<compile_context>
chip_gen: v7x
topology: tpu7x:2x2x1
jax: 0.10.0
libtpu: 0.0.40
codegen_flags: <defaults>
</compile_context>

<pallas_src>
import math
import jax
import jax.numpy as jnp
from jax import lax
from jax.experimental import pallas as pl
from jax.experimental.pallas import tpu as pltpu


# ----------------------------------------------------------------------------
# plain-JAX glue: sample_and_group (FPS + ball query + gather)
# ----------------------------------------------------------------------------
def square_distance(src, dst):
    # src [B, M, C], dst [B, N, C] -> [B, M, N]
    d = -2.0 * jnp.einsum("bmc,bnc->bmn", src, dst)
    d = d + jnp.sum(src ** 2, -1)[:, :, None]
    d = d + jnp.sum(dst ** 2, -1)[:, None, :]
    return d


def index_points(points, idx):
    # points [B, N, C], idx [B, ...] -> [B, ..., C]
    B = points.shape[0]
    flat_idx = idx.reshape(B, -1)
    out = jnp.take_along_axis(points, flat_idx[..., None], axis=1)
    return out.reshape(idx.shape + (points.shape[-1],))


def farthest_point_sample(xyz, npoint):
    B, N, _ = xyz.shape
    distance = jnp.full((B, N), 1e10, dtype=xyz.dtype)
    # torch uses randint for the seed point; fixed to 0 for determinism
    farthest = jnp.zeros((B,), dtype=jnp.int32)
    centroids = jnp.zeros((B, npoint), dtype=jnp.int32)
    batch = jnp.arange(B)

    def body(i, carry):
        distance, farthest, centroids = carry
        centroids = centroids.at[:, i].set(farthest)
        centroid = xyz[batch, farthest]                     # [B, 3]
        dist = jnp.sum((xyz - centroid[:, None, :]) ** 2, -1)
        distance = jnp.minimum(distance, dist)
        farthest = jnp.argmax(distance, -1).astype(jnp.int32)
        return distance, farthest, centroids

    _, _, centroids = lax.fori_loop(0, npoint, body, (distance, farthest, centroids))
    return centroids


def query_ball_point(radius, nsample, xyz, new_xyz):
    B, N, _ = xyz.shape
    S = new_xyz.shape[1]
    sqrdists = square_distance(new_xyz, xyz)                # [B, S, N]
    group_idx = jnp.broadcast_to(jnp.arange(N, dtype=jnp.int32), (B, S, N))
    group_idx = jnp.where(sqrdists > radius ** 2, N, group_idx)
    group_idx = jnp.sort(group_idx, axis=-1)[:, :, :nsample]
    group_first = group_idx[:, :, 0:1]
    group_idx = jnp.where(group_idx == N, group_first, group_idx)
    return group_idx


def sample_and_group(npoint, radius, nsample, xyz, points):
    B, N, _ = xyz.shape
    fps_idx = farthest_point_sample(xyz, npoint)            # [B, S]
    new_xyz = index_points(xyz, fps_idx)                    # [B, S, 3]
    idx = query_ball_point(radius, nsample, xyz, new_xyz)   # [B, S, ns]
    grouped_xyz = index_points(xyz, idx)                    # [B, S, ns, 3]
    grouped_xyz_norm = grouped_xyz - new_xyz[:, :, None, :]
    grouped_points = index_points(points, idx)              # [B, S, ns, D]
    new_points = jnp.concatenate([grouped_xyz_norm, grouped_points], axis=-1)
    return new_xyz, new_points                              # [B,S,3], [B,S,ns,3+D]


# ----------------------------------------------------------------------------
# Pallas kernel: Transformer block + 1x1-conv/BN/ReLU MLP + max over nsample
# Processes TILE_G groups per grid step.
# ----------------------------------------------------------------------------
def _make_kernel(num_mlp, d_model, tile_g, ns, cin):
    inv_sqrt = 1.0 / math.sqrt(d_model)
    rows = tile_g * ns

    def kernel(grp_ref, w1_ref, b1_ref, wqkv_ref, w2_ref, b2_ref, *rest):
        out_ref = rest[-1]
        layer_refs = rest[:-1]          # triplets of (W^T bf16, bn_scale, bn_shift)

        # (tile_g, ns, cin) -> (rows, cin); all linear layers act on channels (last dim)
        x = grp_ref[...].reshape(rows, cin).astype(jnp.bfloat16)

        # --- TransformerBlock ---
        # fc1
        h = jnp.dot(x, w1_ref[...], preferred_element_type=jnp.float32) + b1_ref[...]
        hb = h.astype(jnp.bfloat16)

        # fused q|k|v projection: one wide (rows, 3*d_model) matmul
        qkv = jnp.dot(hb, wqkv_ref[...], preferred_element_type=jnp.float32)
        q = qkv[:, :d_model].reshape(tile_g, ns, d_model).astype(jnp.bfloat16)
        k = qkv[:, d_model:2 * d_model].reshape(tile_g, ns, d_model).astype(jnp.bfloat16)
        v = qkv[:, 2 * d_model:].reshape(tile_g, ns, d_model).astype(jnp.bfloat16)

        # per-group scaled dot-product attention over the nsample axis
        attn = jnp.einsum("gqd,gkd->gqk", q, k,
                          preferred_element_type=jnp.float32) * inv_sqrt
        attn = attn - jnp.max(attn, axis=-1, keepdims=True)
        attn = jnp.exp(attn)
        attn = attn * pl.reciprocal(jnp.sum(attn, axis=-1, keepdims=True), approx=True)
        res = jnp.einsum("gqk,gkd->gqd", attn.astype(jnp.bfloat16), v,
                         preferred_element_type=jnp.float32)
        res = res.reshape(rows, d_model).astype(jnp.bfloat16)

        # fc2 + ReLU
        y = jnp.maximum(
            jnp.dot(res, w2_ref[...], preferred_element_type=jnp.float32) + b2_ref[...],
            0.0)

        # --- MLP: 1x1 Conv2d over channels + BN(eval, folded) + ReLU ---
        for li in range(num_mlp):
            w = layer_refs[3 * li][...]
            sc = layer_refs[3 * li + 1][...]
            sh = layer_refs[3 * li + 2][...]
            y = jnp.maximum(
                jnp.dot(y.astype(jnp.bfloat16), w,
                        preferred_element_type=jnp.float32) * sc + sh,
                0.0)

        # --- max over the nsample axis, per group; lane-dense (tile_g, C_pad) store ---
        out_ref[...] = jnp.max(y.reshape(tile_g, ns, y.shape[-1]), axis=1)

    return kernel


def _const_spec(shape):
    nd = len(shape)
    return pl.BlockSpec(shape, lambda i, _nd=nd: (0,) * _nd)


def set_abstraction_forward(xyz, points, params, *, npoint, radius, nsample, mlp):
    new_xyz, new_points = sample_and_group(npoint, radius, nsample, xyz, points)
    B, S, ns, Cin = new_points.shape
    BS = B * S

    d_model = params["wq"].shape[0]
    C_last = mlp[-1]
    C_pad = ((C_last + 127) // 128) * 128
    eps = 1e-5

    # pick group tile: aim for M = tile_g * ns ~ 256 rows (MXU-shaped on v5e..v7x)
    tile_g = max(1, 256 // ns)
    if BS <= tile_g:
        tile_g = BS                       # single step; output block = full dims
    else:
        tile_g = max(8, (tile_g // 8) * 8)  # keep output sublane dim a multiple of 8
    n_tiles = (BS + tile_g - 1) // tile_g
    BS_pad = n_tiles * tile_g

    grp = new_points.reshape(BS, ns, Cin).astype(jnp.float32)
    if BS_pad != BS:
        grp = jnp.pad(grp, ((0, BS_pad - BS), (0, 0), (0, 0)))

    # fold conv bias + BatchNorm(eval) into per-channel scale/shift; pre-transpose W (bf16);
    # pad the last layer's output channels to a lane-dense multiple of 128
    layer_inputs = []
    for li in range(len(mlp)):
        W = params[f"conv{li}_w"]                 # [Cout, Cin_l]
        b = params[f"conv{li}_b"]                 # [Cout]
        gamma, beta = params[f"bn{li}_gamma"], params[f"bn{li}_beta"]
        mean, var = params[f"bn{li}_mean"], params[f"bn{li}_var"]
        scale = gamma / jnp.sqrt(var + eps)
        shift = (b - mean) * scale + beta
        Wt = W.T.astype(jnp.bfloat16)
        scale = scale.reshape(1, -1).astype(jnp.float32)
        shift = shift.reshape(1, -1).astype(jnp.float32)
        if li == len(mlp) - 1 and C_pad != C_last:
            Wt = jnp.pad(Wt, ((0, 0), (0, C_pad - C_last)))
            scale = jnp.pad(scale, ((0, 0), (0, C_pad - C_last)))
            shift = jnp.pad(shift, ((0, 0), (0, C_pad - C_last)))
        layer_inputs += [Wt, scale, shift]

    # fused q|k|v weight (cast once here, not per grid step)
    wqkv = jnp.concatenate([params["wq"], params["wk"], params["wv"]], axis=1)

    args = [grp,
            params["w1"].astype(jnp.bfloat16),
            params["b1"].astype(jnp.float32),
            wqkv.astype(jnp.bfloat16),
            params["w2"].astype(jnp.bfloat16),
            params["b2"].astype(jnp.float32)] + layer_inputs

    kernel = _make_kernel(len(mlp), d_model, tile_g, ns, Cin)

    in_specs = [pl.BlockSpec((tile_g, ns, Cin), lambda i: (i, 0, 0))]
    in_specs += [_const_spec(a.shape) for a in args[1:]]

    out = pl.pallas_call(
        kernel,
        out_shape=jax.ShapeDtypeStruct((BS_pad, C_pad), jnp.float32),
        grid=(n_tiles,),
        in_specs=in_specs,
        out_specs=pl.BlockSpec((tile_g, C_pad), lambda i: (i, 0)),
        compiler_params=pltpu.CompilerParams(dimension_semantics=("parallel",)),
    )(*args)

    # matches torch.max(..., 2)[0].transpose(1, 2)
    new_feats = out[:BS, :C_last].reshape(B, S, C_last)
    return new_xyz, new_feats


# ----------------------------------------------------------------------------
# deterministic parameter init (shapes follow the module's __init__)
# ----------------------------------------------------------------------------
def init_params(key, in_channel, mlp, d_model=512):
    ks = jax.random.split(key, 8 + 2 * len(mlp))
    p = {
        # TransformerBlock(d_points=in_channel, d_model=512, k=16); weights in (in, out) layout
        "w1": 0.05 * jax.random.normal(ks[0], (in_channel, d_model), jnp.float32),
        "b1": 0.05 * jax.random.normal(ks[1], (1, d_model), jnp.float32),
        "wq": 0.05 * jax.random.normal(ks[2], (d_model, d_model), jnp.float32),
        "wk": 0.05 * jax.random.normal(ks[3], (d_model, d_model), jnp.float32),
        "wv": 0.05 * jax.random.normal(ks[4], (d_model, d_model), jnp.float32),
        "w2": 0.05 * jax.random.normal(ks[5], (d_model, in_channel), jnp.float32),
        "b2": 0.05 * jax.random.normal(ks[6], (1, in_channel), jnp.float32),
    }
    last = in_channel
    for li, cout in enumerate(mlp):
        p[f"conv{li}_w"] = 0.1 * jax.random.normal(ks[7 + 2 * li], (cout, last), jnp.float32)
        p[f"conv{li}_b"] = 0.1 * jax.random.normal(ks[8 + 2 * li], (cout,), jnp.float32)
        p[f"bn{li}_gamma"] = jnp.ones((cout,), jnp.float32)
        p[f"bn{li}_beta"] = jnp.zeros((cout,), jnp.float32)
        p[f"bn{li}_mean"] = jnp.zeros((cout,), jnp.float32)
        p[f"bn{li}_var"] = jnp.ones((cout,), jnp.float32)
        last = cout
    return p


if __name__ == "__main__":
    # small shapes consistent with the module's forward
    B, N = 2, 32
    D_points = 5
    in_channel = 3 + D_points          # grouped features = concat(xyz_norm, point feats)
    npoint, radius, nsample = 8, 0.5, 8
    mlp = [32, 64]
    d_model = 512                      # fixed by TransformerBlock(in_channel, 512, 16)

    key = jax.random.PRNGKey(0)
    k_xyz, k_pts, k_par = jax.random.split(key, 3)
    xyz = jax.random.uniform(k_xyz, (B, N, 3), dtype=jnp.float32)
    points = jax.random.normal(k_pts, (B, N, D_points), dtype=jnp.float32)

    params = init_params(k_par, in_channel, mlp, d_model)

    new_xyz, new_feats = set_abstraction_forward(
        xyz, points, params, npoint=npoint, radius=radius, nsample=nsample, mlp=mlp)
    jax.block_until_ready((new_xyz, new_feats))

    assert new_xyz.shape == (B, npoint, 3)
    assert new_feats.shape == (B, npoint, mlp[-1])
    assert bool(jnp.all(jnp.isfinite(new_feats)))
    print("KERNEL_OK")
</pallas_src>

<mosaic_0001>
module attributes {stable_mosaic.version = 11 : i64} {
  func.func @kernel(%arg0: i32, %arg1: memref<16x8x8xf32, #tpu.memory_space<vmem>>, %arg2: memref<8x512xbf16, #tpu.memory_space<vmem>>, %arg3: memref<1x512xf32, #tpu.memory_space<vmem>>, %arg4: memref<512x1536xbf16, #tpu.memory_space<vmem>>, %arg5: memref<512x8xbf16, #tpu.memory_space<vmem>>, %arg6: memref<1x8xf32, #tpu.memory_space<vmem>>, %arg7: memref<8x32xbf16, #tpu.memory_space<vmem>>, %arg8: memref<1x32xf32, #tpu.memory_space<vmem>>, %arg9: memref<1x32xf32, #tpu.memory_space<vmem>>, %arg10: memref<32x128xbf16, #tpu.memory_space<vmem>>, %arg11: memref<1x128xf32, #tpu.memory_space<vmem>>, %arg12: memref<1x128xf32, #tpu.memory_space<vmem>>, %arg13: memref<16x128xf32, #tpu.memory_space<vmem>>) attributes {dimension_semantics = [#tpu.dimension_semantics<parallel>], iteration_bounds = array<i64: 1>, scalar_prefetch = 0 : i64, scratch_operands = 0 : i64, tpu.core_type = #tpu.core_type<tc>, window_params = [{transform_indices = @transform_0, window_bounds = array<i64: 16, 8, 8>}, {pipeline_mode = #tpu.pipeline_mode<synchronous>, transform_indices = @transform_1, window_bounds = array<i64: 8, 512>}, {pipeline_mode = #tpu.pipeline_mode<synchronous>, transform_indices = @transform_2, window_bounds = array<i64: 1, 512>}, {pipeline_mode = #tpu.pipeline_mode<synchronous>, transform_indices = @transform_3, window_bounds = array<i64: 512, 1536>}, {pipeline_mode = #tpu.pipeline_mode<synchronous>, transform_indices = @transform_4, window_bounds = array<i64: 512, 8>}, {pipeline_mode = #tpu.pipeline_mode<synchronous>, transform_indices = @transform_5, window_bounds = array<i64: 1, 8>}, {pipeline_mode = #tpu.pipeline_mode<synchronous>, transform_indices = @transform_6, window_bounds = array<i64: 8, 32>}, {pipeline_mode = #tpu.pipeline_mode<synchronous>, transform_indices = @transform_7, window_bounds = array<i64: 1, 32>}, {pipeline_mode = #tpu.pipeline_mode<synchronous>, transform_indices = @transform_8, window_bounds = array<i64: 1, 32>}, {pipeline_mode = #tpu.pipeline_mode<synchronous>, transform_indices = @transform_9, window_bounds = array<i64: 32, 128>}, {pipeline_mode = #tpu.pipeline_mode<synchronous>, transform_indices = @transform_10, window_bounds = array<i64: 1, 128>}, {pipeline_mode = #tpu.pipeline_mode<synchronous>, transform_indices = @transform_11, window_bounds = array<i64: 1, 128>}, {transform_indices = @transform_12, window_bounds = array<i64: 16, 128>}]} {
    %c0 = arith.constant 0 : index
    %c0_0 = arith.constant 0 : index
    %c0_1 = arith.constant 0 : index
    %0 = vector.load %arg1[%c0, %c0_0, %c0_1] : memref<16x8x8xf32, #tpu.memory_space<vmem>>, vector<16x8x8xf32>
    %1 = vector.shape_cast %0 : vector<16x8x8xf32> to vector<128x8xf32>
    %2 = arith.truncf %1 : vector<128x8xf32> to vector<128x8xbf16>
    %c0_2 = arith.constant 0 : index
    %c0_3 = arith.constant 0 : index
    %3 = vector.load %arg2[%c0_2, %c0_3] : memref<8x512xbf16, #tpu.memory_space<vmem>>, vector<8x512xbf16>
    %cst = arith.constant dense<0.000000e+00> : vector<128x512xf32>
    %4 = tpu.matmul %2, %3, %cst {dimension_numbers = #tpu.dot_dimension_numbers<[1], [0], [0], [1], [0, 0, 1, 1], [], []>} : vector<128x8xbf16>, vector<8x512xbf16>, vector<128x512xf32> -> vector<128x512xf32>
    %c0_4 = arith.constant 0 : index
    %c0_5 = arith.constant 0 : index
    %5 = vector.load %arg3[%c0_4, %c0_5] : memref<1x512xf32, #tpu.memory_space<vmem>>, vector<1x512xf32>
    %6 = vector.broadcast %5 : vector<1x512xf32> to vector<128x512xf32>
    %7 = arith.addf %4, %6 : vector<128x512xf32>
    %8 = arith.truncf %7 : vector<128x512xf32> to vector<128x512xbf16>
    %c0_6 = arith.constant 0 : index
    %c0_7 = arith.constant 0 : index
    %9 = vector.load %arg4[%c0_6, %c0_7] : memref<512x1536xbf16, #tpu.memory_space<vmem>>, vector<512x1536xbf16>
    %cst_8 = arith.constant dense<0.000000e+00> : vector<128x1536xf32>
    %10 = tpu.matmul %8, %9, %cst_8 {dimension_numbers = #tpu.dot_dimension_numbers<[1], [0], [0], [1], [0, 0, 1, 1], [], []>} : vector<128x512xbf16>, vector<512x1536xbf16>, vector<128x1536xf32> -> vector<128x1536xf32>
    %11 = vector.extract_strided_slice %10 {offsets = [0, 0], sizes = [128, 512], strides = [1, 1]} : vector<128x1536xf32> to vector<128x512xf32>
    %12 = vector.shape_cast %11 : vector<128x512xf32> to vector<16x8x512xf32>
    %13 = arith.truncf %12 : vector<16x8x512xf32> to vector<16x8x512xbf16>
    %14 = vector.extract_strided_slice %10 {offsets = [0, 512], sizes = [128, 512], strides = [1, 1]} : vector<128x1536xf32> to vector<128x512xf32>
    %15 = vector.shape_cast %14 : vector<128x512xf32> to vector<16x8x512xf32>
    %16 = arith.truncf %15 : vector<16x8x512xf32> to vector<16x8x512xbf16>
    %17 = vector.extract_strided_slice %10 {offsets = [0, 1024], sizes = [128, 512], strides = [1, 1]} : vector<128x1536xf32> to vector<128x512xf32>
    %18 = vector.shape_cast %17 : vector<128x512xf32> to vector<16x8x512xf32>
    %19 = arith.truncf %18 : vector<16x8x512xf32> to vector<16x8x512xbf16>
    "tpu.trace_start"() <{level = 10 : i32, message = "gqd,gkd->gqk"}> : () -> ()
    %cst_9 = arith.constant dense<0.000000e+00> : vector<16x8x8xf32>
    %20 = tpu.matmul %13, %16, %cst_9 {dimension_numbers = #tpu.dot_dimension_numbers<[2], [2], [1], [1], [0, 0, 0, 1, 1, 1], [0], [0]>} : vector<16x8x512xbf16>, vector<16x8x512xbf16>, vector<16x8x8xf32> -> vector<16x8x8xf32>
    "tpu.trace_stop"() : () -> ()
    %cst_10 = arith.constant 0.0441941731 : f32
    %21 = vector.broadcast %cst_10 : f32 to vector<16x8x8xf32>
    %22 = arith.mulf %20, %21 : vector<16x8x8xf32>
    %cst_11 = arith.constant dense<0xFF800000> : vector<16x8xf32>
    %23 = vector.multi_reduction <maximumf>, %22, %cst_11 [2] : vector<16x8x8xf32> to vector<16x8xf32>
    %24 = vector.shape_cast %23 : vector<16x8xf32> to vector<16x8x1xf32>
    %25 = vector.broadcast %24 : vector<16x8x1xf32> to vector<16x8x8xf32>
    %26 = arith.subf %22, %25 : vector<16x8x8xf32>
    %27 = math.exp %26 : vector<16x8x8xf32>
    %cst_12 = arith.constant dense<0.000000e+00> : vector<16x8xf32>
    %28 = vector.multi_reduction <add>, %27, %cst_12 [2] : vector<16x8x8xf32> to vector<16x8xf32>
    %29 = vector.shape_cast %28 : vector<16x8xf32> to vector<16x8x1xf32>
    %30 = tpu.reciprocal %29 {approx = true} : vector<16x8x1xf32> -> vector<16x8x1xf32>
    %31 = vector.broadcast %30 : vector<16x8x1xf32> to vector<16x8x8xf32>
    %32 = arith.mulf %27, %31 : vector<16x8x8xf32>
    %33 = arith.truncf %32 : vector<16x8x8xf32> to vector<16x8x8xbf16>
    "tpu.trace_start"() <{level = 10 : i32, message = "gqk,gkd->gqd"}> : () -> ()
    %cst_13 = arith.constant dense<0.000000e+00> : vector<16x8x512xf32>
    %34 = tpu.matmul %33, %19, %cst_13 {dimension_numbers = #tpu.dot_dimension_numbers<[2], [1], [1], [2], [0, 0, 0, 1, 1, 2], [0], [0]>} : vector<16x8x8xbf16>, vector<16x8x512xbf16>, vector<16x8x512xf32> -> vector<16x8x512xf32>
    "tpu.trace_stop"() : () -> ()
    %35 = vector.shape_cast %34 : vector<16x8x512xf32> to vector<128x512xf32>
    %36 = arith.truncf %35 : vector<128x512xf32> to vector<128x512xbf16>
    %c0_14 = arith.constant 0 : index
    %c0_15 = arith.constant 0 : index
    %37 = vector.load %arg5[%c0_14, %c0_15] : memref<512x8xbf16, #tpu.memory_space<vmem>>, vector<512x8xbf16>
    %cst_16 = arith.constant dense<0.000000e+00> : vector<128x8xf32>
    %38 = tpu.matmul %36, %37, %cst_16 {dimension_numbers = #tpu.dot_dimension_numbers<[1], [0], [0], [1], [0, 0, 1, 1], [], []>} : vector<128x512xbf16>, vector<512x8xbf16>, vector<128x8xf32> -> vector<128x8xf32>
    %c0_17 = arith.constant 0 : index
    %c0_18 = arith.constant 0 : index
    %39 = vector.load %arg6[%c0_17, %c0_18] : memref<1x8xf32, #tpu.memory_space<vmem>>, vector<1x8xf32>
    %40 = vector.broadcast %39 : vector<1x8xf32> to vector<128x8xf32>
    %41 = arith.addf %38, %40 : vector<128x8xf32>
    %cst_19 = arith.constant 0.000000e+00 : f32
    %42 = vector.broadcast %cst_19 : f32 to vector<128x8xf32>
    %43 = arith.maximumf %41, %42 : vector<128x8xf32>
    %c0_20 = arith.constant 0 : index
    %c0_21 = arith.constant 0 : index
    %44 = vector.load %arg7[%c0_20, %c0_21] : memref<8x32xbf16, #tpu.memory_space<vmem>>, vector<8x32xbf16>
    %c0_22 = arith.constant 0 : index
    %c0_23 = arith.constant 0 : index
    %45 = vector.load %arg8[%c0_22, %c0_23] : memref<1x32xf32, #tpu.memory_space<vmem>>, vector<1x32xf32>
    %c0_24 = arith.constant 0 : index
    %c0_25 = arith.constant 0 : index
    %46 = vector.load %arg9[%c0_24, %c0_25] : memref<1x32xf32, #tpu.memory_space<vmem>>, vector<1x32xf32>
    %47 = arith.truncf %43 : vector<128x8xf32> to vector<128x8xbf16>
    %cst_26 = arith.constant dense<0.000000e+00> : vector<128x32xf32>
    %48 = tpu.matmul %47, %44, %cst_26 {dimension_numbers = #tpu.dot_dimension_numbers<[1], [0], [0], [1], [0, 0, 1, 1], [], []>} : vector<128x8xbf16>, vector<8x32xbf16>, vector<128x32xf32> -> vector<128x32xf32>
    %49 = vector.broadcast %45 : vector<1x32xf32> to vector<128x32xf32>
    %50 = arith.mulf %48, %49 : vector<128x32xf32>
    %51 = vector.broadcast %46 : vector<1x32xf32> to vector<128x32xf32>
    %52 = arith.addf %50, %51 : vector<128x32xf32>
    %cst_27 = arith.constant 0.000000e+00 : f32
    %53 = vector.broadcast %cst_27 : f32 to vector<128x32xf32>
    %54 = arith.maximumf %52, %53 : vector<128x32xf32>
    %c0_28 = arith.constant 0 : index
    %c0_29 = arith.constant 0 : index
    %55 = vector.load %arg10[%c0_28, %c0_29] : memref<32x128xbf16, #tpu.memory_space<vmem>>, vector<32x128xbf16>
    %c0_30 = arith.constant 0 : index
    %c0_31 = arith.constant 0 : index
    %56 = vector.load %arg11[%c0_30, %c0_31] : memref<1x128xf32, #tpu.memory_space<vmem>>, vector<1x128xf32>
    %c0_32 = arith.constant 0 : index
    %c0_33 = arith.constant 0 : index
    %57 = vector.load %arg12[%c0_32, %c0_33] : memref<1x128xf32, #tpu.memory_space<vmem>>, vector<1x128xf32>
    %58 = arith.truncf %54 : vector<128x32xf32> to vector<128x32xbf16>
    %cst_34 = arith.constant dense<0.000000e+00> : vector<128x128xf32>
    %59 = tpu.matmul %58, %55, %cst_34 {dimension_numbers = #tpu.dot_dimension_numbers<[1], [0], [0], [1], [0, 0, 1, 1], [], []>} : vector<128x32xbf16>, vector<32x128xbf16>, vector<128x128xf32> -> vector<128x128xf32>
    %60 = vector.broadcast %56 : vector<1x128xf32> to vector<128x128xf32>
    %61 = arith.mulf %59, %60 : vector<128x128xf32>
    %62 = vector.broadcast %57 : vector<1x128xf32> to vector<128x128xf32>
    %63 = arith.addf %61, %62 : vector<128x128xf32>
    %cst_35 = arith.constant 0.000000e+00 : f32
    %64 = vector.broadcast %cst_35 : f32 to vector<128x128xf32>
    %65 = arith.maximumf %63, %64 : vector<128x128xf32>
    %66 = vector.shape_cast %65 : vector<128x128xf32> to vector<16x8x128xf32>
    %cst_36 = arith.constant dense<0xFF800000> : vector<16x128xf32>
    %67 = vector.multi_reduction <maximumf>, %66, %cst_36 [1] : vector<16x8x128xf32> to vector<16x128xf32>
    %c0_37 = arith.constant 0 : index
    %c0_38 = arith.constant 0 : index
    %68 = vector.load %arg13[%c0_37, %c0_38] : memref<16x128xf32, #tpu.memory_space<vmem>>, vector<16x128xf32>
    tpu.vector_store %arg13[%c0_37, %c0_38], %67 {strides = array<i32>} : memref<16x128xf32, #tpu.memory_space<vmem>>, vector<16x128xf32>,
    return
  }
  func.func @transform_0(%arg0: i32) -> (i32, i32, i32) {
    %c0_i32 = arith.constant 0 : i32
    %c0_i32_0 = arith.constant 0 : i32
    %c0_i32_1 = arith.constant 0 : i32
    return %arg0, %c0_i32, %c0_i32_0 : i32, i32, i32
  }
  func.func @transform_1(%arg0: i32) -> (i32, i32) {
    %c0_i32 = arith.constant 0 : i32
    %c0_i32_0 = arith.constant 0 : i32
    %c0_i32_1 = arith.constant 0 : i32
    return %c0_i32, %c0_i32_0 : i32, i32
  }
  func.func @transform_2(%arg0: i32) -> (i32, i32) {
    %c0_i32 = arith.constant 0 : i32
    %c0_i32_0 = arith.constant 0 : i32
    %c0_i32_1 = arith.constant 0 : i32
    return %c0_i32, %c0_i32_0 : i32, i32
  }
  func.func @transform_3(%arg0: i32) -> (i32, i32) {
    %c0_i32 = arith.constant 0 : i32
    %c0_i32_0 = arith.constant 0 : i32
    %c0_i32_1 = arith.constant 0 : i32
    return %c0_i32, %c0_i32_0 : i32, i32
  }
  func.func @transform_4(%arg0: i32) -> (i32, i32) {
    %c0_i32 = arith.constant 0 : i32
    %c0_i32_0 = arith.constant 0 : i32
    %c0_i32_1 = arith.constant 0 : i32
    return %c0_i32, %c0_i32_0 : i32, i32
  }
  func.func @transform_5(%arg0: i32) -> (i32, i32) {
    %c0_i32 = arith.constant 0 : i32
    %c0_i32_0 = arith.constant 0 : i32
    %c0_i32_1 = arith.constant 0 : i32
    return %c0_i32, %c0_i32_0 : i32, i32
  }
  func.func @transform_6(%arg0: i32) -> (i32, i32) {
    %c0_i32 = arith.constant 0 : i32
    %c0_i32_0 = arith.constant 0 : i32
    %c0_i32_1 = arith.constant 0 : i32
    return %c0_i32, %c0_i32_0 : i32, i32
  }
  func.func @transform_7(%arg0: i32) -> (i32, i32) {
    %c0_i32 = arith.constant 0 : i32
    %c0_i32_0 = arith.constant 0 : i32
    %c0_i32_1 = arith.constant 0 : i32
    return %c0_i32, %c0_i32_0 : i32, i32
  }
  func.func @transform_8(%arg0: i32) -> (i32, i32) {
    %c0_i32 = arith.constant 0 : i32
    %c0_i32_0 = arith.constant 0 : i32
    %c0_i32_1 = arith.constant 0 : i32
    return %c0_i32, %c0_i32_0 : i32, i32
  }
  func.func @transform_9(%arg0: i32) -> (i32, i32) {
    %c0_i32 = arith.constant 0 : i32
    %c0_i32_0 = arith.constant 0 : i32
    %c0_i32_1 = arith.constant 0 : i32
    return %c0_i32, %c0_i32_0 : i32, i32
  }
  func.func @transform_10(%arg0: i32) -> (i32, i32) {
    %c0_i32 = arith.constant 0 : i32
    %c0_i32_0 = arith.constant 0 : i32
    %c0_i32_1 = arith.constant 0 : i32
    return %c0_i32, %c0_i32_0 : i32, i32
  }
  func.func @transform_11(%arg0: i32) -> (i32, i32) {
    %c0_i32 = arith.constant 0 : i32
    %c0_i32_0 = arith.constant 0 : i32
    %c0_i32_1 = arith.constant 0 : i32
    return %c0_i32, %c0_i32_0 : i32, i32
  }
  func.func @transform_12(%arg0: i32) -> (i32, i32) {
    %c0_i32 = arith.constant 0 : i32
    %c0_i32_0 = arith.constant 0 : i32
    return %arg0, %c0_i32 : i32, i32
  }
}

</mosaic_0001>

<bundles_post_ra>
// kernel: tpu_custom_call.1
= control target key start
LH: loop header
LB: loop body
LE: loop exit
PB: predicated region body
PF: predicated region fallthrough
CT: control target
= control target key end

     0   :  { %17 = vsyncpa [#allocation3], 0  ;;  %s12246_s0 = inlined_call_operand.vmem [shape: f32[16,8,8], index: 0, kind: input, shape index: {}]   ;;  %s12247_s1 = inlined_call_operand.hbm [shape: bf16[8,512], index: 1, kind: input, shape index: {}]   ;;  %s12248_s2 = inlined_call_operand.hbm [shape: f32[1,512], index: 2, kind: input, shape index: {}]   ;;  %s12249_s3 = inlined_call_operand.hbm [shape: bf16[512,1536], index: 3, kind: input, shape index: {}]   ;;  %s12250_s4 = inlined_call_operand.vmem [shape: bf16[512,8], index: 4, kind: input, shape index: {}]   ;;  %s12251_s5 = inlined_call_operand.hbm [shape: f32[1,8], index: 5, kind: input, shape index: {}]   ;;  %s12252_s6 = inlined_call_operand.hbm [shape: bf16[8,32], index: 6, kind: input, shape index: {}]   ;;  %s12253_s7 = inlined_call_operand.hbm [shape: f32[1,32], index: 7, kind: input, shape index: {}]   ;;  %s12254_s8 = inlined_call_operand.hbm [shape: f32[1,32], index: 8, kind: input, shape index: {}]   ;;  %s12255_s9 = inlined_call_operand.hbm [shape: bf16[32,128], index: 9, kind: input, shape index: {}]   ;;  %s12256_s10 = inlined_call_operand.hbm [shape: f32[1,128], index: 10, kind: input, shape index: {}]   ;;  %s12257_s11 = inlined_call_operand.hbm [shape: f32[1,128], index: 11, kind: input, shape index: {}]   ;;  %s12258_s12 = inlined_call_operand.hbm [shape: f32[16,128], index: 12, kind: output, shape index: {}]  }
   0x1   :  { %18 = vsyncpa [#allocation6], 0 }
   0x2   :  { %19 = vsyncpa [#allocation9], 0 }
   0x3   :  { %20 = vsyncpa [#allocation12], 0 }
   0x4   :  { %21 = vsyncpa [#allocation15], 0 }
   0x5   :  { %22 = vsyncpa [#allocation18], 0 }
   0x6   :  { %23 = vsyncpa [#allocation4], 0  ;;  %s10395_s21 = smov [#allocation5]   ;;  %s10396_s23 = smov [#allocation8]  }
   0x7   :  { %s42_s22 = sshll.u32 %s10395_s21, 4  ;;  %s66_s24 = sshll.u32 %s10396_s23, 4  ;;  %s43_s22 = int_to_ptr.vmem [resolvable:$true] %s42_s22  ;;  %s67_s24 = int_to_ptr.vmem [resolvable:$true] %s66_s24 }
   0x8   :  { %s10139_s27 = scalar_lea.hbm %s12248_s2, 64 }
   0x9   :  { %p10140_p0 = scmp.ne.s32.totalorder %s12248_s2, %s10139_s27  ;;  %p10143_p1 = scmp.lt.u32.totalorder %s10139_s27, %s12248_s2 }
   0xb   :  { %p10145_p2 = pnand %p10143_p1, %p10140_p0 }
   0xd   :  { %10148 = shalt.err (!%p10145_p2)
}
   0xe   :  { %s10149_s14 = scalar_lea.vmem %s43_s22, 64  ;;  %p10154_p4 = scmp.lt.s32.totalorder %s43_s22, %s43_s22 }
   0xf   :  { %p10150_p3 = scmp.ne.s32.totalorder %s43_s22, %s10149_s14  ;;  %p10155_p5 = scmp.lt.s32.totalorder %s10149_s14, %s10149_s14 }
  0x11   :  { %p10156_p6 = por %p10155_p5, %p10154_p4 }
  0x13   :  { %p10157_p7 = pnand %p10156_p6, %p10150_p3 }
  0x15   :  { %10160 = shalt.err (!%p10157_p7)
}
  0x16   :  { %45 = dma.hbm_to_vmem [thread:$0]  %s12248_s2, 64, %s43_s22, [#allocation6]  }
  0x17   :  { %s10161_s19 = scalar_lea.hbm %s12251_s5, 16 }
  0x18   :  { %p10162_p8 = scmp.ne.s32.totalorder %s12251_s5, %s10161_s19  ;;  %p10165_p9 = scmp.lt.u32.totalorder %s10161_s19, %s12251_s5 }
  0x1a   :  { %p10167_p10 = pnand %p10165_p9, %p10162_p8 }
  0x1c   :  { %10170 = shalt.err (!%p10167_p10)
}
  0x1d   :  { %s10171_s26 = scalar_lea.vmem %s67_s24, 16  ;;  %s10175_s27 = scalar_lea.vmem %s67_s24, 32 }
  0x1e   :  { %p10172_p11 = scmp.ne.s32.totalorder %s67_s24, %s10171_s26  ;;  %p10176_p12 = scmp.lt.s32.totalorder %s67_s24, %s67_s24 }
  0x1f   :  { %p10177_p13 = scmp.lt.s32.totalorder %s10175_s27, %s10171_s26 }
  0x21   :  { %p10178_p0 = por %p10177_p13, %p10176_p12 }
  0x23   :  { %p10179_p1 = pnand %p10178_p0, %p10172_p11 }
  0x25   :  { %10182 = shalt.err (!%p10179_p1)
}
  0x26   :  { %69 = dma.hbm_to_vmem [thread:$0]  %s12251_s5, 16, %s67_s24, [#allocation9]  }
  0x27   :  { %s10397_s28 = smov [#allocation11]   ;;  %s10398_s30 = smov [#allocation14]  }
  0x28   :  { %s86_s29 = sshll.u32 %s10397_s28, 4  ;;  %s105_s13 = sshll.u32 %s10398_s30, 4  ;;  %s87_s29 = int_to_ptr.vmem [resolvable:$true] %s86_s29  ;;  %s10502_s13 = int_to_ptr.vmem [resolvable:$true] %s105_s13 }
  0x29   :  { %s10183_s16 = scalar_lea.hbm %s12253_s7, 16 }
  0x2a   :  { %p10184_p2 = scmp.ne.s32.totalorder %s12253_s7, %s10183_s16  ;;  %p10187_p3 = scmp.lt.u32.totalorder %s10183_s16, %s12253_s7 }
  0x2c   :  { %p10189_p4 = pnand %p10187_p3, %p10184_p2 }
  0x2e   :  { %10192 = shalt.err (!%p10189_p4)
}
  0x2f   :  { %s10193_s5 = scalar_lea.vmem %s87_s29, 16  ;;  %s10197_s24 = scalar_lea.vmem %s87_s29, 32 }
  0x30   :  { %p10194_p5 = scmp.ne.s32.totalorder %s87_s29, %s10193_s5  ;;  %p10198_p6 = scmp.lt.s32.totalorder %s87_s29, %s87_s29 }
  0x31   :  { %p10199_p7 = scmp.lt.s32.totalorder %s10197_s24, %s10193_s5 }
  0x33   :  { %p10200_p8 = por %p10199_p7, %p10198_p6 }
  0x35   :  { %p10201_p9 = pnand %p10200_p8, %p10194_p5 }
  0x37   :  { %10204 = shalt.err (!%p10201_p9)
}
  0x38   :  { %89 = dma.hbm_to_vmem [thread:$0]  %s12253_s7, 16, %s87_s29, [#allocation12]  }
  0x39   :  { %s10205_s27 = scalar_lea.hbm %s12255_s9, 256 }
  0x3a   :  { %p10206_p10 = scmp.ne.s32.totalorder %s12255_s9, %s10205_s27  ;;  %p10209_p11 = scmp.lt.u32.totalorder %s10205_s27, %s12255_s9 }
  0x3c   :  { %p10211_p12 = pnand %p10209_p11, %p10206_p10 }
  0x3e   :  { %10214 = shalt.err (!%p10211_p12)
}
  0x3f   :  { %s10215_s14 = scalar_lea.vmem %s10502_s13, 256  ;;  %p10220_p0 = scmp.lt.s32.totalorder %s10502_s13, %s10502_s13 }
  0x40   :  { %p10216_p13 = scmp.ne.s32.totalorder %s10502_s13, %s10215_s14  ;;  %p10221_p1 = scmp.lt.s32.totalorder %s10215_s14, %s10215_s14 }
  0x42   :  { %p10222_p2 = por %p10221_p1, %p10220_p0 }
  0x44   :  { %p10223_p3 = pnand %p10222_p2, %p10216_p13 }
  0x46   :  { %10226 = shalt.err (!%p10223_p3)
}
  0x47   :  { %s10399_s7 = smov 64   ;;  %s10400_s29 = smov 4  }
  0x48   :  { %111 = dma.hbm_to_vmem [thread:$0]  %s12255_s9, 256, %s10502_s13, [#allocation15], %s10399_s7, %s10399_s7, %s10400_s29  }
  0x49   :  { %s10401_s17 = smov [#allocation2]   ;;  %s10402_s19 = smov [#allocation7]  }
  0x4a   :  { %s32_s18 = sshll.u32 %s10401_s17, 4  ;;  %s51_s20 = sshll.u32 %s10402_s19, 4  ;;  %s33_s18 = int_to_ptr.vmem [resolvable:$true] %s32_s18  ;;  %s10533_s20 = int_to_ptr.vmem [resolvable:$true] %s51_s20 }
  0x4b   :  { %s10227_s21 = scalar_lea.hbm %s12247_s1, 256 }
  0x4c   :  { %p10228_p4 = scmp.ne.s32.totalorder %s12247_s1, %s10227_s21  ;;  %p10231_p5 = scmp.lt.u32.totalorder %s10227_s21, %s12247_s1 }
  0x4e   :  { %p10233_p6 = pnand %p10231_p5, %p10228_p4 }
  0x50   :  { %10236 = shalt.err (!%p10233_p6)
}
  0x51   :  { %s10237_s9 = scalar_lea.vmem %s33_s18, 256  ;;  %p10242_p8 = scmp.lt.s32.totalorder %s33_s18, %s33_s18 }
  0x52   :  { %p10238_p7 = scmp.ne.s32.totalorder %s33_s18, %s10237_s9  ;;  %p10243_p9 = scmp.lt.s32.totalorder %s10237_s9, %s10237_s9 }
  0x54   :  { %p10244_p10 = por %p10243_p9, %p10242_p8 }
  0x56   :  { %p10245_p11 = pnand %p10244_p10, %p10238_p7 }
  0x58   :  { %10248 = shalt.err (!%p10245_p11)
}
  0x59   :  { %35 = dma.hbm_to_vmem [thread:$0]  %s12247_s1, 256, %s33_s18, [#allocation3]  }
  0x5a   :  { %s10249_s30 = scalar_lea.hbm %s12249_s3, 49152 }
  0x5b   :  { %p10250_p12 = scmp.ne.s32.totalorder %s12249_s3, %s10249_s30  ;;  %p10253_p13 = scmp.lt.u32.totalorder %s10249_s30, %s12249_s3 }
  0x5d   :  { %p10255_p0 = pnand %p10253_p13, %p10250_p12 }
  0x5f   :  { %10258 = shalt.err (!%p10255_p0)
}
  0x60   :  { %s10259_s16 = scalar_lea.vmem %s10533_s20, 49152  ;;  %p10264_p2 = scmp.lt.s32.totalorder %s10533_s20, %s10533_s20 }
  0x61   :  { %p10260_p1 = scmp.ne.s32.totalorder %s10533_s20, %s10259_s16  ;;  %p10265_p3 = scmp.lt.s32.totalorder %s10259_s16, %s10259_s16 }
  0x63   :  { %p10266_p4 = por %p10265_p3, %p10264_p2 }
  0x65   :  { %p10267_p5 = pnand %p10266_p4, %p10260_p1 }
  0x67   :  { %10270 = shalt.err (!%p10267_p5)
}
  0x68   :  { %s10403_s1 = smov 768   ;;  %s10404_s17 = smov 48  }
  0x69   :  { %57 = dma.hbm_to_vmem [thread:$0]  %s12249_s3, 49152, %s10533_s20, [#allocation6], %s10403_s1, %s10403_s1, %s10404_s17  }
  0x6a   :  { %s10405_s5 = smov [#allocation10]   ;;  %s10406_s21 = smov [#allocation13]  }
  0x6b   :  { %s76_s24 = sshll.u32 %s10405_s5, 4  ;;  %s96_s23 = sshll.u32 %s10406_s21, 4  ;;  %s77_s24 = int_to_ptr.vmem [resolvable:$true] %s76_s24  ;;  %s97_s23 = int_to_ptr.vmem [resolvable:$true] %s96_s23 }
  0x6c   :  { %s10271_s27 = scalar_lea.hbm %s12252_s6, 64 }
  0x6d   :  { %p10272_p6 = scmp.ne.s32.totalorder %s12252_s6, %s10271_s27  ;;  %p10275_p7 = scmp.lt.u32.totalorder %s10271_s27, %s12252_s6 }
  0x6f   :  { %p10277_p8 = pnand %p10275_p7, %p10272_p6 }
  0x71   :  { %10280 = shalt.err (!%p10277_p8)
}
  0x72   :  { %s10281_s3 = scalar_lea.vmem %s77_s24, 64  ;;  %p10286_p10 = scmp.lt.s32.totalorder %s77_s24, %s77_s24 }
  0x73   :  { %p10282_p9 = scmp.ne.s32.totalorder %s77_s24, %s10281_s3  ;;  %p10287_p11 = scmp.lt.s32.totalorder %s10281_s3, %s10281_s3 }
  0x75   :  { %p10288_p12 = por %p10287_p11, %p10286_p10 }
  0x77   :  { %p10289_p13 = pnand %p10288_p12, %p10282_p9 }
  0x79   :  { %10292 = shalt.err (!%p10289_p13)
}
  0x7a   :  { %79 = dma.hbm_to_vmem [thread:$0]  %s12252_s6, 64, %s77_s24, [#allocation9]  }
  0x7b   :  { %s10293_s7 = scalar_lea.hbm %s12254_s8, 16 }
  0x7c   :  { %p10294_p0 = scmp.ne.s32.totalorder %s12254_s8, %s10293_s7  ;;  %p10297_p1 = scmp.lt.u32.totalorder %s10293_s7, %s12254_s8 }
  0x7e   :  { %p10299_p2 = pnand %p10297_p1, %p10294_p0 }
  0x80   :  { %10302 = shalt.err (!%p10299_p2)
}
  0x81   :  { %s10303_s17 = scalar_lea.vmem %s97_s23, 16  ;;  %s10307_s18 = scalar_lea.vmem %s97_s23, 32 }
  0x82   :  { %p10304_p3 = scmp.ne.s32.totalorder %s97_s23, %s10303_s17  ;;  %p10308_p4 = scmp.lt.s32.totalorder %s97_s23, %s97_s23 }
  0x83   :  { %p10309_p5 = scmp.lt.s32.totalorder %s10307_s18, %s10303_s17 }
  0x85   :  { %p10310_p6 = por %p10309_p5, %p10308_p4 }
  0x87   :  { %p10311_p7 = pnand %p10310_p6, %p10304_p3 }
  0x89   :  { %10314 = shalt.err (!%p10311_p7)
}
  0x8a   :  { %99 = dma.hbm_to_vmem [thread:$0]  %s12254_s8, 16, %s97_s23, [#allocation12]  }
  0x8b   :  { %s10407_s5 = smov [#allocation16]   ;;  %s10408_s21 = smov [#allocation17]  }
  0x8c   :  { %s118_s24 = sshll.u32 %s10407_s5, 4  ;;  %s128_s25 = sshll.u32 %s10408_s21, 4  ;;  %s119_s24 = int_to_ptr.vmem [resolvable:$true] %s118_s24  ;;  %s129_s25 = int_to_ptr.vmem [resolvable:$true] %s128_s25 }
  0x8d   :  { %s10315_s9 = scalar_lea.hbm %s12256_s10, 16 }
  0x8e   :  { %p10316_p8 = scmp.ne.s32.totalorder %s12256_s10, %s10315_s9  ;;  %p10319_p9 = scmp.lt.u32.totalorder %s10315_s9, %s12256_s10 }
  0x90   :  { %p10321_p10 = pnand %p10319_p9, %p10316_p8 }
  0x92   :  { %10324 = shalt.err (!%p10321_p10)
}
  0x93   :  { %s10325_s8 = scalar_lea.vmem %s119_s24, 16  ;;  %s10329_s23 = scalar_lea.vmem %s119_s24, 32 }
  0x94   :  { %p10326_p11 = scmp.ne.s32.totalorder %s119_s24, %s10325_s8  ;;  %p10330_p12 = scmp.lt.s32.totalorder %s119_s24, %s119_s24 }
  0x95   :  { %p10331_p13 = scmp.lt.s32.totalorder %s10329_s23, %s10325_s8 }
  0x97   :  { %p10332_p0 = por %p10331_p13, %p10330_p12 }
  0x99   :  { %p10333_p1 = pnand %p10332_p0, %p10326_p11 }
  0x9b   :  { %10336 = shalt.err (!%p10333_p1)
}
  0x9c   :  { %121 = dma.hbm_to_vmem [thread:$0]  %s12256_s10, 16, %s119_s24, [#allocation15]  }
  0x9d   :  { %s10337_s7 = scalar_lea.hbm %s12257_s11, 16 }
  0x9e   :  { %p10338_p2 = scmp.ne.s32.totalorder %s12257_s11, %s10337_s7  ;;  %p10341_p3 = scmp.lt.u32.totalorder %s10337_s7, %s12257_s11 }
  0xa0   :  { %p10343_p4 = pnand %p10341_p3, %p10338_p2 }
  0xa2   :  { %10346 = shalt.err (!%p10343_p4)
}
  0xa3   :  { %s10347_s17 = scalar_lea.vmem %s129_s25, 16  ;;  %s10351_s18 = scalar_lea.vmem %s129_s25, 32 }
  0xa4   :  { %p10348_p5 = scmp.ne.s32.totalorder %s129_s25, %s10347_s17  ;;  %p10352_p6 = scmp.lt.s32.totalorder %s129_s25, %s129_s25 }
  0xa5   :  { %p10353_p7 = scmp.lt.s32.totalorder %s10351_s18, %s10347_s17 }
  0xa7   :  { %p10354_p8 = por %p10353_p7, %p10352_p6 }
  0xa9   :  { %p10355_p9 = pnand %p10354_p8, %p10348_p5 }
  0xab   :  { %10358 = shalt.err (!%p10355_p9)
}
  0xac   :  { %131 = dma.hbm_to_vmem [thread:$0]  %s12257_s11, 16, %s129_s25, [#allocation18]  }
  0xad   :  { %10381 = dma.done.wait [#allocation3], 256  }
  0xae   :  { %10382 = vsyncadd [#allocation3], 4294967040 }
  0xaf   :  { %10383 = dma.done.wait [#allocation6], 49216  }
  0xb0   :  { %10384 = vsyncadd [#allocation6], 4294918080 }
  0xb1   :  { %10385 = dma.done.wait [#allocation9], 80  }
  0xb2   :  { %10386 = vsyncadd [#allocation9], 4294967216 }
  0xb3   :  { %10387 = dma.done.wait [#allocation12], 32  }
  0xb4   :  { %10388 = vsyncadd [#allocation12], 4294967264 }
  0xb5   :  { %10389 = dma.done.wait [#allocation15], 272  }
  0xb6   :  { %10390 = vsyncadd [#allocation15], 4294967024 }
  0xb7   :  { %10391 = dma.done.wait [#allocation18], 16  }
  0xb8   :  { %10392 = vsyncadd [#allocation18], 4294967280  ;;  %v12259_v0 = vmov 0   ;;  %v187_v1 = vld [vmem:[#allocation2] sm:$0xff]  ;;  %vm246_vm0 = vcmask 1043456   ;;  %v164_v3 = vld [vmem:[%s12246_s0 + $0x8] sm:$0xff] }
  0xb9   :  { %291 = vmatprep.mubr.bf16.mxu0 %v12259_v0  ;;  %404 = vmatprep.mubr.bf16.mxu1 %v12259_v0  ;;  %v163_v2 = vld [vmem:[%s12246_s0] sm:$0xff]  ;;  %v8477_v4 = vcombine.high %v187_v1, %v187_v1  ;;  %v8476_v5 = vcombine.low %v187_v1, %v187_v1  ;;  %vm221_vm1 = vcmask 64512   ;;  %v188_v8 = vld [vmem:[#allocation2 + $0x8] sm:$0xff]  ;;  %v165_v9 = vld [vmem:[%s12246_s0 + $0x10] sm:$0xff]  ;;  %vm8135_vm2 = vcmask 261120  }
  0xba   :  { %v179_v7 = vpack.c.bf16 %v164_v3, %v163_v2  ;;  %v8479_v10 = vcombine.high %v188_v8, %v188_v8  ;;  %v8478_v11 = vcombine.low %v188_v8, %v188_v8  ;;  %v9465_v12 = vld [vmem:[#allocation7] ss:$48 sps:$4 sm:$0xff]   ;;  %v9467_v13 = vld [vmem:[#allocation7 + $0x4] ss:$48 sps:$4 sm:$0xff]   ;;  %v9470_v16 = vld [vmem:[#allocation7 + $0xc] ss:$48 sps:$4 sm:$0xff]  }
  0xbb   :  { %8480 = vmatprep.subr.msk.bf16.mxu0 %vm246_vm0, %v8477_v4  ;;  %v248_v6 = vsel %vm246_vm0, %v8476_v5, 0  ;;  %v166_v14 = vld [vmem:[%s12246_s0 + $0x18] sm:$0xff]  ;;  %v9471_v19 = vld [vmem:[#allocation7 + $0x60] ss:$48 sps:$4 sm:$0xff]   ;;  %v9476_v21 = vld [vmem:[#allocation7 + $0x6c] ss:$48 sps:$4 sm:$0xff]  }
  0xbc   :  { %260 = vmatpush1.bf16.msra.mxu0 %v248_v6  ;;  %8489 = vmatprep.subr.msk.bf16.mxu1 %vm246_vm0, %v8479_v10  ;;  %v254_v15 = vsel %vm246_vm0, %v8478_v11, 0  ;;  %v9468_v17 = vld [vmem:[#allocation7 + $0x8] ss:$48 sps:$4 sm:$0xff]   ;;  %v9473_v18 = vld [vmem:[#allocation7 + $0x64] ss:$48 sps:$4 sm:$0xff]   ;;  %v180_v20 = vpack.c.bf16 %v166_v14, %v165_v9  ;;  %v167_v27 = vld [vmem:[%s12246_s0 + $0x20] sm:$0xff] }
  0xbd   :  { %373 = vmatpush1.bf16.msra.mxu1 %v254_v15  ;;  %2821 = vmatprep.subr.bf16.mxu0 %v9467_v13  ;;  %v9479_v22 = vld [vmem:[#allocation7 + $0xc4] ss:$48 sps:$4 sm:$0xff]   ;;  %v9474_v23 = vld [vmem:[#allocation7 + $0x68] ss:$48 sps:$4 sm:$0xff]   ;;  %v9477_v24 = vld [vmem:[#allocation7 + $0xc0] ss:$48 sps:$4 sm:$0xff]  }
  0xbe   :  { %3047 = vmatprep.subr.bf16.mxu1 %v9470_v16  ;;  %v9482_v25 = vld [vmem:[#allocation7 + $0xcc] ss:$48 sps:$4 sm:$0xff]   ;;  %v9485_v26 = vld [vmem:[#allocation7 + $0x124] ss:$48 sps:$4 sm:$0xff]   ;;  %v9480_v29 = vld [vmem:[#allocation7 + $0xc8] ss:$48 sps:$4 sm:$0xff]  }
  0xbf   :  { %8481 = vmatmul.mubr.msk.bf16.vlgmr.msra.gmra.mrb[0].mxu0 %vm221_vm1, %v179_v7  ;;  %v168_v28 = vld [vmem:[%s12246_s0 + $0x28] sm:$0xff]  ;;  %v9483_v30 = vld [vmem:[#allocation7 + $0x120] ss:$48 sps:$4 sm:$0xff]   ;;  %v9488_v31 = vld [vmem:[#allocation7 + $0x12c] ss:$48 sps:$4 sm:$0xff]   ;;  %vm8429_vm3 = vcmask 1041409  }
  0xc0   :  { %301 = vmatprep.mubr.bf16.mxu0 %v12259_v0  ;;  %2822 = vmatpush1.bf16.msra.mxu0 %v9465_v12  ;;  %v181_v32 = vpack.c.bf16 %v168_v28, %v167_v27  ;;  %v9491_v33 = vld [vmem:[#allocation7 + $0x184] ss:$48 sps:$4 sm:$0xff]   ;;  %v9486_v34 = vld [vmem:[#allocation7 + $0x128] ss:$48 sps:$4 sm:$0xff]   ;;  %v9489_v35 = vld [vmem:[#allocation7 + $0x180] ss:$48 sps:$4 sm:$0xff]  }
  0xc1   :  { %2823 = vmatprep.subr.bf16.mxu0 %v9473_v18  ;;  %8490 = vmatmul.mubr.msk.bf16.vlgmr.msra.gmra.mrb[0].mxu1 %vm221_vm1, %v179_v7  ;;  %v9494_v36 = vld [vmem:[#allocation7 + $0x18c] ss:$48 sps:$4 sm:$0xff]   ;;  %v9497_v37 = vld [vmem:[#allocation7 + $0x1e4] ss:$48 sps:$4 sm:$0xff]   ;;  %v9492_v40 = vld [vmem:[#allocation7 + $0x188] ss:$48 sps:$4 sm:$0xff]  }
  0xc2   :  { %414 = vmatprep.mubr.bf16.mxu1 %v12259_v0  ;;  %3048 = vmatpush1.bf16.msra.mxu1 %v9468_v17  ;;  %v169_v38 = vld [vmem:[%s12246_s0 + $0x30] sm:$0xff]  ;;  %v170_v39 = vld [vmem:[%s12246_s0 + $0x38] sm:$0xff]  ;;  %v171_v49 = vld [vmem:[%s12246_s0 + $0x40] sm:$0xff]  ;;  %vm8431_vm4 = vcmask 1042434   ;;  %vm8433_vm5 = vcmask 1043459   ;;  %vm8435_vm6 = vcmask 1044484  }
  0xc3   :  { %3049 = vmatprep.subr.bf16.mxu1 %v9476_v21  ;;  %v9495_v41 = vld [vmem:[#allocation7 + $0x1e0] ss:$48 sps:$4 sm:$0xff]   ;;  %v9500_v42 = vld [vmem:[#allocation7 + $0x1ec] ss:$48 sps:$4 sm:$0xff]   ;;  %v182_v43 = vpack.c.bf16 %v170_v39, %v169_v38  ;;  %v9503_v44 = vld [vmem:[#allocation7 + $0x244] ss:$48 sps:$4 sm:$0xff]  }
  0xc4   :  { %2824 = vmatpush1.bf16.msra.mxu0 %v9471_v19  ;;  %v9498_v45 = vld [vmem:[#allocation7 + $0x1e8] ss:$48 sps:$4 sm:$0xff]   ;;  %v9501_v46 = vld [vmem:[#allocation7 + $0x240] ss:$48 sps:$4 sm:$0xff]   ;;  %v9506_v47 = vld [vmem:[#allocation7 + $0x24c] ss:$48 sps:$4 sm:$0xff]  }
  0xc5   :  { %2825 = vmatprep.subr.bf16.mxu0 %v9479_v22  ;;  %v9509_v48 = vld [vmem:[#allocation7 + $0x2a4] ss:$48 sps:$4 sm:$0xff]   ;;  %v9504_v51 = vld [vmem:[#allocation7 + $0x248] ss:$48 sps:$4 sm:$0xff]   ;;  %v9507_v52 = vld [vmem:[#allocation7 + $0x2a0] ss:$48 sps:$4 sm:$0xff]  }
  0xc6   :  { %3050 = vmatpush1.bf16.msra.mxu1 %v9474_v23  ;;  %v172_v50 = vld [vmem:[%s12246_s0 + $0x48] sm:$0xff]  ;;  %v9512_v53 = vld [vmem:[#allocation7 + $0x2ac] ss:$48 sps:$4 sm:$0xff]   ;;  %v9513_v57 = vld [vmem:[#allocation7 + $0x300] ss:$48 sps:$4 sm:$0xff]   ;;  %vm8437_vm7 = vcmask 1045509  }
  0xc7   :  { %8482 = vmatmul.mubr.msk.bf16.gmra.mrb[4].mxu0 %vm221_vm1, %v180_v20  ;;  %3051 = vmatprep.subr.bf16.mxu1 %v9482_v25  ;;  %v183_v54 = vpack.c.bf16 %v172_v50, %v171_v49  ;;  %v9515_v55 = vld [vmem:[#allocation7 + $0x304] ss:$48 sps:$4 sm:$0xff]   ;;  %v9510_v56 = vld [vmem:[#allocation7 + $0x2a8] ss:$48 sps:$4 sm:$0xff]   ;;  %v9518_v58 = vld [vmem:[#allocation7 + $0x30c] ss:$48 sps:$4 sm:$0xff]  }
  0xc8   :  { %311 = vmatprep.mubr.bf16.mxu0 %v12259_v0  ;;  %2826 = vmatpush1.bf16.msra.mxu0 %v9477_v24  ;;  %v9521_v59 = vld [vmem:[#allocation7 + $0x364] ss:$48 sps:$4 sm:$0xff]   ;;  %v173_v60 = vld [vmem:[%s12246_s0 + $0x50] sm:$0xff]  ;;  %v9516_v62 = vld [vmem:[#allocation7 + $0x308] ss:$48 sps:$4 sm:$0xff]   ;;  %vm8439_vm8 = vcmask 1046534  }
  0xc9   :  { %2827 = vmatprep.subr.bf16.mxu0 %v9485_v26  ;;  %8491 = vmatmul.mubr.msk.bf16.gmra.mrb[4].mxu1 %vm221_vm1, %v180_v20  ;;  %v174_v61 = vld [vmem:[%s12246_s0 + $0x58] sm:$0xff]  ;;  %v9519_v63 = vld [vmem:[#allocation7 + $0x360] ss:$48 sps:$4 sm:$0xff]   ;;  %v9524_v1 = vld [vmem:[#allocation7 + $0x36c] ss:$48 sps:$4 sm:$0xff]   ;;  %vm8441_vm9 = vcmask 1047559  }
  0xca   :  { %424 = vmatprep.mubr.bf16.mxu1 %v12259_v0  ;;  %3052 = vmatpush1.bf16.msra.mxu1 %v9480_v29  ;;  %v184_v2 = vpack.c.bf16 %v174_v61, %v173_v60  ;;  %v9522_v3 = vld [vmem:[#allocation7 + $0x368] ss:$48 sps:$4 sm:$0xff]   ;;  %v9527_v4 = vld [vmem:[#allocation7 + $0x3c4] ss:$48 sps:$4 sm:$0xff]   ;;  %v9525_v5 = vld [vmem:[#allocation7 + $0x3c0] ss:$48 sps:$4 sm:$0xff]  }
  0xcb   :  { %3053 = vmatprep.subr.bf16.mxu1 %v9488_v31  ;;  %v9530_v6 = vld [vmem:[#allocation7 + $0x3cc] ss:$48 sps:$4 sm:$0xff]   ;;  %v9533_v7 = vld [vmem:[#allocation7 + $0x424] ss:$48 sps:$4 sm:$0xff]   ;;  %v9528_v10 = vld [vmem:[#allocation7 + $0x3c8] ss:$48 sps:$4 sm:$0xff]  }
  0xcc   :  { %2828 = vmatpush1.bf16.msra.mxu0 %v9483_v30  ;;  %v175_v8 = vld [vmem:[%s12246_s0 + $0x60] sm:$0xff]  ;;  %v176_v9 = vld [vmem:[%s12246_s0 + $0x68] sm:$0xff]  ;;  %v177_v19 = vld [vmem:[%s12246_s0 + $0x70] sm:$0xff] }
  0xcd   :  { %2829 = vmatprep.subr.bf16.mxu0 %v9491_v33  ;;  %v9531_v11 = vld [vmem:[#allocation7 + $0x420] ss:$48 sps:$4 sm:$0xff]   ;;  %v9536_v12 = vld [vmem:[#allocation7 + $0x42c] ss:$48 sps:$4 sm:$0xff]   ;;  %v9539_v13 = vld [vmem:[#allocation7 + $0x484] ss:$48 sps:$4 sm:$0xff]   ;;  %v185_v14 = vpack.c.bf16 %v176_v9, %v175_v8 }
  0xce   :  { %3054 = vmatpush1.bf16.msra.mxu1 %v9486_v34  ;;  %v9534_v15 = vld [vmem:[#allocation7 + $0x428] ss:$48 sps:$4 sm:$0xff]   ;;  %v9537_v16 = vld [vmem:[#allocation7 + $0x480] ss:$48 sps:$4 sm:$0xff]   ;;  %v9542_v17 = vld [vmem:[#allocation7 + $0x48c] ss:$48 sps:$4 sm:$0xff]  }
  0xcf   :  { %8483 = vmatmul.mubr.msk.bf16.gmra.mrb[8].mxu0 %vm221_vm1, %v181_v32  ;;  %3055 = vmatprep.subr.bf16.mxu1 %v9494_v36  ;;  %v9545_v18 = vld [vmem:[#allocation7 + $0x4e4] ss:$48 sps:$4 sm:$0xff]   ;;  %v9540_v21 = vld [vmem:[#allocation7 + $0x488] ss:$48 sps:$4 sm:$0xff]   ;;  %v9543_v22 = vld [vmem:[#allocation7 + $0x4e0] ss:$48 sps:$4 sm:$0xff]   ;;  %v191_v36 = vlaneseq }
  0xd0   :  { %321 = vmatprep.mubr.bf16.mxu0 %v12259_v0  ;;  %2830 = vmatpush1.bf16.msra.mxu0 %v9489_v35  ;;  %v178_v20 = vld [vmem:[%s12246_s0 + $0x78] sm:$0xff]  ;;  %v9548_v23 = vld [vmem:[#allocation7 + $0x4ec] ss:$48 sps:$4 sm:$0xff]   ;;  %v9549_v28 = vld [vmem:[#allocation7 + $0x540] ss:$48 sps:$4 sm:$0xff]  }
  0xd1   :  { %2831 = vmatprep.subr.bf16.mxu0 %v9497_v37  ;;  %8492 = vmatmul.mubr.msk.bf16.gmra.mrb[8].mxu1 %vm221_vm1, %v181_v32  ;;  %v186_v24 = vpack.c.bf16 %v178_v20, %v177_v19  ;;  %v9546_v25 = vld [vmem:[#allocation7 + $0x4e8] ss:$48 sps:$4 sm:$0xff]   ;;  %v9551_v26 = vld [vmem:[#allocation7 + $0x544] ss:$48 sps:$4 sm:$0xff]   ;;  %v9554_v27 = vld [vmem:[#allocation7 + $0x54c] ss:$48 sps:$4 sm:$0xff]  }
  0xd2   :  { %434 = vmatprep.mubr.bf16.mxu1 %v12259_v0  ;;  %3056 = vmatpush1.bf16.msra.mxu1 %v9492_v40  ;;  %v9552_v29 = vld [vmem:[#allocation7 + $0x548] ss:$48 sps:$4 sm:$0xff]   ;;  %v9557_v30 = vld [vmem:[#allocation7 + $0x5a4] ss:$48 sps:$4 sm:$0xff]   ;;  %v9560_v31 = vld [vmem:[#allocation7 + $0x5ac] ss:$48 sps:$4 sm:$0xff]  }
  0xd3   :  { %3057 = vmatprep.subr.bf16.mxu1 %v9500_v42  ;;  %v9555_v32 = vld [vmem:[#allocation7 + $0x5a0] ss:$48 sps:$4 sm:$0xff]   ;;  %v9558_v33 = vld [vmem:[#allocation7 + $0x5a8] ss:$48 sps:$4 sm:$0xff]   ;;  %v9563_v34 = vld [vmem:[#allocation7 + $0x604] ss:$48 sps:$4 sm:$0xff]  }
  0xd4   :  { %2832 = vmatpush1.bf16.msra.mxu0 %v9495_v41  ;;  %v9566_v35 = vld [vmem:[#allocation7 + $0x60c] ss:$48 sps:$4 sm:$0xff]   ;;  %v192_v37 = vshrl.u32 %v191_v36, 7  ;;  %v9567_v9 = vld [vmem:[#allocation7 + $0x660] ss:$48 sps:$4 sm:$0xff]  }
  0xd5   :  { %2833 = vmatprep.subr.bf16.mxu0 %v9503_v44  ;;  %v189_v38 = vld [vmem:[#allocation5] sm:$0xf] }
  0xd6   :  { %3058 = vmatpush1.bf16.msra.mxu1 %v9498_v45  ;;  %v193_v39 = vsub.s32 0, %v192_v37  ;;  %v197_v40 = vsub.s32 1, %v192_v37  ;;  %v201_v41 = vsub.s32 2, %v192_v37 }
  0xd7   :  { %8484 = vmatmul.mubr.msk.bf16.gmra.mrb[12].mxu0 %vm221_vm1, %v182_v43  ;;  %3059 = vmatprep.subr.bf16.mxu1 %v9506_v47 }
  0xd8   :  { %331 = vmatprep.mubr.bf16.mxu0 %v12259_v0  ;;  %2834 = vmatpush1.bf16.msra.mxu0 %v9501_v46  ;;  %v10696_v42 = vrot.slane %v189_v38, %v193_v39  ;;  %v10698_v45 = vrot.slane %v189_v38, %v197_v40 }
  0xd9   :  { %2835 = vmatprep.subr.bf16.mxu0 %v9509_v48  ;;  %8493 = vmatmul.mubr.msk.bf16.gmra.mrb[12].mxu1 %vm221_vm1, %v182_v43  ;;  %v205_v43 = vsub.s32 3, %v192_v37  ;;  %v10700_v48 = vrot.slane %v189_v38, %v201_v41  ;;  %v9579_v37 = vld [vmem:[#allocation7 + $0x720] ss:$48 sps:$4 sm:$0xff]  }
  0xda   :  { %444 = vmatprep.mubr.bf16.mxu1 %v12259_v0  ;;  %3060 = vmatpush1.bf16.msra.mxu1 %v9504_v51 }
  0xdb   :  { %3061 = vmatprep.subr.bf16.mxu1 %v9512_v53 }
  0xdc   :  { %2836 = vmatpush1.bf16.msra.mxu0 %v9507_v52  ;;  %v10704_v52 = vrot.slane %v189_v38, %v205_v43  ;;  %v9582_v38 = vld [vmem:[#allocation7 + $0x728] ss:$48 sps:$4 sm:$0xff]  }
  0xdd   :  { %2837 = vmatprep.subr.bf16.mxu0 %v9515_v55 }
  0xde   :  { %3062 = vmatpush1.bf16.msra.mxu1 %v9510_v56 }
  0xdf   :  { %8485 = vmatmul.mubr.msk.bf16.gmra.mrb[16].mxu0 %vm221_vm1, %v183_v54  ;;  %3063 = vmatprep.subr.bf16.mxu1 %v9518_v58  ;;  %v9561_v58 = vld [vmem:[#allocation7 + $0x600] ss:$48 sps:$4 sm:$0xff]  }
  0xe0   :  { %341 = vmatprep.mubr.bf16.mxu0 %v12259_v0  ;;  %2838 = vmatpush1.bf16.msra.mxu0 %v9513_v57 }
  0xe1   :  { %2839 = vmatprep.subr.bf16.mxu0 %v9521_v59  ;;  %8494 = vmatmul.mubr.msk.bf16.gmra.mrb[16].mxu1 %vm221_vm1, %v183_v54  ;;  %v9564_v59 = vld [vmem:[#allocation7 + $0x608] ss:$48 sps:$4 sm:$0xff]  }
  0xe2   :  { %454 = vmatprep.mubr.bf16.mxu1 %v12259_v0  ;;  %3064 = vmatpush1.bf16.msra.mxu1 %v9516_v62  ;;  %v9569_v62 = vld [vmem:[#allocation7 + $0x664] ss:$48 sps:$4 sm:$0xff]  }
  0xe3   :  { %3065 = vmatprep.subr.bf16.mxu1 %v9524_v1 }
  0xe4   :  { %2840 = vmatpush1.bf16.msra.mxu0 %v9519_v63  ;;  %v9572_v63 = vld [vmem:[#allocation7 + $0x66c] ss:$48 sps:$4 sm:$0xff]  }
  0xe5   :  { %2841 = vmatprep.subr.bf16.mxu0 %v9527_v4 }
  0xe6   :  { %3066 = vmatpush1.bf16.msra.mxu1 %v9522_v3 }
  0xe7   :  { %8486 = vmatmul.mubr.msk.bf16.gmra.mrb[20].mxu0 %vm221_vm1, %v184_v2  ;;  %3067 = vmatprep.subr.bf16.mxu1 %v9530_v6 }
  0xe8   :  { %351 = vmatprep.mubr.bf16.mxu0 %v12259_v0  ;;  %2842 = vmatpush1.bf16.msra.mxu0 %v9525_v5 }
  0xe9   :  { %2843 = vmatprep.subr.bf16.mxu0 %v9533_v7  ;;  %8495 = vmatmul.mubr.msk.bf16.gmra.mrb[20].mxu1 %vm221_vm1, %v184_v2 }
  0xea   :  { %464 = vmatprep.mubr.bf16.mxu1 %v12259_v0  ;;  %3068 = vmatpush1.bf16.msra.mxu1 %v9528_v10  ;;  %v9570_v10 = vld [vmem:[#allocation7 + $0x668] ss:$48 sps:$4 sm:$0xff]  }
  0xeb   :  { %3069 = vmatprep.subr.bf16.mxu1 %v9536_v12 }
  0xec   :  { %2844 = vmatpush1.bf16.msra.mxu0 %v9531_v11 }
  0xed   :  { %2845 = vmatprep.subr.bf16.mxu0 %v9539_v13 }
  0xee   :  { %3070 = vmatpush1.bf16.msra.mxu1 %v9534_v15  ;;  %v9575_v15 = vld [vmem:[#allocation7 + $0x6c4] ss:$48 sps:$4 sm:$0xff]  }
  0xef   :  { %8487 = vmatmul.mubr.msk.bf16.gmra.mrb[24].mxu0 %vm221_vm1, %v185_v14  ;;  %3071 = vmatprep.subr.bf16.mxu1 %v9542_v17 }
  0xf0   :  { %361 = vmatprep.mubr.bf16.mxu0 %v12259_v0  ;;  %2846 = vmatpush1.bf16.msra.mxu0 %v9537_v16  ;;  %v9578_v16 = vld [vmem:[#allocation7 + $0x6cc] ss:$48 sps:$4 sm:$0xff]  }
  0xf1   :  { %2847 = vmatprep.subr.bf16.mxu0 %v9545_v18  ;;  %8496 = vmatmul.mubr.msk.bf16.gmra.mrb[24].mxu1 %vm221_vm1, %v185_v14 }
  0xf2   :  { %474 = vmatprep.mubr.bf16.mxu1 %v12259_v0  ;;  %3072 = vmatpush1.bf16.msra.mxu1 %v9540_v21 }
  0xf3   :  { %3073 = vmatprep.subr.bf16.mxu1 %v9548_v23  ;;  %v9573_v23 = vld [vmem:[#allocation7 + $0x6c0] ss:$48 sps:$4 sm:$0xff]  }
  0xf4   :  { %2848 = vmatpush1.bf16.msra.mxu0 %v9543_v22 }
  0xf5   :  { %2849 = vmatprep.subr.bf16.mxu0 %v9551_v26 }
  0xf6   :  { %3074 = vmatpush1.bf16.msra.mxu1 %v9546_v25 }
  0xf7   :  { %8488 = vmatmul.mubr.msk.bf16.gmra.mrb[28].mxu0 %vm221_vm1, %v186_v24  ;;  %3075 = vmatprep.subr.bf16.mxu1 %v9554_v27  ;;  %v9581_v27 = vld [vmem:[#allocation7 + $0x724] ss:$48 sps:$4 sm:$0xff]  }
  0xf8   :  { %2850 = vmatpush1.bf16.msra.mxu0 %v9549_v28  ;;  %v9584_v28 = vld [vmem:[#allocation7 + $0x72c] ss:$48 sps:$4 sm:$0xff]  }
  0xf9   :  { %8497 = vmatmul.mubr.msk.bf16.gmra.mrb[28].mxu1 %vm221_vm1, %v186_v24  ;;  %2851 = vmatprep.subr.bf16.mxu0 %v9557_v30  ;;  %v9576_v24 = vld [vmem:[#allocation7 + $0x6c8] ss:$48 sps:$4 sm:$0xff]  }
  0xfa   :  { %3076 = vmatpush1.bf16.msra.mxu1 %v9552_v29 }
  0xfb   :  { %3077 = vmatprep.subr.bf16.mxu1 %v9560_v31 }
  0xfc   :  { %2852 = vmatpush1.bf16.msra.mxu0 %v9555_v32 }
  0xfd   :  { %2934 = vmatprep.subr.bf16.mxu0 %v9563_v34 }
  0xfe   :  { %3078 = vmatpush1.bf16.msra.mxu1 %v9558_v33 }
  0xff   :  { %3160 = vmatprep.subr.bf16.mxu1 %v9566_v35 }
 0x192   :  { %v293_v44 = vpop.f32.mrb[0].mxu0 }
 0x193   :  { %v295_v46 = vpop.f32.mrb[1].mxu0  ;;  %v294_v49 = vadd.f32 %v293_v44, %v10696_v42  ;;  %v9587_v44 = vld [vmem:[#allocation7 + $0x784] ss:$48 sps:$4 sm:$0xff]  }
 0x194   :  { %v297_v47 = vpop.f32.mrb[2].mxu0  ;;  %v296_v53 = vadd.f32 %v295_v46, %v10698_v45  ;;  %v406_v56 = vpop.f32.mrb[0].mxu1  ;;  %v9590_v46 = vld [vmem:[#allocation7 + $0x78c] ss:$48 sps:$4 sm:$0xff]  }
 0x195   :  { %v298_v50 = vadd.f32 %v297_v47, %v10696_v42  ;;  %v299_v51 = vpop.f32.mrb[3].mxu0  ;;  %v407_v60 = vadd.f32 %v406_v56, %v10700_v48  ;;  %v408_v61 = vpop.f32.mrb[1].mxu1  ;;  %v9585_v56 = vld [vmem:[#allocation7 + $0x780] ss:$48 sps:$4 sm:$0xff]  }
 0x196   :  { %v300_v54 = vadd.f32 %v299_v51, %v10698_v45  ;;  %v409_v1 = vadd.f32 %v408_v61, %v10704_v52  ;;  %v410_v2 = vpop.f32.mrb[2].mxu1  ;;  %v9593_v61 = vld [vmem:[#allocation7 + $0x7e4] ss:$48 sps:$4 sm:$0xff]  }
 0x197   :  { %v10708_v55 = vpack.c.bf16 %v298_v50, %v294_v49  ;;  %v411_v4 = vadd.f32 %v410_v2, %v10700_v48  ;;  %v412_v5 = vpop.f32.mrb[3].mxu1 }
 0x198   :  { %v10710_v57 = vpack.c.bf16 %v300_v54, %v296_v53  ;;  %v413_v7 = vadd.f32 %v412_v5, %v10704_v52 }
 0x199   :  { %v10720_v11 = vpack.c.bf16 %v411_v4, %v407_v60 }
 0x19a   :  { %v303_v3 = vpop.f32.mrb[4].mxu0  ;;  %2853 = vmatprep.mubr.bf16.mxu0 %v10710_v57  ;;  %3079 = vmatprep.mubr.bf16.mxu1 %v10710_v57  ;;  %v10724_v17 = vpack.c.bf16 %v413_v7, %v409_v1 }
 0x19b   :  { %v305_v6 = vpop.f32.mrb[5].mxu0  ;;  %2854 = vmatmul.mubr.bf16.vlgmr.msra.gmra.mrb[32].mxu0 %v10708_v55  ;;  %3080 = vmatmul.mubr.bf16.vlgmr.msra.gmra.mrb[32].mxu1 %v10708_v55  ;;  %v304_v12 = vadd.f32 %v303_v3, %v10696_v42 }
 0x19c   :  { %v307_v8 = vpop.f32.mrb[6].mxu0  ;;  %2935 = vmatpush1.bf16.msra.mxu0 %v9561_v58  ;;  %3161 = vmatpush1.bf16.msra.mxu1 %v9564_v59  ;;  %v306_v18 = vadd.f32 %v305_v6, %v10698_v45  ;;  %v416_v21 = vpop.f32.mrb[4].mxu1  ;;  %v9588_v58 = vld [vmem:[#allocation7 + $0x788] ss:$48 sps:$4 sm:$0xff]  }
 0x19d   :  { %v308_v13 = vadd.f32 %v307_v8, %v10696_v42  ;;  %v309_v14 = vpop.f32.mrb[7].mxu0  ;;  %2936 = vmatprep.subr.bf16.mxu0 %v9569_v62  ;;  %3162 = vmatprep.subr.bf16.mxu1 %v9572_v63  ;;  %v417_v25 = vadd.f32 %v416_v21, %v10700_v48  ;;  %v418_v26 = vpop.f32.mrb[5].mxu1  ;;  %v9596_v62 = vld [vmem:[#allocation7 + $0x7ec] ss:$48 sps:$4 sm:$0xff]   ;;  %v9591_v8 = vld [vmem:[#allocation7 + $0x7e0] ss:$48 sps:$4 sm:$0xff]  }
 0x19e   :  { %v310_v19 = vadd.f32 %v309_v14, %v10698_v45  ;;  %v419_v29 = vadd.f32 %v418_v26, %v10704_v52  ;;  %v420_v30 = vpop.f32.mrb[6].mxu1  ;;  %v9597_v26 = vld [vmem:[#allocation7 + $0x840] ss:$48 sps:$4 sm:$0xff]  }
 0x19f   :  { %v10728_v20 = vpack.c.bf16 %v308_v13, %v304_v12  ;;  %v421_v32 = vadd.f32 %v420_v30, %v10700_v48  ;;  %v422_v33 = vpop.f32.mrb[7].mxu1  ;;  %v9605_v30 = vld [vmem:[#allocation7 + $0x8a4] ss:$48 sps:$4 sm:$0xff]  }
 0x1a0   :  { %v10730_v22 = vpack.c.bf16 %v310_v19, %v306_v18  ;;  %2937 = vmatpush1.bf16.msra.mxu0 %v9567_v9  ;;  %3163 = vmatpush1.bf16.msra.mxu1 %v9570_v10  ;;  %v423_v35 = vadd.f32 %v422_v33, %v10704_v52  ;;  %v9594_v9 = vld [vmem:[#allocation7 + $0x7e8] ss:$48 sps:$4 sm:$0xff]  }
 0x1a1   :  { %2938 = vmatprep.subr.bf16.mxu0 %v9575_v15  ;;  %3164 = vmatprep.subr.bf16.mxu1 %v9578_v16  ;;  %v10740_v39 = vpack.c.bf16 %v421_v32, %v417_v25  ;;  %v9599_v15 = vld [vmem:[#allocation7 + $0x844] ss:$48 sps:$4 sm:$0xff]   ;;  %v9602_v16 = vld [vmem:[#allocation7 + $0x84c] ss:$48 sps:$4 sm:$0xff]  }
 0x1a2   :  { %v313_v31 = vpop.f32.mrb[8].mxu0  ;;  %2863 = vmatprep.mubr.bf16.mxu0 %v10730_v22  ;;  %3089 = vmatprep.mubr.bf16.mxu1 %v10730_v22  ;;  %v10744_v47 = vpack.c.bf16 %v423_v35, %v419_v29 }
 0x1a3   :  { %v315_v34 = vpop.f32.mrb[9].mxu0  ;;  %2864 = vmatmul.mubr.bf16.gmra.mrb[36].mxu0 %v10728_v20  ;;  %3090 = vmatmul.mubr.bf16.gmra.mrb[36].mxu1 %v10728_v20  ;;  %v314_v40 = vadd.f32 %v313_v31, %v10696_v42  ;;  %v9608_v31 = vld [vmem:[#allocation7 + $0x8ac] ss:$48 sps:$4 sm:$0xff]  }
 0x1a4   :  { %v317_v36 = vpop.f32.mrb[10].mxu0  ;;  %2939 = vmatpush1.bf16.msra.mxu0 %v9573_v23  ;;  %3165 = vmatpush1.bf16.msra.mxu1 %v9576_v24  ;;  %v316_v49 = vadd.f32 %v315_v34, %v10698_v45  ;;  %v426_v53 = vpop.f32.mrb[8].mxu1 }
 0x1a5   :  { %v318_v41 = vadd.f32 %v317_v36, %v10696_v42  ;;  %v319_v43 = vpop.f32.mrb[11].mxu0  ;;  %2940 = vmatprep.subr.bf16.mxu0 %v9581_v27  ;;  %3166 = vmatprep.subr.bf16.mxu1 %v9584_v28  ;;  %v427_v59 = vadd.f32 %v426_v53, %v10700_v48  ;;  %v428_v60 = vpop.f32.mrb[9].mxu1  ;;  %v9600_v27 = vld [vmem:[#allocation7 + $0x848] ss:$48 sps:$4 sm:$0xff]   ;;  %v9611_v53 = vld [vmem:[#allocation7 + $0x904] ss:$48 sps:$4 sm:$0xff]  }
 0x1a6   :  { %v320_v50 = vadd.f32 %v319_v43, %v10698_v45  ;;  %v429_v63 = vadd.f32 %v428_v60, %v10704_v52  ;;  %v430_v1 = vpop.f32.mrb[10].mxu1  ;;  %v9606_v43 = vld [vmem:[#allocation7 + $0x8a8] ss:$48 sps:$4 sm:$0xff]  }
 0x1a7   :  { %v10748_v51 = vpack.c.bf16 %v318_v41, %v314_v40  ;;  %v431_v3 = vadd.f32 %v430_v1, %v10700_v48  ;;  %v432_v4 = vpop.f32.mrb[11].mxu1  ;;  %v9603_v41 = vld [vmem:[#allocation7 + $0x8a0] ss:$48 sps:$4 sm:$0xff]  }
 0x1a8   :  { %v10750_v54 = vpack.c.bf16 %v320_v50, %v316_v49  ;;  %2941 = vmatpush1.bf16.msra.mxu0 %v9579_v37  ;;  %3167 = vmatpush1.bf16.msra.mxu1 %v9582_v38  ;;  %v433_v6 = vadd.f32 %v432_v4, %v10704_v52  ;;  %v9609_v1 = vld [vmem:[#allocation7 + $0x900] ss:$48 sps:$4 sm:$0xff]  }
 0x1a9   :  { %2942 = vmatprep.subr.bf16.mxu0 %v9587_v44  ;;  %3168 = vmatprep.subr.bf16.mxu1 %v9590_v46  ;;  %v10760_v10 = vpack.c.bf16 %v431_v3, %v427_v59 }
 0x1aa   :  { %v323_v2 = vpop.f32.mrb[12].mxu0  ;;  %2873 = vmatprep.mubr.bf16.mxu0 %v10750_v54  ;;  %3099 = vmatprep.mubr.bf16.mxu1 %v10750_v54  ;;  %v10764_v18 = vpack.c.bf16 %v433_v6, %v429_v63  ;;  %v9620_v6 = vld [vmem:[#allocation7 + $0x96c] ss:$48 sps:$4 sm:$0xff]  }
 0x1ab   :  { %v325_v5 = vpop.f32.mrb[13].mxu0  ;;  %2874 = vmatmul.mubr.bf16.gmra.mrb[40].mxu0 %v10748_v51  ;;  %3100 = vmatmul.mubr.bf16.gmra.mrb[40].mxu1 %v10748_v51  ;;  %v324_v12 = vadd.f32 %v323_v2, %v10696_v42  ;;  %v9612_v2 = vld [vmem:[#allocation7 + $0x908] ss:$48 sps:$4 sm:$0xff]  }
 0x1ac   :  { %v327_v7 = vpop.f32.mrb[14].mxu0  ;;  %2943 = vmatpush1.bf16.msra.mxu0 %v9585_v56  ;;  %3169 = vmatpush1.bf16.msra.mxu1 %v9588_v58  ;;  %v326_v19 = vadd.f32 %v325_v5, %v10698_v45  ;;  %v436_v24 = vpop.f32.mrb[12].mxu1  ;;  %v9614_v56 = vld [vmem:[#allocation7 + $0x90c] ss:$48 sps:$4 sm:$0xff]   ;;  %v9617_v5 = vld [vmem:[#allocation7 + $0x964] ss:$48 sps:$4 sm:$0xff]  }
 0x1ad   :  { %v328_v13 = vadd.f32 %v327_v7, %v10696_v42  ;;  %v329_v14 = vpop.f32.mrb[15].mxu0  ;;  %2944 = vmatprep.subr.bf16.mxu0 %v9593_v61  ;;  %3170 = vmatprep.subr.bf16.mxu1 %v9596_v62  ;;  %v437_v28 = vadd.f32 %v436_v24, %v10700_v48  ;;  %v438_v29 = vpop.f32.mrb[13].mxu1 }
 0x1ae   :  { %v330_v21 = vadd.f32 %v329_v14, %v10698_v45  ;;  %v439_v32 = vadd.f32 %v438_v29, %v10704_v52  ;;  %v440_v33 = vpop.f32.mrb[14].mxu1  ;;  %v9623_v29 = vld [vmem:[#allocation7 + $0x9c4] ss:$48 sps:$4 sm:$0xff]  }
 0x1af   :  { %v10768_v23 = vpack.c.bf16 %v328_v13, %v324_v12  ;;  %v441_v35 = vadd.f32 %v440_v33, %v10700_v48  ;;  %v442_v36 = vpop.f32.mrb[15].mxu1 }
 0x1b0   :  { %v10770_v25 = vpack.c.bf16 %v330_v21, %v326_v19  ;;  %2945 = vmatpush1.bf16.msra.mxu0 %v9591_v8  ;;  %3171 = vmatpush1.bf16.msra.mxu1 %v9594_v9  ;;  %v443_v38 = vadd.f32 %v442_v36, %v10704_v52  ;;  %v9615_v19 = vld [vmem:[#allocation7 + $0x960] ss:$48 sps:$4 sm:$0xff]   ;;  %v9618_v21 = vld [vmem:[#allocation7 + $0x968] ss:$48 sps:$4 sm:$0xff]  }
 0x1b1   :  { %2946 = vmatprep.subr.bf16.mxu0 %v9599_v15  ;;  %3172 = vmatprep.subr.bf16.mxu1 %v9602_v16  ;;  %v10780_v44 = vpack.c.bf16 %v441_v35, %v437_v28 }
 0x1b2   :  { %v333_v34 = vpop.f32.mrb[16].mxu0  ;;  %2883 = vmatprep.mubr.bf16.mxu0 %v10770_v25  ;;  %3109 = vmatprep.mubr.bf16.mxu1 %v10770_v25  ;;  %v10784_v58 = vpack.c.bf16 %v443_v38, %v439_v32  ;;  %v9624_v38 = vld [vmem:[#allocation7 + $0x9c8] ss:$48 sps:$4 sm:$0xff]  }
 0x1b3   :  { %v335_v37 = vpop.f32.mrb[17].mxu0  ;;  %2884 = vmatmul.mubr.bf16.gmra.mrb[44].mxu0 %v10768_v23  ;;  %3110 = vmatmul.mubr.bf16.gmra.mrb[44].mxu1 %v10768_v23  ;;  %v334_v46 = vadd.f32 %v333_v34, %v10696_v42 }
 0x1b4   :  { %v337_v40 = vpop.f32.mrb[18].mxu0  ;;  %2947 = vmatpush1.bf16.msra.mxu0 %v9597_v26  ;;  %3173 = vmatpush1.bf16.msra.mxu1 %v9600_v27  ;;  %v336_v59 = vadd.f32 %v335_v37, %v10698_v45  ;;  %v446_v62 = vpop.f32.mrb[16].mxu1  ;;  %v9621_v37 = vld [vmem:[#allocation7 + $0x9c0] ss:$48 sps:$4 sm:$0xff]  }
 0x1b5   :  { %v338_v49 = vadd.f32 %v337_v40, %v10696_v42  ;;  %v339_v50 = vpop.f32.mrb[19].mxu0  ;;  %2948 = vmatprep.subr.bf16.mxu0 %v9605_v30  ;;  %3174 = vmatprep.subr.bf16.mxu1 %v9608_v31  ;;  %v447_v3 = vadd.f32 %v446_v62, %v10700_v48  ;;  %v448_v4 = vpop.f32.mrb[17].mxu1  ;;  %v9626_v30 = vld [vmem:[#allocation7 + $0x9cc] ss:$48 sps:$4 sm:$0xff]  }
 0x1b6   :  { %v340_v60 = vadd.f32 %v339_v50, %v10698_v45  ;;  %v449_v7 = vadd.f32 %v448_v4, %v10704_v52  ;;  %v450_v8 = vpop.f32.mrb[18].mxu1 }
 0x1b7   :  { %v10788_v61 = vpack.c.bf16 %v338_v49, %v334_v46  ;;  %v451_v12 = vadd.f32 %v450_v8, %v10700_v48  ;;  %v452_v13 = vpop.f32.mrb[19].mxu1  ;;  %v9632_v46 = vld [vmem:[#allocation7 + $0xa2c] ss:$48 sps:$4 sm:$0xff]   ;;  %v9635_v8 = vld [vmem:[#allocation7 + $0xa84] ss:$48 sps:$4 sm:$0xff]  }
 0x1b8   :  { %v10790_v63 = vpack.c.bf16 %v340_v60, %v336_v59  ;;  %2949 = vmatpush1.bf16.msra.mxu0 %v9603_v41  ;;  %3175 = vmatpush1.bf16.msra.mxu1 %v9606_v43  ;;  %v453_v15 = vadd.f32 %v452_v13, %v10704_v52  ;;  %v9629_v43 = vld [vmem:[#allocation7 + $0xa24] ss:$48 sps:$4 sm:$0xff]  }
 0x1b9   :  { %2950 = vmatprep.subr.bf16.mxu0 %v9611_v53  ;;  %3176 = vmatprep.subr.bf16.mxu1 %v9614_v56  ;;  %v10800_v24 = vpack.c.bf16 %v451_v12, %v447_v3  ;;  %v9630_v3 = vld [vmem:[#allocation7 + $0xa28] ss:$48 sps:$4 sm:$0xff]  }
 0x1ba   :  { %v343_v9 = vpop.f32.mrb[20].mxu0  ;;  %2893 = vmatprep.mubr.bf16.mxu0 %v10790_v63  ;;  %3119 = vmatprep.mubr.bf16.mxu1 %v10790_v63  ;;  %v10804_v31 = vpack.c.bf16 %v453_v15, %v449_v7 }
 0x1bb   :  { %v345_v14 = vpop.f32.mrb[21].mxu0  ;;  %2894 = vmatmul.mubr.bf16.gmra.mrb[48].mxu0 %v10788_v61  ;;  %3120 = vmatmul.mubr.bf16.gmra.mrb[48].mxu1 %v10788_v61  ;;  %v344_v26 = vadd.f32 %v343_v9, %v10696_v42  ;;  %v9638_v9 = vld [vmem:[#allocation7 + $0xa8c] ss:$48 sps:$4 sm:$0xff]  }
 0x1bc   :  { %v347_v16 = vpop.f32.mrb[22].mxu0  ;;  %2951 = vmatpush1.bf16.msra.mxu0 %v9609_v1  ;;  %3177 = vmatpush1.bf16.msra.mxu1 %v9612_v2  ;;  %v346_v32 = vadd.f32 %v345_v14, %v10698_v45  ;;  %v456_v35 = vpop.f32.mrb[20].mxu1  ;;  %v9627_v2 = vld [vmem:[#allocation7 + $0xa20] ss:$48 sps:$4 sm:$0xff]  }
 0x1bd   :  { %v348_v27 = vadd.f32 %v347_v16, %v10696_v42  ;;  %v349_v28 = vpop.f32.mrb[23].mxu0  ;;  %2952 = vmatprep.subr.bf16.mxu0 %v9617_v5  ;;  %3178 = vmatprep.subr.bf16.mxu1 %v9620_v6  ;;  %v457_v40 = vadd.f32 %v456_v35, %v10700_v48  ;;  %v458_v41 = vpop.f32.mrb[21].mxu1 }
 0x1be   :  { %v350_v33 = vadd.f32 %v349_v28, %v10698_v45  ;;  %v459_v49 = vadd.f32 %v458_v41, %v10704_v52  ;;  %v460_v50 = vpop.f32.mrb[22].mxu1 }
 0x1bf   :  { %v10808_v34 = vpack.c.bf16 %v348_v27, %v344_v26  ;;  %v461_v56 = vadd.f32 %v460_v50, %v10700_v48  ;;  %v462_v59 = vpop.f32.mrb[23].mxu1  ;;  %v9636_v26 = vld [vmem:[#allocation7 + $0xa88] ss:$48 sps:$4 sm:$0xff]  }
 0x1c0   :  { %v10810_v36 = vpack.c.bf16 %v350_v33, %v346_v32  ;;  %2953 = vmatpush1.bf16.msra.mxu0 %v9615_v19  ;;  %3179 = vmatpush1.bf16.msra.mxu1 %v9618_v21  ;;  %v463_v62 = vadd.f32 %v462_v59, %v10704_v52  ;;  %v9633_v21 = vld [vmem:[#allocation7 + $0xa80] ss:$48 sps:$4 sm:$0xff]  }
 0x1c1   :  { %2954 = vmatprep.subr.bf16.mxu0 %v9623_v29  ;;  %3180 = vmatprep.subr.bf16.mxu1 %v9626_v30  ;;  %v10820_v4 = vpack.c.bf16 %v461_v56, %v457_v40  ;;  %v9641_v29 = vld [vmem:[#allocation7 + $0xae4] ss:$48 sps:$4 sm:$0xff]   ;;  %v9644_v30 = vld [vmem:[#allocation7 + $0xaec] ss:$48 sps:$4 sm:$0xff]  }
 0x1c2   :  { %v353_v53 = vpop.f32.mrb[24].mxu0  ;;  %2903 = vmatprep.mubr.bf16.mxu0 %v10810_v36  ;;  %3129 = vmatprep.mubr.bf16.mxu1 %v10810_v36  ;;  %v10824_v12 = vpack.c.bf16 %v463_v62, %v459_v49  ;;  %v9642_v49 = vld [vmem:[#allocation7 + $0xae8] ss:$48 sps:$4 sm:$0xff]   ;;  %v9650_v62 = vld [vmem:[#allocation7 + $0xb4c] ss:$48 sps:$4 sm:$0xff]  }
 0x1c3   :  { %v355_v60 = vpop.f32.mrb[25].mxu0  ;;  %2904 = vmatmul.mubr.bf16.gmra.mrb[52].mxu0 %v10808_v34  ;;  %3130 = vmatmul.mubr.bf16.gmra.mrb[52].mxu1 %v10808_v34  ;;  %v354_v5 = vadd.f32 %v353_v53, %v10696_v42 }
 0x1c4   :  { %v357_v1 = vpop.f32.mrb[26].mxu0  ;;  %2955 = vmatpush1.bf16.msra.mxu0 %v9621_v37  ;;  %3181 = vmatpush1.bf16.msra.mxu1 %v9624_v38  ;;  %v356_v13 = vadd.f32 %v355_v60, %v10698_v45  ;;  %v466_v16 = vpop.f32.mrb[24].mxu1  ;;  %v9647_v60 = vld [vmem:[#allocation7 + $0xb44] ss:$48 sps:$4 sm:$0xff]  }
 0x1c5   :  { %v358_v6 = vadd.f32 %v357_v1, %v10696_v42  ;;  %v359_v7 = vpop.f32.mrb[27].mxu0  ;;  %2956 = vmatprep.subr.bf16.mxu0 %v9629_v43  ;;  %3182 = vmatprep.subr.bf16.mxu1 %v9632_v46  ;;  %v467_v27 = vadd.f32 %v466_v16, %v10700_v48  ;;  %v468_v28 = vpop.f32.mrb[25].mxu1  ;;  %v9639_v46 = vld [vmem:[#allocation7 + $0xae0] ss:$48 sps:$4 sm:$0xff]  }
 0x1c6   :  { %v360_v14 = vadd.f32 %v359_v7, %v10698_v45  ;;  %v469_v32 = vadd.f32 %v468_v28, %v10704_v52  ;;  %v470_v33 = vpop.f32.mrb[26].mxu1 }
 0x1c7   :  { %v10828_v15 = vpack.c.bf16 %v358_v6, %v354_v5  ;;  %v471_v37 = vadd.f32 %v470_v33, %v10700_v48  ;;  %v472_v38 = vpop.f32.mrb[27].mxu1  ;;  %v9659_v33 = vld [vmem:[#allocation7 + $0x14] ss:$48 sps:$4 sm:$0xff]  }
 0x1c8   :  { %v10830_v19 = vpack.c.bf16 %v360_v14, %v356_v13  ;;  %2957 = vmatpush1.bf16.msra.mxu0 %v9627_v2  ;;  %3183 = vmatpush1.bf16.msra.mxu1 %v9630_v3  ;;  %v473_v41 = vadd.f32 %v472_v38, %v10704_v52  ;;  %v9653_v14 = vld [vmem:[#allocation7 + $0xba4] ss:$48 sps:$4 sm:$0xff]  }
 0x1c9   :  { %2958 = vmatprep.subr.bf16.mxu0 %v9635_v8  ;;  %3184 = vmatprep.subr.bf16.mxu1 %v9638_v9  ;;  %v10840_v50 = vpack.c.bf16 %v471_v37, %v467_v27  ;;  %v9645_v8 = vld [vmem:[#allocation7 + $0xb40] ss:$48 sps:$4 sm:$0xff]   ;;  %v9665_v38 = vld [vmem:[#allocation7 + $0x74] ss:$48 sps:$4 sm:$0xff]  }
 0x1ca   :  { %v363_v35 = vpop.f32.mrb[28].mxu0  ;;  %2913 = vmatprep.mubr.bf16.mxu0 %v10830_v19  ;;  %3139 = vmatprep.mubr.bf16.mxu1 %v10830_v19  ;;  %v10844_v1 = vpack.c.bf16 %v473_v41, %v469_v32  ;;  %v9663_v41 = vld [vmem:[#allocation7 + $0x70] ss:$48 sps:$4 sm:$0xff]  }
 0x1cb   :  { %v365_v40 = vpop.f32.mrb[29].mxu0  ;;  %2914 = vmatmul.mubr.bf16.gmra.mrb[56].mxu0 %v10828_v15  ;;  %3140 = vmatmul.mubr.bf16.gmra.mrb[56].mxu1 %v10828_v15  ;;  %v364_v53 = vadd.f32 %v363_v35, %v10696_v42  ;;  %v9662_v35 = vld [vmem:[#allocation7 + $0x1c] ss:$48 sps:$4 sm:$0xff]  }
 0x1cc   :  { %v367_v43 = vpop.f32.mrb[30].mxu0  ;;  %2959 = vmatpush1.bf16.msra.mxu0 %v9633_v21  ;;  %3185 = vmatpush1.bf16.msra.mxu1 %v9636_v26  ;;  %v366_v2 = vadd.f32 %v365_v40, %v10698_v45  ;;  %v476_v6 = vpop.f32.mrb[28].mxu1  ;;  %v9668_v40 = vld [vmem:[#allocation7 + $0x7c] ss:$48 sps:$4 sm:$0xff]  }
 0x1cd   :  { %v368_v56 = vadd.f32 %v367_v43, %v10696_v42  ;;  %v369_v59 = vpop.f32.mrb[31].mxu0  ;;  %2960 = vmatprep.subr.bf16.mxu0 %v9641_v29  ;;  %3186 = vmatprep.subr.bf16.mxu1 %v9644_v30  ;;  %v9648_v42 = vld [vmem:[#allocation7 + $0xb48] ss:$48 sps:$4 sm:$0xff]   ;;  %v477_v9 = vadd.f32 %v476_v6, %v10700_v48  ;;  %v478_v13 = vpop.f32.mrb[29].mxu1  ;;  %v9651_v29 = vld [vmem:[#allocation7 + $0xba0] ss:$48 sps:$4 sm:$0xff]  }
 0x1ce   :  { %v370_v3 = vadd.f32 %v369_v59, %v10698_v45  ;;  %v479_v16 = vadd.f32 %v478_v13, %v10704_v52  ;;  %v480_v21 = vpop.f32.mrb[30].mxu1  ;;  %v9656_v45 = vld [vmem:[#allocation7 + $0xbac] ss:$48 sps:$4 sm:$0xff]   ;;  %v9654_v30 = vld [vmem:[#allocation7 + $0xba8] ss:$48 sps:$4 sm:$0xff]  }
 0x1cf   :  { %v10848_v5 = vpack.c.bf16 %v368_v56, %v364_v53  ;;  %v481_v26 = vadd.f32 %v480_v21, %v10700_v48  ;;  %v482_v27 = vpop.f32.mrb[31].mxu1  ;;  %v9657_v48 = vld [vmem:[#allocation7 + $0x10] ss:$48 sps:$4 sm:$0xff]   ;;  %v9666_v43 = vld [vmem:[#allocation7 + $0x78] ss:$48 sps:$4 sm:$0xff]  }
 0x1d0   :  { %v10850_v7 = vpack.c.bf16 %v370_v3, %v366_v2  ;;  %2961 = vmatpush1.bf16.msra.mxu0 %v9639_v46  ;;  %3187 = vmatpush1.bf16.msra.mxu1 %v9642_v49  ;;  %v483_v28 = vadd.f32 %v482_v27, %v10704_v52  ;;  %v9660_v52 = vld [vmem:[#allocation7 + $0x18] ss:$48 sps:$4 sm:$0xff]   ;;  %v9671_v46 = vld [vmem:[#allocation7 + $0xd4] ss:$48 sps:$4 sm:$0xff]   ;;  %v9674_v49 = vld [vmem:[#allocation7 + $0xdc] ss:$48 sps:$4 sm:$0xff]  }
 0x1d1   :  { %2962 = vmatprep.subr.bf16.mxu0 %v9647_v60  ;;  %3188 = vmatprep.subr.bf16.mxu1 %v9650_v62  ;;  %v10860_v32 = vpack.c.bf16 %v481_v26, %v477_v9  ;;  %v9669_v53 = vld [vmem:[#allocation7 + $0xd0] ss:$48 sps:$4 sm:$0xff]   ;;  %v9672_v56 = vld [vmem:[#allocation7 + $0xd8] ss:$48 sps:$4 sm:$0xff]   ;;  %v9677_v59 = vld [vmem:[#allocation7 + $0x134] ss:$48 sps:$4 sm:$0xff]  }
 0x1d2   :  { %2923 = vmatprep.mubr.bf16.mxu0 %v10850_v7  ;;  %3149 = vmatprep.mubr.bf16.mxu1 %v10850_v7  ;;  %v10863_v37 = vpack.c.bf16 %v483_v28, %v479_v16  ;;  %v9680_v60 = vld [vmem:[#allocation7 + $0x13c] ss:$48 sps:$4 sm:$0xff]   ;;  %v9675_v62 = vld [vmem:[#allocation7 + $0x130] ss:$48 sps:$4 sm:$0xff]   ;;  %v9678_v2 = vld [vmem:[#allocation7 + $0x138] ss:$48 sps:$4 sm:$0xff]  }
 0x1d3   :  { %2924 = vmatmul.mubr.bf16.gmra.mrb[60].mxu0 %v10848_v5  ;;  %3150 = vmatmul.mubr.bf16.gmra.mrb[60].mxu1 %v10848_v5  ;;  %v9683_v3 = vld [vmem:[#allocation7 + $0x194] ss:$48 sps:$4 sm:$0xff]   ;;  %v9686_v6 = vld [vmem:[#allocation7 + $0x19c] ss:$48 sps:$4 sm:$0xff]   ;;  %v9690_v16 = vld [vmem:[#allocation7 + $0x1f8] ss:$48 sps:$4 sm:$0xff]  }
 0x1d4   :  { %2963 = vmatpush1.bf16.msra.mxu0 %v9645_v8  ;;  %3189 = vmatpush1.bf16.msra.mxu1 %v9648_v42  ;;  %v9681_v8 = vld [vmem:[#allocation7 + $0x190] ss:$48 sps:$4 sm:$0xff]   ;;  %v9684_v42 = vld [vmem:[#allocation7 + $0x198] ss:$48 sps:$4 sm:$0xff]   ;;  %v9689_v9 = vld [vmem:[#allocation7 + $0x1f4] ss:$48 sps:$4 sm:$0xff]  }
 0x1d5   :  { %2964 = vmatprep.subr.bf16.mxu0 %v9653_v14  ;;  %2966 = vmatprep.mubr.bf16.mxu0 %v10724_v17  ;;  %v9692_v13 = vld [vmem:[#allocation7 + $0x1fc] ss:$48 sps:$4 sm:$0xff]   ;;  %v9687_v14 = vld [vmem:[#allocation7 + $0x1f0] ss:$48 sps:$4 sm:$0xff]   ;;  %v9695_v21 = vld [vmem:[#allocation7 + $0x254] ss:$48 sps:$4 sm:$0xff]  }
 0x1d6   :  { %3190 = vmatprep.subr.bf16.mxu1 %v9656_v45  ;;  %3192 = vmatprep.mubr.bf16.mxu1 %v10724_v17  ;;  %v9698_v45 = vld [vmem:[#allocation7 + $0x25c] ss:$48 sps:$4 sm:$0xff]   ;;  %v9693_v26 = vld [vmem:[#allocation7 + $0x250] ss:$48 sps:$4 sm:$0xff]   ;;  %v9696_v27 = vld [vmem:[#allocation7 + $0x258] ss:$48 sps:$4 sm:$0xff]  }
 0x1d7   :  { %v9701_v28 = vld [vmem:[#allocation7 + $0x2b4] ss:$48 sps:$4 sm:$0xff]  }
 0x1d8   :  { %2965 = vmatpush1.bf16.msra.mxu0 %v9651_v29  ;;  %3191 = vmatpush1.bf16.msra.mxu1 %v9654_v30  ;;  %v9704_v29 = vld [vmem:[#allocation7 + $0x2bc] ss:$48 sps:$4 sm:$0xff]   ;;  %v9699_v30 = vld [vmem:[#allocation7 + $0x2b0] ss:$48 sps:$4 sm:$0xff]  }
 0x1d9   :  { %3273 = vmatprep.subr.bf16.mxu0 %v9659_v33  ;;  %3499 = vmatprep.subr.bf16.mxu1 %v9662_v35  ;;  %v9702_v33 = vld [vmem:[#allocation7 + $0x2b8] ss:$48 sps:$4 sm:$0xff]   ;;  %v9707_v35 = vld [vmem:[#allocation7 + $0x314] ss:$48 sps:$4 sm:$0xff]  }
 0x1db   :  { %2967 = vmatmul.mubr.bf16.vlgmr.msra.gmra.mrb[32].mxu0 %v10720_v11  ;;  %3193 = vmatmul.mubr.bf16.vlgmr.msra.gmra.mrb[32].mxu1 %v10720_v11 }
 0x1dc   :  { %3274 = vmatpush1.bf16.msra.mxu0 %v9657_v48  ;;  %3500 = vmatpush1.bf16.msra.mxu1 %v9660_v52  ;;  %v9710_v48 = vld [vmem:[#allocation7 + $0x31c] ss:$48 sps:$4 sm:$0xff]   ;;  %v9705_v52 = vld [vmem:[#allocation7 + $0x310] ss:$48 sps:$4 sm:$0xff]  }
 0x1dd   :  { %2976 = vmatprep.mubr.bf16.mxu0 %v10744_v47  ;;  %3202 = vmatprep.mubr.bf16.mxu1 %v10744_v47 }
 0x1de   :  { %3275 = vmatprep.subr.bf16.mxu0 %v9665_v38  ;;  %3501 = vmatprep.subr.bf16.mxu1 %v9668_v40  ;;  %v9708_v38 = vld [vmem:[#allocation7 + $0x318] ss:$48 sps:$4 sm:$0xff]   ;;  %v9713_v40 = vld [vmem:[#allocation7 + $0x374] ss:$48 sps:$4 sm:$0xff]  }
 0x1e0   :  { %3276 = vmatpush1.bf16.msra.mxu0 %v9663_v41  ;;  %3502 = vmatpush1.bf16.msra.mxu1 %v9666_v43  ;;  %v9716_v41 = vld [vmem:[#allocation7 + $0x37c] ss:$48 sps:$4 sm:$0xff]   ;;  %v9711_v43 = vld [vmem:[#allocation7 + $0x370] ss:$48 sps:$4 sm:$0xff]  }
 0x1e1   :  { %3277 = vmatprep.subr.bf16.mxu0 %v9671_v46  ;;  %3503 = vmatprep.subr.bf16.mxu1 %v9674_v49  ;;  %v9714_v46 = vld [vmem:[#allocation7 + $0x378] ss:$48 sps:$4 sm:$0xff]   ;;  %v9719_v49 = vld [vmem:[#allocation7 + $0x3d4] ss:$48 sps:$4 sm:$0xff]  }
 0x1e3   :  { %2977 = vmatmul.mubr.bf16.gmra.mrb[36].mxu0 %v10740_v39  ;;  %3203 = vmatmul.mubr.bf16.gmra.mrb[36].mxu1 %v10740_v39 }
 0x1e4   :  { %3278 = vmatpush1.bf16.msra.mxu0 %v9669_v53  ;;  %3504 = vmatpush1.bf16.msra.mxu1 %v9672_v56  ;;  %v9722_v53 = vld [vmem:[#allocation7 + $0x3dc] ss:$48 sps:$4 sm:$0xff]   ;;  %v9717_v56 = vld [vmem:[#allocation7 + $0x3d0] ss:$48 sps:$4 sm:$0xff]  }
 0x1e5   :  { %2986 = vmatprep.mubr.bf16.mxu0 %v10764_v18  ;;  %3212 = vmatprep.mubr.bf16.mxu1 %v10764_v18 }
 0x1e6   :  { %3279 = vmatprep.subr.bf16.mxu0 %v9677_v59  ;;  %3505 = vmatprep.subr.bf16.mxu1 %v9680_v60  ;;  %v9720_v59 = vld [vmem:[#allocation7 + $0x3d8] ss:$48 sps:$4 sm:$0xff]   ;;  %v9725_v60 = vld [vmem:[#allocation7 + $0x434] ss:$48 sps:$4 sm:$0xff]  }
 0x1e8   :  { %3280 = vmatpush1.bf16.msra.mxu0 %v9675_v62  ;;  %3506 = vmatpush1.bf16.msra.mxu1 %v9678_v2  ;;  %v9728_v62 = vld [vmem:[#allocation7 + $0x43c] ss:$48 sps:$4 sm:$0xff]   ;;  %v9723_v2 = vld [vmem:[#allocation7 + $0x430] ss:$48 sps:$4 sm:$0xff]  }
 0x1e9   :  { %3281 = vmatprep.subr.bf16.mxu0 %v9683_v3  ;;  %3507 = vmatprep.subr.bf16.mxu1 %v9686_v6  ;;  %v9726_v3 = vld [vmem:[#allocation7 + $0x438] ss:$48 sps:$4 sm:$0xff]   ;;  %v9731_v6 = vld [vmem:[#allocation7 + $0x494] ss:$48 sps:$4 sm:$0xff]  }
 0x1eb   :  { %2987 = vmatmul.mubr.bf16.gmra.mrb[40].mxu0 %v10760_v10  ;;  %3213 = vmatmul.mubr.bf16.gmra.mrb[40].mxu1 %v10760_v10 }
 0x1ec   :  { %3282 = vmatpush1.bf16.msra.mxu0 %v9681_v8  ;;  %3508 = vmatpush1.bf16.msra.mxu1 %v9684_v42  ;;  %v9734_v8 = vld [vmem:[#allocation7 + $0x49c] ss:$48 sps:$4 sm:$0xff]   ;;  %v9729_v42 = vld [vmem:[#allocation7 + $0x490] ss:$48 sps:$4 sm:$0xff]  }
 0x1ed   :  { %2996 = vmatprep.mubr.bf16.mxu0 %v10784_v58  ;;  %3222 = vmatprep.mubr.bf16.mxu1 %v10784_v58 }
 0x1ee   :  { %3283 = vmatprep.subr.bf16.mxu0 %v9689_v9  ;;  %3509 = vmatprep.subr.bf16.mxu1 %v9692_v13  ;;  %v9732_v9 = vld [vmem:[#allocation7 + $0x498] ss:$48 sps:$4 sm:$0xff]   ;;  %v9737_v13 = vld [vmem:[#allocation7 + $0x4f4] ss:$48 sps:$4 sm:$0xff]  }
 0x1f0   :  { %3284 = vmatpush1.bf16.msra.mxu0 %v9687_v14  ;;  %3510 = vmatpush1.bf16.msra.mxu1 %v9690_v16  ;;  %v9740_v14 = vld [vmem:[#allocation7 + $0x4fc] ss:$48 sps:$4 sm:$0xff]   ;;  %v9735_v16 = vld [vmem:[#allocation7 + $0x4f0] ss:$48 sps:$4 sm:$0xff]  }
 0x1f1   :  { %3285 = vmatprep.subr.bf16.mxu0 %v9695_v21  ;;  %3511 = vmatprep.subr.bf16.mxu1 %v9698_v45  ;;  %v9738_v21 = vld [vmem:[#allocation7 + $0x4f8] ss:$48 sps:$4 sm:$0xff]   ;;  %v9743_v45 = vld [vmem:[#allocation7 + $0x554] ss:$48 sps:$4 sm:$0xff]  }
 0x1f3   :  { %2997 = vmatmul.mubr.bf16.gmra.mrb[44].mxu0 %v10780_v44  ;;  %3223 = vmatmul.mubr.bf16.gmra.mrb[44].mxu1 %v10780_v44 }
 0x1f4   :  { %3286 = vmatpush1.bf16.msra.mxu0 %v9693_v26  ;;  %3512 = vmatpush1.bf16.msra.mxu1 %v9696_v27  ;;  %v9746_v26 = vld [vmem:[#allocation7 + $0x55c] ss:$48 sps:$4 sm:$0xff]   ;;  %v9741_v27 = vld [vmem:[#allocation7 + $0x550] ss:$48 sps:$4 sm:$0xff]  }
 0x1f5   :  { %3006 = vmatprep.mubr.bf16.mxu0 %v10804_v31  ;;  %3232 = vmatprep.mubr.bf16.mxu1 %v10804_v31 }
 0x1f6   :  { %3287 = vmatprep.subr.bf16.mxu0 %v9701_v28  ;;  %3513 = vmatprep.subr.bf16.mxu1 %v9704_v29  ;;  %v9744_v28 = vld [vmem:[#allocation7 + $0x558] ss:$48 sps:$4 sm:$0xff]   ;;  %v9749_v29 = vld [vmem:[#allocation7 + $0x5b4] ss:$48 sps:$4 sm:$0xff]  }
 0x1f8   :  { %3288 = vmatpush1.bf16.msra.mxu0 %v9699_v30  ;;  %3514 = vmatpush1.bf16.msra.mxu1 %v9702_v33  ;;  %v9752_v30 = vld [vmem:[#allocation7 + $0x5bc] ss:$48 sps:$4 sm:$0xff]   ;;  %v9747_v33 = vld [vmem:[#allocation7 + $0x5b0] ss:$48 sps:$4 sm:$0xff]  }
 0x1f9   :  { %3289 = vmatprep.subr.bf16.mxu0 %v9707_v35  ;;  %3515 = vmatprep.subr.bf16.mxu1 %v9710_v48  ;;  %v9750_v35 = vld [vmem:[#allocation7 + $0x5b8] ss:$48 sps:$4 sm:$0xff]   ;;  %v9755_v48 = vld [vmem:[#allocation7 + $0x614] ss:$48 sps:$4 sm:$0xff]  }
 0x1fb   :  { %3007 = vmatmul.mubr.bf16.gmra.mrb[48].mxu0 %v10800_v24  ;;  %3233 = vmatmul.mubr.bf16.gmra.mrb[48].mxu1 %v10800_v24 }
 0x1fc   :  { %3290 = vmatpush1.bf16.msra.mxu0 %v9705_v52  ;;  %3516 = vmatpush1.bf16.msra.mxu1 %v9708_v38  ;;  %v9758_v52 = vld [vmem:[#allocation7 + $0x61c] ss:$48 sps:$4 sm:$0xff]   ;;  %v9753_v38 = vld [vmem:[#allocation7 + $0x610] ss:$48 sps:$4 sm:$0xff]  }
 0x1fd   :  { %3016 = vmatprep.mubr.bf16.mxu0 %v10824_v12  ;;  %3242 = vmatprep.mubr.bf16.mxu1 %v10824_v12 }
 0x1fe   :  { %3291 = vmatprep.subr.bf16.mxu0 %v9713_v40  ;;  %3517 = vmatprep.subr.bf16.mxu1 %v9716_v41  ;;  %v9756_v40 = vld [vmem:[#allocation7 + $0x618] ss:$48 sps:$4 sm:$0xff]   ;;  %v9761_v41 = vld [vmem:[#allocation7 + $0x674] ss:$48 sps:$4 sm:$0xff]  }
 0x200   :  { %3292 = vmatpush1.bf16.msra.mxu0 %v9711_v43  ;;  %3518 = vmatpush1.bf16.msra.mxu1 %v9714_v46  ;;  %v9764_v43 = vld [vmem:[#allocation7 + $0x67c] ss:$48 sps:$4 sm:$0xff]   ;;  %v9759_v46 = vld [vmem:[#allocation7 + $0x670] ss:$48 sps:$4 sm:$0xff]  }
 0x201   :  { %3293 = vmatprep.subr.bf16.mxu0 %v9719_v49  ;;  %3519 = vmatprep.subr.bf16.mxu1 %v9722_v53  ;;  %v9762_v49 = vld [vmem:[#allocation7 + $0x678] ss:$48 sps:$4 sm:$0xff]   ;;  %v9767_v53 = vld [vmem:[#allocation7 + $0x6d4] ss:$48 sps:$4 sm:$0xff]  }
 0x203   :  { %3017 = vmatmul.mubr.bf16.gmra.mrb[52].mxu0 %v10820_v4  ;;  %3243 = vmatmul.mubr.bf16.gmra.mrb[52].mxu1 %v10820_v4 }
 0x204   :  { %3294 = vmatpush1.bf16.msra.mxu0 %v9717_v56  ;;  %3520 = vmatpush1.bf16.msra.mxu1 %v9720_v59  ;;  %v9770_v56 = vld [vmem:[#allocation7 + $0x6dc] ss:$48 sps:$4 sm:$0xff]   ;;  %v9765_v59 = vld [vmem:[#allocation7 + $0x6d0] ss:$48 sps:$4 sm:$0xff]  }
 0x205   :  { %3026 = vmatprep.mubr.bf16.mxu0 %v10844_v1  ;;  %3252 = vmatprep.mubr.bf16.mxu1 %v10844_v1 }
 0x206   :  { %3295 = vmatprep.subr.bf16.mxu0 %v9725_v60  ;;  %3521 = vmatprep.subr.bf16.mxu1 %v9728_v62  ;;  %v9768_v60 = vld [vmem:[#allocation7 + $0x6d8] ss:$48 sps:$4 sm:$0xff]   ;;  %v9773_v62 = vld [vmem:[#allocation7 + $0x734] ss:$48 sps:$4 sm:$0xff]  }
 0x208   :  { %3296 = vmatpush1.bf16.msra.mxu0 %v9723_v2  ;;  %3522 = vmatpush1.bf16.msra.mxu1 %v9726_v3  ;;  %v9776_v2 = vld [vmem:[#allocation7 + $0x73c] ss:$48 sps:$4 sm:$0xff]   ;;  %v9771_v3 = vld [vmem:[#allocation7 + $0x730] ss:$48 sps:$4 sm:$0xff]  }
 0x209   :  { %3297 = vmatprep.subr.bf16.mxu0 %v9731_v6  ;;  %3523 = vmatprep.subr.bf16.mxu1 %v9734_v8  ;;  %v9774_v6 = vld [vmem:[#allocation7 + $0x738] ss:$48 sps:$4 sm:$0xff]   ;;  %v9779_v8 = vld [vmem:[#allocation7 + $0x794] ss:$48 sps:$4 sm:$0xff]  }
 0x20b   :  { %3027 = vmatmul.mubr.bf16.gmra.mrb[56].mxu0 %v10840_v50  ;;  %3253 = vmatmul.mubr.bf16.gmra.mrb[56].mxu1 %v10840_v50 }
 0x20c   :  { %3298 = vmatpush1.bf16.msra.mxu0 %v9729_v42  ;;  %3524 = vmatpush1.bf16.msra.mxu1 %v9732_v9  ;;  %v9782_v42 = vld [vmem:[#allocation7 + $0x79c] ss:$48 sps:$4 sm:$0xff]   ;;  %v9777_v9 = vld [vmem:[#allocation7 + $0x790] ss:$48 sps:$4 sm:$0xff]  }
 0x20d   :  { %3036 = vmatprep.mubr.bf16.mxu0 %v10863_v37  ;;  %3262 = vmatprep.mubr.bf16.mxu1 %v10863_v37 }
 0x20e   :  { %3299 = vmatprep.subr.bf16.mxu0 %v9737_v13  ;;  %3525 = vmatprep.subr.bf16.mxu1 %v9740_v14  ;;  %v9780_v13 = vld [vmem:[#allocation7 + $0x798] ss:$48 sps:$4 sm:$0xff]   ;;  %v9785_v14 = vld [vmem:[#allocation7 + $0x7f4] ss:$48 sps:$4 sm:$0xff]  }
 0x210   :  { %3300 = vmatpush1.bf16.msra.mxu0 %v9735_v16  ;;  %3526 = vmatpush1.bf16.msra.mxu1 %v9738_v21  ;;  %v9788_v16 = vld [vmem:[#allocation7 + $0x7fc] ss:$48 sps:$4 sm:$0xff]   ;;  %v9783_v21 = vld [vmem:[#allocation7 + $0x7f0] ss:$48 sps:$4 sm:$0xff]  }
 0x211   :  { %3301 = vmatprep.subr.bf16.mxu0 %v9743_v45  ;;  %3527 = vmatprep.subr.bf16.mxu1 %v9746_v26  ;;  %v9786_v45 = vld [vmem:[#allocation7 + $0x7f8] ss:$48 sps:$4 sm:$0xff]   ;;  %v9791_v26 = vld [vmem:[#allocation7 + $0x854] ss:$48 sps:$4 sm:$0xff]  }
 0x213   :  { %3037 = vmatmul.mubr.bf16.gmra.mrb[60].mxu0 %v10860_v32  ;;  %3263 = vmatmul.mubr.bf16.gmra.mrb[60].mxu1 %v10860_v32 }
 0x214   :  { %3302 = vmatpush1.bf16.msra.mxu0 %v9741_v27  ;;  %3305 = vmatprep.mubr.bf16.mxu0 %v10710_v57  ;;  %v9794_v27 = vld [vmem:[#allocation7 + $0x85c] ss:$48 sps:$4 sm:$0xff]  }
 0x215   :  { %3528 = vmatpush1.bf16.msra.mxu1 %v9744_v28  ;;  %3531 = vmatprep.mubr.bf16.mxu1 %v10710_v57  ;;  %v9789_v28 = vld [vmem:[#allocation7 + $0x850] ss:$48 sps:$4 sm:$0xff]  }
 0x216   :  { %3303 = vmatprep.subr.bf16.mxu0 %v9749_v29  ;;  %3529 = vmatprep.subr.bf16.mxu1 %v9752_v30  ;;  %v9792_v29 = vld [vmem:[#allocation7 + $0x858] ss:$48 sps:$4 sm:$0xff]   ;;  %v9797_v30 = vld [vmem:[#allocation7 + $0x8b4] ss:$48 sps:$4 sm:$0xff]  }
 0x218   :  { %3304 = vmatpush1.bf16.msra.mxu0 %v9747_v33  ;;  %v9800_v33 = vld [vmem:[#allocation7 + $0x8bc] ss:$48 sps:$4 sm:$0xff]  }
 0x219   :  { %3530 = vmatpush1.bf16.msra.mxu1 %v9750_v35  ;;  %3386 = vmatprep.subr.bf16.mxu0 %v9755_v48  ;;  %v9795_v35 = vld [vmem:[#allocation7 + $0x8b0] ss:$48 sps:$4 sm:$0xff]   ;;  %v9798_v48 = vld [vmem:[#allocation7 + $0x8b8] ss:$48 sps:$4 sm:$0xff]  }
 0x21a   :  { %3612 = vmatprep.subr.bf16.mxu1 %v9758_v52  ;;  %v9803_v52 = vld [vmem:[#allocation7 + $0x914] ss:$48 sps:$4 sm:$0xff]  }
 0x21b   :  { %3306 = vmatmul.mubr.bf16.vlgmr.msra.gmra.mrb[64].mxu0 %v10708_v55 }
 0x21c   :  { %3532 = vmatmul.mubr.bf16.vlgmr.msra.gmra.mrb[64].mxu1 %v10708_v55  ;;  %3315 = vmatprep.mubr.bf16.mxu0 %v10730_v22 }
 0x21d   :  { %3387 = vmatpush1.bf16.msra.mxu0 %v9753_v38  ;;  %3541 = vmatprep.mubr.bf16.mxu1 %v10730_v22  ;;  %v9806_v38 = vld [vmem:[#allocation7 + $0x91c] ss:$48 sps:$4 sm:$0xff]  }
 0x21e   :  { %3613 = vmatpush1.bf16.msra.mxu1 %v9756_v40  ;;  %3388 = vmatprep.subr.bf16.mxu0 %v9761_v41  ;;  %v9801_v40 = vld [vmem:[#allocation7 + $0x910] ss:$48 sps:$4 sm:$0xff]   ;;  %v9804_v41 = vld [vmem:[#allocation7 + $0x918] ss:$48 sps:$4 sm:$0xff]  }
 0x21f   :  { %3614 = vmatprep.subr.bf16.mxu1 %v9764_v43  ;;  %v9809_v43 = vld [vmem:[#allocation7 + $0x974] ss:$48 sps:$4 sm:$0xff]  }
 0x221   :  { %3389 = vmatpush1.bf16.msra.mxu0 %v9759_v46  ;;  %v9812_v46 = vld [vmem:[#allocation7 + $0x97c] ss:$48 sps:$4 sm:$0xff]  }
 0x222   :  { %3615 = vmatpush1.bf16.msra.mxu1 %v9762_v49  ;;  %3390 = vmatprep.subr.bf16.mxu0 %v9767_v53  ;;  %v9807_v49 = vld [vmem:[#allocation7 + $0x970] ss:$48 sps:$4 sm:$0xff]   ;;  %v9810_v53 = vld [vmem:[#allocation7 + $0x978] ss:$48 sps:$4 sm:$0xff]  }
 0x223   :  { %3316 = vmatmul.mubr.bf16.gmra.mrb[68].mxu0 %v10728_v20  ;;  %3616 = vmatprep.subr.bf16.mxu1 %v9770_v56  ;;  %v9815_v56 = vld [vmem:[#allocation7 + $0x9d4] ss:$48 sps:$4 sm:$0xff]  }
 0x224   :  { %3542 = vmatmul.mubr.bf16.gmra.mrb[68].mxu1 %v10728_v20  ;;  %3325 = vmatprep.mubr.bf16.mxu0 %v10750_v54 }
 0x225   :  { %3391 = vmatpush1.bf16.msra.mxu0 %v9765_v59  ;;  %3551 = vmatprep.mubr.bf16.mxu1 %v10750_v54  ;;  %v9818_v59 = vld [vmem:[#allocation7 + $0x9dc] ss:$48 sps:$4 sm:$0xff]  }
 0x226   :  { %3617 = vmatpush1.bf16.msra.mxu1 %v9768_v60  ;;  %3392 = vmatprep.subr.bf16.mxu0 %v9773_v62  ;;  %v9813_v60 = vld [vmem:[#allocation7 + $0x9d0] ss:$48 sps:$4 sm:$0xff]   ;;  %v9816_v62 = vld [vmem:[#allocation7 + $0x9d8] ss:$48 sps:$4 sm:$0xff]  }
 0x227   :  { %3618 = vmatprep.subr.bf16.mxu1 %v9776_v2  ;;  %v9821_v2 = vld [vmem:[#allocation7 + $0xa34] ss:$48 sps:$4 sm:$0xff]  }
 0x229   :  { %3393 = vmatpush1.bf16.msra.mxu0 %v9771_v3  ;;  %v9824_v3 = vld [vmem:[#allocation7 + $0xa3c] ss:$48 sps:$4 sm:$0xff]  }
 0x22a   :  { %3619 = vmatpush1.bf16.msra.mxu1 %v9774_v6  ;;  %3394 = vmatprep.subr.bf16.mxu0 %v9779_v8  ;;  %v9819_v6 = vld [vmem:[#allocation7 + $0xa30] ss:$48 sps:$4 sm:$0xff]   ;;  %v9822_v8 = vld [vmem:[#allocation7 + $0xa38] ss:$48 sps:$4 sm:$0xff]  }
 0x22b   :  { %3326 = vmatmul.mubr.bf16.gmra.mrb[72].mxu0 %v10748_v51  ;;  %3620 = vmatprep.subr.bf16.mxu1 %v9782_v42  ;;  %v9827_v42 = vld [vmem:[#allocation7 + $0xa94] ss:$48 sps:$4 sm:$0xff]  }
 0x22c   :  { %3552 = vmatmul.mubr.bf16.gmra.mrb[72].mxu1 %v10748_v51  ;;  %3335 = vmatprep.mubr.bf16.mxu0 %v10770_v25 }
 0x22d   :  { %3395 = vmatpush1.bf16.msra.mxu0 %v9777_v9  ;;  %3561 = vmatprep.mubr.bf16.mxu1 %v10770_v25  ;;  %v9830_v9 = vld [vmem:[#allocation7 + $0xa9c] ss:$48 sps:$4 sm:$0xff]  }
 0x22e   :  { %3621 = vmatpush1.bf16.msra.mxu1 %v9780_v13  ;;  %3396 = vmatprep.subr.bf16.mxu0 %v9785_v14  ;;  %v9825_v13 = vld [vmem:[#allocation7 + $0xa90] ss:$48 sps:$4 sm:$0xff]   ;;  %v9828_v14 = vld [vmem:[#allocation7 + $0xa98] ss:$48 sps:$4 sm:$0xff]  }
 0x22f   :  { %3622 = vmatprep.subr.bf16.mxu1 %v9788_v16  ;;  %v9833_v16 = vld [vmem:[#allocation7 + $0xaf4] ss:$48 sps:$4 sm:$0xff]  }
 0x231   :  { %3397 = vmatpush1.bf16.msra.mxu0 %v9783_v21  ;;  %v9836_v21 = vld [vmem:[#allocation7 + $0xafc] ss:$48 sps:$4 sm:$0xff]  }
 0x232   :  { %3623 = vmatpush1.bf16.msra.mxu1 %v9786_v45  ;;  %3398 = vmatprep.subr.bf16.mxu0 %v9791_v26  ;;  %v9831_v45 = vld [vmem:[#allocation7 + $0xaf0] ss:$48 sps:$4 sm:$0xff]   ;;  %v9834_v26 = vld [vmem:[#allocation7 + $0xaf8] ss:$48 sps:$4 sm:$0xff]  }
 0x233   :  { %3336 = vmatmul.mubr.bf16.gmra.mrb[76].mxu0 %v10768_v23  ;;  %3624 = vmatprep.subr.bf16.mxu1 %v9794_v27  ;;  %v9839_v27 = vld [vmem:[#allocation7 + $0xb54] ss:$48 sps:$4 sm:$0xff]  }
 0x234   :  { %3562 = vmatmul.mubr.bf16.gmra.mrb[76].mxu1 %v10768_v23  ;;  %3345 = vmatprep.mubr.bf16.mxu0 %v10790_v63 }
 0x235   :  { %3399 = vmatpush1.bf16.msra.mxu0 %v9789_v28  ;;  %3571 = vmatprep.mubr.bf16.mxu1 %v10790_v63  ;;  %v9842_v28 = vld [vmem:[#allocation7 + $0xb5c] ss:$48 sps:$4 sm:$0xff]  }
 0x236   :  { %3625 = vmatpush1.bf16.msra.mxu1 %v9792_v29  ;;  %3400 = vmatprep.subr.bf16.mxu0 %v9797_v30  ;;  %v9837_v29 = vld [vmem:[#allocation7 + $0xb50] ss:$48 sps:$4 sm:$0xff]   ;;  %v9840_v30 = vld [vmem:[#allocation7 + $0xb58] ss:$48 sps:$4 sm:$0xff]  }
 0x237   :  { %3626 = vmatprep.subr.bf16.mxu1 %v9800_v33  ;;  %v9845_v33 = vld [vmem:[#allocation7 + $0xbb4] ss:$48 sps:$4 sm:$0xff]  }
 0x239   :  { %3401 = vmatpush1.bf16.msra.mxu0 %v9795_v35  ;;  %v9848_v35 = vld [vmem:[#allocation7 + $0xbbc] ss:$48 sps:$4 sm:$0xff]  }
 0x23a   :  { %3627 = vmatpush1.bf16.msra.mxu1 %v9798_v48  ;;  %3402 = vmatprep.subr.bf16.mxu0 %v9803_v52  ;;  %v9843_v48 = vld [vmem:[#allocation7 + $0xbb0] ss:$48 sps:$4 sm:$0xff]   ;;  %v9846_v52 = vld [vmem:[#allocation7 + $0xbb8] ss:$48 sps:$4 sm:$0xff]  }
 0x23b   :  { %3346 = vmatmul.mubr.bf16.gmra.mrb[80].mxu0 %v10788_v61  ;;  %3628 = vmatprep.subr.bf16.mxu1 %v9806_v38  ;;  %v9851_v38 = vld [vmem:[#allocation7 + $0x24] ss:$48 sps:$4 sm:$0xff]  }
 0x23c   :  { %3572 = vmatmul.mubr.bf16.gmra.mrb[80].mxu1 %v10788_v61  ;;  %3355 = vmatprep.mubr.bf16.mxu0 %v10810_v36 }
 0x23d   :  { %3403 = vmatpush1.bf16.msra.mxu0 %v9801_v40  ;;  %3581 = vmatprep.mubr.bf16.mxu1 %v10810_v36  ;;  %v9854_v40 = vld [vmem:[#allocation7 + $0x2c] ss:$48 sps:$4 sm:$0xff]  }
 0x23e   :  { %3629 = vmatpush1.bf16.msra.mxu1 %v9804_v41  ;;  %3404 = vmatprep.subr.bf16.mxu0 %v9809_v43  ;;  %v9849_v41 = vld [vmem:[#allocation7 + $0x20] ss:$48 sps:$4 sm:$0xff]   ;;  %v9852_v43 = vld [vmem:[#allocation7 + $0x28] ss:$48 sps:$4 sm:$0xff]  }
 0x23f   :  { %3630 = vmatprep.subr.bf16.mxu1 %v9812_v46  ;;  %v9857_v46 = vld [vmem:[#allocation7 + $0x84] ss:$48 sps:$4 sm:$0xff]  }
 0x241   :  { %3405 = vmatpush1.bf16.msra.mxu0 %v9807_v49  ;;  %v9860_v49 = vld [vmem:[#allocation7 + $0x8c] ss:$48 sps:$4 sm:$0xff]  }
 0x242   :  { %3631 = vmatpush1.bf16.msra.mxu1 %v9810_v53  ;;  %3406 = vmatprep.subr.bf16.mxu0 %v9815_v56  ;;  %v9855_v53 = vld [vmem:[#allocation7 + $0x80] ss:$48 sps:$4 sm:$0xff]   ;;  %v9858_v56 = vld [vmem:[#allocation7 + $0x88] ss:$48 sps:$4 sm:$0xff]  }
 0x243   :  { %3356 = vmatmul.mubr.bf16.gmra.mrb[84].mxu0 %v10808_v34  ;;  %3632 = vmatprep.subr.bf16.mxu1 %v9818_v59  ;;  %v9863_v59 = vld [vmem:[#allocation7 + $0xe4] ss:$48 sps:$4 sm:$0xff]  }
 0x244   :  { %3582 = vmatmul.mubr.bf16.gmra.mrb[84].mxu1 %v10808_v34  ;;  %3365 = vmatprep.mubr.bf16.mxu0 %v10830_v19 }
 0x245   :  { %3407 = vmatpush1.bf16.msra.mxu0 %v9813_v60  ;;  %3591 = vmatprep.mubr.bf16.mxu1 %v10830_v19  ;;  %v9866_v60 = vld [vmem:[#allocation7 + $0xec] ss:$48 sps:$4 sm:$0xff]  }
 0x246   :  { %3633 = vmatpush1.bf16.msra.mxu1 %v9816_v62  ;;  %3408 = vmatprep.subr.bf16.mxu0 %v9821_v2  ;;  %v9861_v62 = vld [vmem:[#allocation7 + $0xe0] ss:$48 sps:$4 sm:$0xff]   ;;  %v9864_v2 = vld [vmem:[#allocation7 + $0xe8] ss:$48 sps:$4 sm:$0xff]  }
 0x247   :  { %3634 = vmatprep.subr.bf16.mxu1 %v9824_v3  ;;  %v9869_v3 = vld [vmem:[#allocation7 + $0x144] ss:$48 sps:$4 sm:$0xff]  }
 0x249   :  { %3409 = vmatpush1.bf16.msra.mxu0 %v9819_v6  ;;  %v9872_v6 = vld [vmem:[#allocation7 + $0x14c] ss:$48 sps:$4 sm:$0xff]  }
 0x24a   :  { %3635 = vmatpush1.bf16.msra.mxu1 %v9822_v8  ;;  %3410 = vmatprep.subr.bf16.mxu0 %v9827_v42  ;;  %v9867_v8 = vld [vmem:[#allocation7 + $0x140] ss:$48 sps:$4 sm:$0xff]   ;;  %v9870_v42 = vld [vmem:[#allocation7 + $0x148] ss:$48 sps:$4 sm:$0xff]  }
 0x24b   :  { %3366 = vmatmul.mubr.bf16.gmra.mrb[88].mxu0 %v10828_v15  ;;  %3636 = vmatprep.subr.bf16.mxu1 %v9830_v9  ;;  %v9875_v9 = vld [vmem:[#allocation7 + $0x1a4] ss:$48 sps:$4 sm:$0xff]  }
 0x24c   :  { %3592 = vmatmul.mubr.bf16.gmra.mrb[88].mxu1 %v10828_v15  ;;  %3375 = vmatprep.mubr.bf16.mxu0 %v10850_v7 }
 0x24d   :  { %3411 = vmatpush1.bf16.msra.mxu0 %v9825_v13  ;;  %3601 = vmatprep.mubr.bf16.mxu1 %v10850_v7  ;;  %v9878_v13 = vld [vmem:[#allocation7 + $0x1ac] ss:$48 sps:$4 sm:$0xff]  }
 0x24e   :  { %3637 = vmatpush1.bf16.msra.mxu1 %v9828_v14  ;;  %3412 = vmatprep.subr.bf16.mxu0 %v9833_v16  ;;  %v9873_v14 = vld [vmem:[#allocation7 + $0x1a0] ss:$48 sps:$4 sm:$0xff]   ;;  %v9876_v16 = vld [vmem:[#allocation7 + $0x1a8] ss:$48 sps:$4 sm:$0xff]  }
 0x24f   :  { %3638 = vmatprep.subr.bf16.mxu1 %v9836_v21  ;;  %v9881_v21 = vld [vmem:[#allocation7 + $0x204] ss:$48 sps:$4 sm:$0xff]  }
 0x251   :  { %3413 = vmatpush1.bf16.msra.mxu0 %v9831_v45  ;;  %v9884_v45 = vld [vmem:[#allocation7 + $0x20c] ss:$48 sps:$4 sm:$0xff]  }
 0x252   :  { %3639 = vmatpush1.bf16.msra.mxu1 %v9834_v26  ;;  %3414 = vmatprep.subr.bf16.mxu0 %v9839_v27  ;;  %v9879_v26 = vld [vmem:[#allocation7 + $0x200] ss:$48 sps:$4 sm:$0xff]   ;;  %v9882_v27 = vld [vmem:[#allocation7 + $0x208] ss:$48 sps:$4 sm:$0xff]  }
 0x253   :  { %3376 = vmatmul.mubr.bf16.gmra.mrb[92].mxu0 %v10848_v5  ;;  %3640 = vmatprep.subr.bf16.mxu1 %v9842_v28  ;;  %v9887_v28 = vld [vmem:[#allocation7 + $0x264] ss:$48 sps:$4 sm:$0xff]  }
 0x254   :  { %3602 = vmatmul.mubr.bf16.gmra.mrb[92].mxu1 %v10848_v5  ;;  %3418 = vmatprep.mubr.bf16.mxu0 %v10724_v17 }
 0x255   :  { %3415 = vmatpush1.bf16.msra.mxu0 %v9837_v29  ;;  %3644 = vmatprep.mubr.bf16.mxu1 %v10724_v17  ;;  %v9890_v29 = vld [vmem:[#allocation7 + $0x26c] ss:$48 sps:$4 sm:$0xff]  }
 0x256   :  { %3641 = vmatpush1.bf16.msra.mxu1 %v9840_v30  ;;  %3416 = vmatprep.subr.bf16.mxu0 %v9845_v33  ;;  %v9885_v30 = vld [vmem:[#allocation7 + $0x260] ss:$48 sps:$4 sm:$0xff]   ;;  %v9888_v33 = vld [vmem:[#allocation7 + $0x268] ss:$48 sps:$4 sm:$0xff]  }
 0x257   :  { %3642 = vmatprep.subr.bf16.mxu1 %v9848_v35  ;;  %v9893_v35 = vld [vmem:[#allocation7 + $0x2c4] ss:$48 sps:$4 sm:$0xff]  }
 0x259   :  { %3417 = vmatpush1.bf16.msra.mxu0 %v9843_v48  ;;  %v9896_v48 = vld [vmem:[#allocation7 + $0x2cc] ss:$48 sps:$4 sm:$0xff]  }
 0x25a   :  { %3643 = vmatpush1.bf16.msra.mxu1 %v9846_v52  ;;  %3725 = vmatprep.subr.bf16.mxu0 %v9851_v38  ;;  %v9891_v52 = vld [vmem:[#allocation7 + $0x2c0] ss:$48 sps:$4 sm:$0xff]   ;;  %v9894_v38 = vld [vmem:[#allocation7 + $0x2c8] ss:$48 sps:$4 sm:$0xff]  }
 0x25b   :  { %3951 = vmatprep.subr.bf16.mxu1 %v9854_v40  ;;  %v9899_v40 = vld [vmem:[#allocation7 + $0x324] ss:$48 sps:$4 sm:$0xff]  }
 0x25c   :  { %3419 = vmatmul.mubr.bf16.vlgmr.msra.gmra.mrb[64].mxu0 %v10720_v11 }
 0x25d   :  { %3645 = vmatmul.mubr.bf16.vlgmr.msra.gmra.mrb[64].mxu1 %v10720_v11  ;;  %3428 = vmatprep.mubr.bf16.mxu0 %v10744_v47 }
 0x25e   :  { %3654 = vmatprep.mubr.bf16.mxu1 %v10744_v47  ;;  %3726 = vmatpush1.bf16.msra.mxu0 %v9849_v41  ;;  %v9902_v41 = vld [vmem:[#allocation7 + $0x32c] ss:$48 sps:$4 sm:$0xff]  }
 0x25f   :  { %3952 = vmatpush1.bf16.msra.mxu1 %v9852_v43  ;;  %3727 = vmatprep.subr.bf16.mxu0 %v9857_v46  ;;  %v9897_v43 = vld [vmem:[#allocation7 + $0x320] ss:$48 sps:$4 sm:$0xff]   ;;  %v9900_v46 = vld [vmem:[#allocation7 + $0x328] ss:$48 sps:$4 sm:$0xff]  }
 0x260   :  { %3953 = vmatprep.subr.bf16.mxu1 %v9860_v49  ;;  %v9905_v49 = vld [vmem:[#allocation7 + $0x384] ss:$48 sps:$4 sm:$0xff]  }
 0x262   :  { %3728 = vmatpush1.bf16.msra.mxu0 %v9855_v53  ;;  %v9908_v53 = vld [vmem:[#allocation7 + $0x38c] ss:$48 sps:$4 sm:$0xff]  }
 0x263   :  { %3954 = vmatpush1.bf16.msra.mxu1 %v9858_v56  ;;  %3729 = vmatprep.subr.bf16.mxu0 %v9863_v59  ;;  %v9903_v56 = vld [vmem:[#allocation7 + $0x380] ss:$48 sps:$4 sm:$0xff]   ;;  %v9906_v59 = vld [vmem:[#allocation7 + $0x388] ss:$48 sps:$4 sm:$0xff]  }
 0x264   :  { %3429 = vmatmul.mubr.bf16.gmra.mrb[68].mxu0 %v10740_v39  ;;  %3955 = vmatprep.subr.bf16.mxu1 %v9866_v60  ;;  %v9911_v60 = vld [vmem:[#allocation7 + $0x3e4] ss:$48 sps:$4 sm:$0xff]  }
 0x265   :  { %3655 = vmatmul.mubr.bf16.gmra.mrb[68].mxu1 %v10740_v39  ;;  %3438 = vmatprep.mubr.bf16.mxu0 %v10764_v18 }
 0x266   :  { %3664 = vmatprep.mubr.bf16.mxu1 %v10764_v18  ;;  %3730 = vmatpush1.bf16.msra.mxu0 %v9861_v62  ;;  %v9914_v62 = vld [vmem:[#allocation7 + $0x3ec] ss:$48 sps:$4 sm:$0xff]  }
 0x267   :  { %3956 = vmatpush1.bf16.msra.mxu1 %v9864_v2  ;;  %3731 = vmatprep.subr.bf16.mxu0 %v9869_v3  ;;  %v9909_v2 = vld [vmem:[#allocation7 + $0x3e0] ss:$48 sps:$4 sm:$0xff]   ;;  %v9912_v3 = vld [vmem:[#allocation7 + $0x3e8] ss:$48 sps:$4 sm:$0xff]  }
 0x268   :  { %3957 = vmatprep.subr.bf16.mxu1 %v9872_v6  ;;  %v9917_v6 = vld [vmem:[#allocation7 + $0x444] ss:$48 sps:$4 sm:$0xff]  }
 0x26a   :  { %3732 = vmatpush1.bf16.msra.mxu0 %v9867_v8  ;;  %v9920_v8 = vld [vmem:[#allocation7 + $0x44c] ss:$48 sps:$4 sm:$0xff]  }
 0x26b   :  { %3958 = vmatpush1.bf16.msra.mxu1 %v9870_v42  ;;  %3733 = vmatprep.subr.bf16.mxu0 %v9875_v9  ;;  %v9915_v42 = vld [vmem:[#allocation7 + $0x440] ss:$48 sps:$4 sm:$0xff]   ;;  %v9918_v9 = vld [vmem:[#allocation7 + $0x448] ss:$48 sps:$4 sm:$0xff]  }
 0x26c   :  { %3439 = vmatmul.mubr.bf16.gmra.mrb[72].mxu0 %v10760_v10  ;;  %3959 = vmatprep.subr.bf16.mxu1 %v9878_v13  ;;  %v9923_v13 = vld [vmem:[#allocation7 + $0x4a4] ss:$48 sps:$4 sm:$0xff]  }
 0x26d   :  { %3665 = vmatmul.mubr.bf16.gmra.mrb[72].mxu1 %v10760_v10  ;;  %3448 = vmatprep.mubr.bf16.mxu0 %v10784_v58 }
 0x26e   :  { %3674 = vmatprep.mubr.bf16.mxu1 %v10784_v58  ;;  %3734 = vmatpush1.bf16.msra.mxu0 %v9873_v14  ;;  %v9926_v14 = vld [vmem:[#allocation7 + $0x4ac] ss:$48 sps:$4 sm:$0xff]  }
 0x26f   :  { %3960 = vmatpush1.bf16.msra.mxu1 %v9876_v16  ;;  %3735 = vmatprep.subr.bf16.mxu0 %v9881_v21  ;;  %v9921_v16 = vld [vmem:[#allocation7 + $0x4a0] ss:$48 sps:$4 sm:$0xff]   ;;  %v9924_v21 = vld [vmem:[#allocation7 + $0x4a8] ss:$48 sps:$4 sm:$0xff]  }
 0x270   :  { %3961 = vmatprep.subr.bf16.mxu1 %v9884_v45  ;;  %v9929_v45 = vld [vmem:[#allocation7 + $0x504] ss:$48 sps:$4 sm:$0xff]  }
 0x272   :  { %3736 = vmatpush1.bf16.msra.mxu0 %v9879_v26  ;;  %v9932_v26 = vld [vmem:[#allocation7 + $0x50c] ss:$48 sps:$4 sm:$0xff]  }
 0x273   :  { %3962 = vmatpush1.bf16.msra.mxu1 %v9882_v27  ;;  %3737 = vmatprep.subr.bf16.mxu0 %v9887_v28  ;;  %v9927_v27 = vld [vmem:[#allocation7 + $0x500] ss:$48 sps:$4 sm:$0xff]   ;;  %v9930_v28 = vld [vmem:[#allocation7 + $0x508] ss:$48 sps:$4 sm:$0xff]  }
 0x274   :  { %3449 = vmatmul.mubr.bf16.gmra.mrb[76].mxu0 %v10780_v44  ;;  %3963 = vmatprep.subr.bf16.mxu1 %v9890_v29  ;;  %v9935_v29 = vld [vmem:[#allocation7 + $0x564] ss:$48 sps:$4 sm:$0xff]  }
 0x275   :  { %3675 = vmatmul.mubr.bf16.gmra.mrb[76].mxu1 %v10780_v44  ;;  %3458 = vmatprep.mubr.bf16.mxu0 %v10804_v31 }
 0x276   :  { %3684 = vmatprep.mubr.bf16.mxu1 %v10804_v31  ;;  %3738 = vmatpush1.bf16.msra.mxu0 %v9885_v30  ;;  %v9938_v30 = vld [vmem:[#allocation7 + $0x56c] ss:$48 sps:$4 sm:$0xff]  }
 0x277   :  { %3964 = vmatpush1.bf16.msra.mxu1 %v9888_v33  ;;  %3739 = vmatprep.subr.bf16.mxu0 %v9893_v35  ;;  %v9933_v33 = vld [vmem:[#allocation7 + $0x560] ss:$48 sps:$4 sm:$0xff]   ;;  %v9936_v35 = vld [vmem:[#allocation7 + $0x568] ss:$48 sps:$4 sm:$0xff]  }
 0x278   :  { %3965 = vmatprep.subr.bf16.mxu1 %v9896_v48  ;;  %v9941_v48 = vld [vmem:[#allocation7 + $0x5c4] ss:$48 sps:$4 sm:$0xff]  }
 0x27a   :  { %3740 = vmatpush1.bf16.msra.mxu0 %v9891_v52  ;;  %v9944_v52 = vld [vmem:[#allocation7 + $0x5cc] ss:$48 sps:$4 sm:$0xff]  }
 0x27b   :  { %3966 = vmatpush1.bf16.msra.mxu1 %v9894_v38  ;;  %3741 = vmatprep.subr.bf16.mxu0 %v9899_v40  ;;  %v9939_v38 = vld [vmem:[#allocation7 + $0x5c0] ss:$48 sps:$4 sm:$0xff]   ;;  %v9942_v40 = vld [vmem:[#allocation7 + $0x5c8] ss:$48 sps:$4 sm:$0xff]  }
 0x27c   :  { %3459 = vmatmul.mubr.bf16.gmra.mrb[80].mxu0 %v10800_v24  ;;  %3967 = vmatprep.subr.bf16.mxu1 %v9902_v41  ;;  %v9947_v41 = vld [vmem:[#allocation7 + $0x624] ss:$48 sps:$4 sm:$0xff]  }
 0x27d   :  { %3685 = vmatmul.mubr.bf16.gmra.mrb[80].mxu1 %v10800_v24  ;;  %3468 = vmatprep.mubr.bf16.mxu0 %v10824_v12 }
 0x27e   :  { %3694 = vmatprep.mubr.bf16.mxu1 %v10824_v12  ;;  %3742 = vmatpush1.bf16.msra.mxu0 %v9897_v43  ;;  %v9950_v43 = vld [vmem:[#allocation7 + $0x62c] ss:$48 sps:$4 sm:$0xff]  }
 0x27f   :  { %3968 = vmatpush1.bf16.msra.mxu1 %v9900_v46  ;;  %3743 = vmatprep.subr.bf16.mxu0 %v9905_v49  ;;  %v9945_v46 = vld [vmem:[#allocation7 + $0x620] ss:$48 sps:$4 sm:$0xff]   ;;  %v9948_v49 = vld [vmem:[#allocation7 + $0x628] ss:$48 sps:$4 sm:$0xff]  }
 0x280   :  { %3969 = vmatprep.subr.bf16.mxu1 %v9908_v53  ;;  %v9953_v53 = vld [vmem:[#allocation7 + $0x684] ss:$48 sps:$4 sm:$0xff]  }
 0x282   :  { %3744 = vmatpush1.bf16.msra.mxu0 %v9903_v56  ;;  %v9956_v56 = vld [vmem:[#allocation7 + $0x68c] ss:$48 sps:$4 sm:$0xff]  }
 0x283   :  { %3970 = vmatpush1.bf16.msra.mxu1 %v9906_v59  ;;  %3745 = vmatprep.subr.bf16.mxu0 %v9911_v60  ;;  %v9954_v59 = vld [vmem:[#allocation7 + $0x688] ss:$48 sps:$4 sm:$0xff]   ;;  %v9959_v60 = vld [vmem:[#allocation7 + $0x6e4] ss:$48 sps:$4 sm:$0xff]  }
 0x284   :  { %3469 = vmatmul.mubr.bf16.gmra.mrb[84].mxu0 %v10820_v4  ;;  %3971 = vmatprep.subr.bf16.mxu1 %v9914_v62  ;;  %v9962_v62 = vld [vmem:[#allocation7 + $0x6ec] ss:$48 sps:$4 sm:$0xff]  }
 0x285   :  { %3695 = vmatmul.mubr.bf16.gmra.mrb[84].mxu1 %v10820_v4  ;;  %3478 = vmatprep.mubr.bf16.mxu0 %v10844_v1 }
 0x286   :  { %3704 = vmatprep.mubr.bf16.mxu1 %v10844_v1  ;;  %3746 = vmatpush1.bf16.msra.mxu0 %v9909_v2  ;;  %v9957_v2 = vld [vmem:[#allocation7 + $0x6e0] ss:$48 sps:$4 sm:$0xff]  }
 0x287   :  { %3972 = vmatpush1.bf16.msra.mxu1 %v9912_v3  ;;  %3747 = vmatprep.subr.bf16.mxu0 %v9917_v6  ;;  %v9960_v3 = vld [vmem:[#allocation7 + $0x6e8] ss:$48 sps:$4 sm:$0xff]   ;;  %v9965_v6 = vld [vmem:[#allocation7 + $0x744] ss:$48 sps:$4 sm:$0xff]  }
 0x288   :  { %3973 = vmatprep.subr.bf16.mxu1 %v9920_v8  ;;  %v9966_v8 = vld [vmem:[#allocation7 + $0x748] ss:$48 sps:$4 sm:$0xff]  }
 0x28a   :  { %3748 = vmatpush1.bf16.msra.mxu0 %v9915_v42  ;;  %v9971_v42 = vld [vmem:[#allocation7 + $0x7a4] ss:$48 sps:$4 sm:$0xff]  }
 0x28b   :  { %3974 = vmatpush1.bf16.msra.mxu1 %v9918_v9  ;;  %3749 = vmatprep.subr.bf16.mxu0 %v9923_v13  ;;  %v9974_v9 = vld [vmem:[#allocation7 + $0x7ac] ss:$48 sps:$4 sm:$0xff]   ;;  %v9969_v13 = vld [vmem:[#allocation7 + $0x7a0] ss:$48 sps:$4 sm:$0xff]  }
 0x28c   :  { %3479 = vmatmul.mubr.bf16.gmra.mrb[88].mxu0 %v10840_v50  ;;  %3975 = vmatprep.subr.bf16.mxu1 %v9926_v14  ;;  %v9972_v14 = vld [vmem:[#allocation7 + $0x7a8] ss:$48 sps:$4 sm:$0xff]  }
 0x28d   :  { %3705 = vmatmul.mubr.bf16.gmra.mrb[88].mxu1 %v10840_v50  ;;  %3488 = vmatprep.mubr.bf16.mxu0 %v10863_v37 }
 0x28e   :  { %3714 = vmatprep.mubr.bf16.mxu1 %v10863_v37  ;;  %3750 = vmatpush1.bf16.msra.mxu0 %v9921_v16  ;;  %v9977_v16 = vld [vmem:[#allocation7 + $0x804] ss:$48 sps:$4 sm:$0xff]  }
 0x28f   :  { %3976 = vmatpush1.bf16.msra.mxu1 %v9924_v21  ;;  %3751 = vmatprep.subr.bf16.mxu0 %v9929_v45 }
 0x290   :  { %3977 = vmatprep.subr.bf16.mxu1 %v9932_v26 }
 0x292   :  { %3752 = vmatpush1.bf16.msra.mxu0 %v9927_v27  ;;  %v9975_v27 = vld [vmem:[#allocation7 + $0x800] ss:$48 sps:$4 sm:$0xff]  }
 0x293   :  { %3978 = vmatpush1.bf16.msra.mxu1 %v9930_v28  ;;  %3753 = vmatprep.subr.bf16.mxu0 %v9935_v29  ;;  %v9978_v28 = vld [vmem:[#allocation7 + $0x808] ss:$48 sps:$4 sm:$0xff]  }
 0x294   :  { %3489 = vmatmul.mubr.bf16.gmra.mrb[92].mxu0 %v10860_v32  ;;  %3979 = vmatprep.subr.bf16.mxu1 %v9938_v30  ;;  %v9983_v30 = vld [vmem:[#allocation7 + $0x864] ss:$48 sps:$4 sm:$0xff]  }
 0x295   :  { %3715 = vmatmul.mubr.bf16.gmra.mrb[92].mxu1 %v10860_v32  ;;  %3757 = vmatprep.mubr.bf16.mxu0 %v10710_v57 }
 0x296   :  { %3754 = vmatpush1.bf16.msra.mxu0 %v9933_v33  ;;  %3983 = vmatprep.mubr.bf16.mxu1 %v10710_v57  ;;  %v9951_v57 = vld [vmem:[#allocation7 + $0x680] ss:$48 sps:$4 sm:$0xff]  }
 0x297   :  { %3980 = vmatpush1.bf16.msra.mxu1 %v9936_v35  ;;  %3755 = vmatprep.subr.bf16.mxu0 %v9941_v48  ;;  %v9986_v48 = vld [vmem:[#allocation7 + $0x86c] ss:$48 sps:$4 sm:$0xff]  }
 0x298   :  { %3981 = vmatprep.subr.bf16.mxu1 %v9944_v52  ;;  %v9984_v52 = vld [vmem:[#allocation7 + $0x868] ss:$48 sps:$4 sm:$0xff]  }
 0x29a   :  { %3756 = vmatpush1.bf16.msra.mxu0 %v9939_v38  ;;  %v9989_v38 = vld [vmem:[#allocation7 + $0x8c4] ss:$48 sps:$4 sm:$0xff]  }
 0x29b   :  { %3982 = vmatpush1.bf16.msra.mxu1 %v9942_v40  ;;  %3838 = vmatprep.subr.bf16.mxu0 %v9947_v41  ;;  %v9992_v40 = vld [vmem:[#allocation7 + $0x8cc] ss:$48 sps:$4 sm:$0xff]  }
 0x29c   :  { %4064 = vmatprep.subr.bf16.mxu1 %v9950_v43 }
 0x29d   :  { %3758 = vmatmul.mubr.bf16.vlgmr.msra.gmra.mrb[96].mxu0 %v10708_v55 }
 0x29e   :  { %3984 = vmatmul.mubr.bf16.vlgmr.msra.gmra.mrb[96].mxu1 %v10708_v55  ;;  %3767 = vmatprep.mubr.bf16.mxu0 %v10730_v22  ;;  %v9968_v55 = vld [vmem:[#allocation7 + $0x74c] ss:$48 sps:$4 sm:$0xff]  }
 0x29f   :  { %3839 = vmatpush1.bf16.msra.mxu0 %v9945_v46  ;;  %3993 = vmatprep.mubr.bf16.mxu1 %v10730_v22  ;;  %v9963_v22 = vld [vmem:[#allocation7 + $0x740] ss:$48 sps:$4 sm:$0xff]  }
 0x2a0   :  { %4065 = vmatpush1.bf16.msra.mxu1 %v9948_v49  ;;  %3840 = vmatprep.subr.bf16.mxu0 %v9953_v53  ;;  %v9987_v53 = vld [vmem:[#allocation7 + $0x8c0] ss:$48 sps:$4 sm:$0xff]  }
 0x2a1   :  { %4066 = vmatprep.subr.bf16.mxu1 %v9956_v56  ;;  %v9990_v56 = vld [vmem:[#allocation7 + $0x8c8] ss:$48 sps:$4 sm:$0xff]  }
 0x2a3   :  { %3841 = vmatpush1.bf16.msra.mxu0 %v9951_v57 }
 0x2a4   :  { %4067 = vmatpush1.bf16.msra.mxu1 %v9954_v59  ;;  %3842 = vmatprep.subr.bf16.mxu0 %v9959_v60  ;;  %v9995_v59 = vld [vmem:[#allocation7 + $0x924] ss:$48 sps:$4 sm:$0xff]  }
 0x2a5   :  { %3768 = vmatmul.mubr.bf16.gmra.mrb[100].mxu0 %v10728_v20  ;;  %4068 = vmatprep.subr.bf16.mxu1 %v9962_v62 }
 0x2a6   :  { %3994 = vmatmul.mubr.bf16.gmra.mrb[100].mxu1 %v10728_v20  ;;  %3777 = vmatprep.mubr.bf16.mxu0 %v10750_v54  ;;  %v9980_v20 = vld [vmem:[#allocation7 + $0x80c] ss:$48 sps:$4 sm:$0xff]  }
 0x2a7   :  { %3843 = vmatpush1.bf16.msra.mxu0 %v9957_v2  ;;  %4003 = vmatprep.mubr.bf16.mxu1 %v10750_v54  ;;  %v9998_v2 = vld [vmem:[#allocation7 + $0x92c] ss:$48 sps:$4 sm:$0xff]  }
 0x2a8   :  { %4069 = vmatpush1.bf16.msra.mxu1 %v9960_v3  ;;  %3844 = vmatprep.subr.bf16.mxu0 %v9965_v6  ;;  %v9996_v3 = vld [vmem:[#allocation7 + $0x928] ss:$48 sps:$4 sm:$0xff]   ;;  %v10001_v6 = vld [vmem:[#allocation7 + $0x984] ss:$48 sps:$4 sm:$0xff]  }
 0x2a9   :  { %4070 = vmatprep.subr.bf16.mxu1 %v9968_v55  ;;  %v10004_v55 = vld [vmem:[#allocation7 + $0x98c] ss:$48 sps:$4 sm:$0xff]  }
 0x2ab   :  { %3845 = vmatpush1.bf16.msra.mxu0 %v9963_v22 }
 0x2ac   :  { %4071 = vmatpush1.bf16.msra.mxu1 %v9966_v8  ;;  %3846 = vmatprep.subr.bf16.mxu0 %v9971_v42 }
 0x2ad   :  { %3778 = vmatmul.mubr.bf16.gmra.mrb[104].mxu0 %v10748_v51  ;;  %4072 = vmatprep.subr.bf16.mxu1 %v9974_v9 }
 0x2ae   :  { %4004 = vmatmul.mubr.bf16.gmra.mrb[104].mxu1 %v10748_v51  ;;  %3787 = vmatprep.mubr.bf16.mxu0 %v10770_v25  ;;  %v10973_v54 = vpop.f32.mrb[32].mxu0  ;;  %v10975_v21 = vpop.f32.mrb[32].mxu1 }
 0x2af   :  { %3847 = vmatpush1.bf16.msra.mxu0 %v9969_v13  ;;  %4013 = vmatprep.mubr.bf16.mxu1 %v10770_v25  ;;  %v10978_v45 = vpop.f32.mrb[33].mxu0  ;;  %v10980_v26 = vpop.f32.mrb[33].mxu1  ;;  %v9981_v25 = vld [vmem:[#allocation7 + $0x860] ss:$48 sps:$4 sm:$0xff]  }
 0x2b0   :  { %4073 = vmatpush1.bf16.msra.mxu1 %v9972_v14  ;;  %3848 = vmatprep.subr.bf16.mxu0 %v9977_v16  ;;  %v10982_v29 = vpop.f32.mrb[34].mxu0  ;;  %v10984_v51 = vpop.f32.mrb[34].mxu1  ;;  %v9999_v13 = vld [vmem:[#allocation7 + $0x980] ss:$48 sps:$4 sm:$0xff]   ;;  %v10002_v14 = vld [vmem:[#allocation7 + $0x988] ss:$48 sps:$4 sm:$0xff]  }
 0x2b1   :  { %4074 = vmatprep.subr.bf16.mxu1 %v9980_v20  ;;  %v10986_v33 = vpop.f32.mrb[35].mxu0  ;;  %v10988_v35 = vpop.f32.mrb[35].mxu1  ;;  %v10007_v20 = vld [vmem:[#allocation7 + $0x9e4] ss:$48 sps:$4 sm:$0xff]  }
 0x2b3   :  { %3849 = vmatpush1.bf16.msra.mxu0 %v9975_v27 }
 0x2b4   :  { %4075 = vmatpush1.bf16.msra.mxu1 %v9978_v28  ;;  %3850 = vmatprep.subr.bf16.mxu0 %v9983_v30  ;;  %v10010_v30 = vld [vmem:[#allocation7 + $0x9ec] ss:$48 sps:$4 sm:$0xff]  }
 0x2b5   :  { %3788 = vmatmul.mubr.bf16.gmra.mrb[108].mxu0 %v10768_v23  ;;  %4076 = vmatprep.subr.bf16.mxu1 %v9986_v48  ;;  %v10008_v48 = vld [vmem:[#allocation7 + $0x9e8] ss:$48 sps:$4 sm:$0xff]  }
 0x2b6   :  { %4014 = vmatmul.mubr.bf16.gmra.mrb[108].mxu1 %v10768_v23  ;;  %3797 = vmatprep.mubr.bf16.mxu0 %v10790_v63  ;;  %v10993_v41 = vpop.f32.mrb[36].mxu0  ;;  %v10995_v43 = vpop.f32.mrb[36].mxu1 }
 0x2b7   :  { %3851 = vmatpush1.bf16.msra.mxu0 %v9981_v25  ;;  %4023 = vmatprep.mubr.bf16.mxu1 %v10790_v63  ;;  %v10998_v46 = vpop.f32.mrb[37].mxu0  ;;  %v11000_v49 = vpop.f32.mrb[37].mxu1  ;;  %v9993_v63 = vld [vmem:[#allocation7 + $0x920] ss:$48 sps:$4 sm:$0xff]   ;;  %v10013_v25 = vld [vmem:[#allocation7 + $0xa44] ss:$48 sps:$4 sm:$0xff]  }
 0x2b8   :  { %4077 = vmatpush1.bf16.msra.mxu1 %v9984_v52  ;;  %3852 = vmatprep.subr.bf16.mxu0 %v9989_v38  ;;  %v11002_v57 = vpop.f32.mrb[38].mxu0  ;;  %v11004_v23 = vpop.f32.mrb[38].mxu1  ;;  %v10016_v52 = vld [vmem:[#allocation7 + $0xa4c] ss:$48 sps:$4 sm:$0xff]  }
 0x2b9   :  { %4078 = vmatprep.subr.bf16.mxu1 %v9992_v40  ;;  %v11006_v60 = vpop.f32.mrb[39].mxu0  ;;  %v11008_v62 = vpop.f32.mrb[39].mxu1 }
 0x2bb   :  { %3853 = vmatpush1.bf16.msra.mxu0 %v9987_v53 }
 0x2bc   :  { %4079 = vmatpush1.bf16.msra.mxu1 %v9990_v56  ;;  %3854 = vmatprep.subr.bf16.mxu0 %v9995_v59  ;;  %v10011_v59 = vld [vmem:[#allocation7 + $0xa40] ss:$48 sps:$4 sm:$0xff]  }
 0x2bd   :  { %3798 = vmatmul.mubr.bf16.gmra.mrb[112].mxu0 %v10788_v61  ;;  %4080 = vmatprep.subr.bf16.mxu1 %v9998_v2  ;;  %v10014_v2 = vld [vmem:[#allocation7 + $0xa48] ss:$48 sps:$4 sm:$0xff]  }
 0x2be   :  { %4024 = vmatmul.mubr.bf16.gmra.mrb[112].mxu1 %v10788_v61  ;;  %3807 = vmatprep.mubr.bf16.mxu0 %v10810_v36  ;;  %v11013_v22 = vpop.f32.mrb[40].mxu0  ;;  %v11015_v8 = vpop.f32.mrb[40].mxu1 }
 0x2bf   :  { %3855 = vmatpush1.bf16.msra.mxu0 %v9993_v63  ;;  %4033 = vmatprep.mubr.bf16.mxu1 %v10810_v36  ;;  %v11018_v42 = vpop.f32.mrb[41].mxu0  ;;  %v11020_v9 = vpop.f32.mrb[41].mxu1  ;;  %v10005_v36 = vld [vmem:[#allocation7 + $0x9e0] ss:$48 sps:$4 sm:$0xff]  }
 0x2c0   :  { %4081 = vmatpush1.bf16.msra.mxu1 %v9996_v3  ;;  %3856 = vmatprep.subr.bf16.mxu0 %v10001_v6  ;;  %v11022_v16 = vpop.f32.mrb[42].mxu0  ;;  %v11024_v61 = vpop.f32.mrb[42].mxu1  ;;  %v10019_v3 = vld [vmem:[#allocation7 + $0xaa4] ss:$48 sps:$4 sm:$0xff]  }
 0x2c1   :  { %4082 = vmatprep.subr.bf16.mxu1 %v10004_v55  ;;  %v11026_v27 = vpop.f32.mrb[43].mxu0  ;;  %v11028_v28 = vpop.f32.mrb[43].mxu1 }
 0x2c3   :  { %3857 = vmatpush1.bf16.msra.mxu0 %v9999_v13  ;;  %v10022_v13 = vld [vmem:[#allocation7 + $0xaac] ss:$48 sps:$4 sm:$0xff]  }
 0x2c4   :  { %4083 = vmatpush1.bf16.msra.mxu1 %v10002_v14  ;;  %3858 = vmatprep.subr.bf16.mxu0 %v10007_v20  ;;  %v10020_v14 = vld [vmem:[#allocation7 + $0xaa8] ss:$48 sps:$4 sm:$0xff]   ;;  %v10025_v20 = vld [vmem:[#allocation7 + $0xb04] ss:$48 sps:$4 sm:$0xff]  }
 0x2c5   :  { %3808 = vmatmul.mubr.bf16.gmra.mrb[116].mxu0 %v10808_v34  ;;  %4084 = vmatprep.subr.bf16.mxu1 %v10010_v30  ;;  %v10028_v30 = vld [vmem:[#allocation7 + $0xb0c] ss:$48 sps:$4 sm:$0xff]  }
 0x2c6   :  { %4034 = vmatmul.mubr.bf16.gmra.mrb[116].mxu1 %v10808_v34  ;;  %3817 = vmatprep.mubr.bf16.mxu0 %v10830_v19  ;;  %v11033_v38 = vpop.f32.mrb[44].mxu0  ;;  %v11035_v40 = vpop.f32.mrb[44].mxu1 }
 0x2c7   :  { %3859 = vmatpush1.bf16.msra.mxu0 %v10005_v36  ;;  %4043 = vmatprep.mubr.bf16.mxu1 %v10830_v19  ;;  %v11038_v53 = vpop.f32.mrb[45].mxu0  ;;  %v11040_v56 = vpop.f32.mrb[45].mxu1  ;;  %v10017_v19 = vld [vmem:[#allocation7 + $0xaa0] ss:$48 sps:$4 sm:$0xff]  }
 0x2c8   :  { %4085 = vmatpush1.bf16.msra.mxu1 %v10008_v48  ;;  %3860 = vmatprep.subr.bf16.mxu0 %v10013_v25  ;;  %v11042_v63 = vpop.f32.mrb[46].mxu0  ;;  %v11044_v34 = vpop.f32.mrb[46].mxu1 }
 0x2c9   :  { %4086 = vmatprep.subr.bf16.mxu1 %v10016_v52  ;;  %v11046_v6 = vpop.f32.mrb[47].mxu0  ;;  %v11048_v55 = vpop.f32.mrb[47].mxu1 }
 0x2cb   :  { %3861 = vmatpush1.bf16.msra.mxu0 %v10011_v59  ;;  %v10023_v59 = vld [vmem:[#allocation7 + $0xb00] ss:$48 sps:$4 sm:$0xff]  }
 0x2cc   :  { %4087 = vmatpush1.bf16.msra.mxu1 %v10014_v2  ;;  %3862 = vmatprep.subr.bf16.mxu0 %v10019_v3  ;;  %v10026_v2 = vld [vmem:[#allocation7 + $0xb08] ss:$48 sps:$4 sm:$0xff]  }
 0x2cd   :  { %3818 = vmatmul.mubr.bf16.gmra.mrb[120].mxu0 %v10828_v15  ;;  %4088 = vmatprep.subr.bf16.mxu1 %v10022_v13  ;;  %v10031_v13 = vld [vmem:[#allocation7 + $0xb64] ss:$48 sps:$4 sm:$0xff]  }
 0x2ce   :  { %4044 = vmatmul.mubr.bf16.gmra.mrb[120].mxu1 %v10828_v15  ;;  %3827 = vmatprep.mubr.bf16.mxu0 %v10850_v7  ;;  %v11053_v36 = vpop.f32.mrb[48].mxu0  ;;  %v11055_v48 = vpop.f32.mrb[48].mxu1 }
 0x2cf   :  { %12261 = vst [vmem:[#allocation27_spill] sm:$0xff] %v11053_v36  ;;  %12262 = vst [vmem:[#allocation28_spill] sm:$0xff] %v11055_v48  ;;  %3863 = vmatpush1.bf16.msra.mxu0 %v10017_v19  ;;  %4053 = vmatprep.mubr.bf16.mxu1 %v10850_v7  ;;  %v11058_v25 = vpop.f32.mrb[49].mxu0  ;;  %v11060_v52 = vpop.f32.mrb[49].mxu1  ;;  %v10034_v19 = vld [vmem:[#allocation7 + $0xb6c] ss:$48 sps:$4 sm:$0xff]  }
 0x2d0   :  { %12263 = vst [vmem:[#allocation29_spill] sm:$0xff] %v11060_v52  ;;  %4089 = vmatpush1.bf16.msra.mxu1 %v10020_v14  ;;  %3864 = vmatprep.subr.bf16.mxu0 %v10025_v20  ;;  %v11062_v3 = vpop.f32.mrb[50].mxu0  ;;  %v11064_v15 = vpop.f32.mrb[50].mxu1  ;;  %v10029_v7 = vld [vmem:[#allocation7 + $0xb60] ss:$48 sps:$4 sm:$0xff]  }
 0x2d1   :  { %12264 = vst [vmem:[#allocation30_spill] sm:$0xff] %v11064_v15  ;;  %4090 = vmatprep.subr.bf16.mxu1 %v10028_v30  ;;  %v11066_v0 = vpop.f32.mrb[51].mxu0  ;;  %v11068_v48 = vpop.f32.mrb[51].mxu1  ;;  %v10032_v52 = vld [vmem:[#allocation7 + $0xb68] ss:$48 sps:$4 sm:$0xff]  }
 0x2d2   :  { %12265 = vst [vmem:[#allocation31_spill] sm:$0xff] %v11068_v48  ;;  %v10037_v36 = vld [vmem:[#allocation7 + $0xbc4] ss:$48 sps:$4 sm:$0xff]   ;;  %v10040_v14 = vld [vmem:[#allocation7 + $0xbcc] ss:$48 sps:$4 sm:$0xff]  }
 0x2d3   :  { %3865 = vmatpush1.bf16.msra.mxu0 %v10023_v59 }
 0x2d4   :  { %4091 = vmatpush1.bf16.msra.mxu1 %v10026_v2  ;;  %3866 = vmatprep.subr.bf16.mxu0 %v10031_v13  ;;  %v10035_v13 = vld [vmem:[#allocation7 + $0xbc0] ss:$48 sps:$4 sm:$0xff]  }
 0x2d5   :  { %3828 = vmatmul.mubr.bf16.gmra.mrb[124].mxu0 %v10848_v5  ;;  %4092 = vmatprep.subr.bf16.mxu1 %v10034_v19  ;;  %v10038_v19 = vld [vmem:[#allocation7 + $0xbc8] ss:$48 sps:$4 sm:$0xff]  }
 0x2d6   :  { %4054 = vmatmul.mubr.bf16.gmra.mrb[124].mxu1 %v10848_v5  ;;  %3870 = vmatprep.mubr.bf16.mxu0 %v10724_v17  ;;  %v11073_v20 = vpop.f32.mrb[52].mxu0  ;;  %v11075_v30 = vpop.f32.mrb[52].mxu1 }
 0x2d7   :  { %12266 = vst [vmem:[#allocation32_spill] sm:$0xff] %v11073_v20  ;;  %3867 = vmatpush1.bf16.msra.mxu0 %v10029_v7  ;;  %4096 = vmatprep.mubr.bf16.mxu1 %v10724_v17  ;;  %v11078_v59 = vpop.f32.mrb[53].mxu0  ;;  %v11080_v2 = vpop.f32.mrb[53].mxu1 }
 0x2d8   :  { %4093 = vmatpush1.bf16.msra.mxu1 %v10032_v52  ;;  %3868 = vmatprep.subr.bf16.mxu0 %v10037_v36  ;;  %v11082_v15 = vpop.f32.mrb[54].mxu0  ;;  %v11084_v5 = vpop.f32.mrb[54].mxu1 }
 0x2d9   :  { %12267 = vst [vmem:[#allocation33_spill] sm:$0xff] %v11084_v5  ;;  %4094 = vmatprep.subr.bf16.mxu1 %v10040_v14  ;;  %v11086_v48 = vpop.f32.mrb[55].mxu0  ;;  %v11088_v20 = vpop.f32.mrb[55].mxu1 }
 0x2db   :  { %3869 = vmatpush1.bf16.msra.mxu0 %v10035_v13 }
 0x2dc   :  { %4095 = vmatpush1.bf16.msra.mxu1 %v10038_v19 }
 0x2de   :  { %3871 = vmatmul.mubr.bf16.vlgmr.msra.gmra.mrb[96].mxu0 %v10720_v11  ;;  %v11091_v17 = vpop.f32.mrb[56].mxu0  ;;  %v11093_v7 = vpop.f32.mrb[56].mxu1 }
 0x2df   :  { %12268 = vst [vmem:[#allocation34_spill] sm:$0xff] %v11091_v17  ;;  %12269 = vst [vmem:[#allocation35_spill] sm:$0xff] %v11093_v7  ;;  %4097 = vmatmul.mubr.bf16.vlgmr.msra.gmra.mrb[96].mxu1 %v10720_v11  ;;  %3880 = vmatprep.mubr.bf16.mxu0 %v10744_v47  ;;  %v11097_v36 = vpop.f32.mrb[57].mxu0  ;;  %v11099_v52 = vpop.f32.mrb[57].mxu1 }
 0x2e0   :  { %12270 = vst [vmem:[#allocation36_spill] sm:$0xff] %v11099_v52  ;;  %4106 = vmatprep.mubr.bf16.mxu1 %v10744_v47  ;;  %v11102_v14 = vpop.f32.mrb[58].mxu0  ;;  %v11104_v13 = vpop.f32.mrb[58].mxu1 }
 0x2e1   :  { %12271 = vst [vmem:[#allocation37_spill] sm:$0xff] %v11102_v14  ;;  %12272 = vst [vmem:[#allocation38_spill] sm:$0xff] %v11104_v13  ;;  %v11106_v19 = vpop.f32.mrb[59].mxu0  ;;  %v11108_v5 = vpop.f32.mrb[59].mxu1 }
 0x2e2   :  { %12273 = vst [vmem:[#allocation39_spill] sm:$0xff] %v11108_v5 }
 0x2e6   :  { %3881 = vmatmul.mubr.bf16.gmra.mrb[100].mxu0 %v10740_v39  ;;  %v11111_v7 = vpop.f32.mrb[60].mxu0  ;;  %v11113_v11 = vpop.f32.mrb[60].mxu1 }
 0x2e7   :  { %12274 = vst [vmem:[#allocation40_spill] sm:$0xff] %v11111_v7  ;;  %12275 = vst [vmem:[#allocation41_spill] sm:$0xff] %v11113_v11  ;;  %4107 = vmatmul.mubr.bf16.gmra.mrb[100].mxu1 %v10740_v39  ;;  %3890 = vmatprep.mubr.bf16.mxu0 %v10764_v18  ;;  %v11117_v52 = vpop.f32.mrb[61].mxu0  ;;  %v11119_v47 = vpop.f32.mrb[61].mxu1  ;;  %v4178_v39 = vpack.c.bf16 %v10978_v45, %v10978_v45  ;;  %v4191_v7 = vpack.c.bf16 %v11004_v23, %v11004_v23 }
 0x2e8   :  { %12276 = vst [vmem:[#allocation42_spill] sm:$0xff] %v11117_v52  ;;  %12277 = vst [vmem:[#allocation43_spill] sm:$0xff] %v11119_v47  ;;  %4116 = vmatprep.mubr.bf16.mxu1 %v10764_v18  ;;  %v11122_v13 = vpop.f32.mrb[62].mxu0  ;;  %v11124_v14 = vpop.f32.mrb[62].mxu1  ;;  %v4198_v52 = vpack.c.bf16 %v11026_v27, %v11026_v27  ;;  %v4193_v27 = vpack.c.bf16 %v11013_v22, %v11013_v22 }
 0x2e9   :  { %12278 = vst [vmem:[#allocation44_spill] sm:$0xff] %v11122_v13  ;;  %12279 = vst [vmem:[#allocation45_spill] sm:$0xff] %v11124_v14  ;;  %v11126_v5 = vpop.f32.mrb[63].mxu0  ;;  %v11128_v17 = vpop.f32.mrb[63].mxu1 }
 0x2ea   :  { %12280 = vst [vmem:[#allocation46_spill] sm:$0xff] %v11126_v5  ;;  %12281 = vst [vmem:[#allocation47_spill] sm:$0xff] %v11128_v17 }
 0x2ee   :  { %3891 = vmatmul.mubr.bf16.gmra.mrb[104].mxu0 %v10760_v10 }
 0x2ef   :  { %4117 = vmatmul.mubr.bf16.gmra.mrb[104].mxu1 %v10760_v10  ;;  %3900 = vmatprep.mubr.bf16.mxu0 %v10784_v58  ;;  %v4182_v10 = vpack.c.bf16 %v10986_v33, %v10986_v33 }
 0x2f0   :  { %4126 = vmatprep.mubr.bf16.mxu1 %v10784_v58 }
 0x2f6   :  { %3901 = vmatmul.mubr.bf16.gmra.mrb[108].mxu0 %v10780_v44 }
 0x2f7   :  { %4127 = vmatmul.mubr.bf16.gmra.mrb[108].mxu1 %v10780_v44  ;;  %3910 = vmatprep.mubr.bf16.mxu0 %v10804_v31 }
 0x2f8   :  { %4136 = vmatprep.mubr.bf16.mxu1 %v10804_v31 }
 0x2fe   :  { %3911 = vmatmul.mubr.bf16.gmra.mrb[112].mxu0 %v10800_v24 }
 0x2ff   :  { %4137 = vmatmul.mubr.bf16.gmra.mrb[112].mxu1 %v10800_v24  ;;  %3920 = vmatprep.mubr.bf16.mxu0 %v10824_v12 }
 0x300   :  { %4146 = vmatprep.mubr.bf16.mxu1 %v10824_v12 }
 0x306   :  { %3921 = vmatmul.mubr.bf16.gmra.mrb[116].mxu0 %v10820_v4 }
 0x307   :  { %4147 = vmatmul.mubr.bf16.gmra.mrb[116].mxu1 %v10820_v4  ;;  %3930 = vmatprep.mubr.bf16.mxu0 %v10844_v1 }
 0x308   :  { %4156 = vmatprep.mubr.bf16.mxu1 %v10844_v1 }
 0x30e   :  { %3931 = vmatmul.mubr.bf16.gmra.mrb[120].mxu0 %v10840_v50 }
 0x30f   :  { %4157 = vmatmul.mubr.bf16.gmra.mrb[120].mxu1 %v10840_v50  ;;  %3940 = vmatprep.mubr.bf16.mxu0 %v10863_v37 }
 0x310   :  { %4166 = vmatprep.mubr.bf16.mxu1 %v10863_v37 }
 0x316   :  { %3941 = vmatmul.mubr.bf16.gmra.mrb[124].mxu0 %v10860_v32 }
 0x317   :  { %4167 = vmatmul.mubr.bf16.gmra.mrb[124].mxu1 %v10860_v32  ;;  %4401 = vmatprep.mubr.bf16.mxu0 %v4178_v39 }
 0x318   :  { %4481 = vmatprep.mubr.bf16.mxu1 %v4182_v10 }
 0x32f   :  { %v3420_v18 = vpop.f32.mrb[64].mxu0 }
 0x330   :  { %v3646_v44 = vpop.f32.mrb[64].mxu1  ;;  %v3422_v58 = vpop.f32.mrb[65].mxu0  ;;  %v4241_v12 = vpack.c.bf16 %v3420_v18, %v3420_v18  ;;  %v4177_v18 = vpack.c.bf16 %v10973_v54, %v10973_v54 }
 0x331   :  { %v4242_v24 = vpack.c.bf16 %v3422_v58, %v3422_v58  ;;  %v3648_v31 = vpop.f32.mrb[65].mxu1  ;;  %v3424_v4 = vpop.f32.mrb[66].mxu0 }
 0x332   :  { %v3650_v50 = vpop.f32.mrb[66].mxu1  ;;  %v3426_v1 = vpop.f32.mrb[67].mxu0  ;;  %v4244_v37 = vpack.c.bf16 %v3648_v31, %v3648_v31  ;;  %v4245_v33 = vpack.c.bf16 %v3424_v4, %v3424_v4  ;;  %v4180_v31 = vpack.c.bf16 %v10980_v26, %v10980_v26 }
 0x333   :  { %v4246_v45 = vpack.c.bf16 %v3426_v1, %v3426_v1  ;;  %v3652_v14 = vpop.f32.mrb[67].mxu1  ;;  %4369 = vmatprep.subr.bf16.mxu0 %v4242_v24  ;;  %v4243_v24 = vpack.c.bf16 %v3646_v44, %v3646_v44 }
 0x334   :  { %4370 = vmatpush1.bf16.xpose.msra.mxu0 %v4241_v12  ;;  %v4248_v11 = vpack.c.bf16 %v3652_v14, %v3652_v14  ;;  %v4181_v12 = vpack.c.bf16 %v10982_v29, %v10982_v29 }
 0x335   :  { %4409 = vmatprep.subr.bf16.mxu0 %v4244_v37  ;;  %4449 = vmatprep.subr.bf16.mxu1 %v4246_v45  ;;  %v4184_v37 = vpack.c.bf16 %v10988_v35, %v10988_v35  ;;  %v4247_v45 = vpack.c.bf16 %v3650_v50, %v3650_v50 }
 0x336   :  { %4450 = vmatpush1.bf16.xpose.msra.mxu1 %v4245_v33 }
 0x337   :  { %v3430_v32 = vpop.f32.mrb[68].mxu0  ;;  %4489 = vmatprep.subr.bf16.mxu1 %v4248_v11 }
 0x338   :  { %v11156_v39 = vpop.f32.mrb[68].mxu1  ;;  %v3432_v10 = vpop.f32.mrb[69].mxu0 }
 0x339   :  { %v3658_v58 = vpop.f32.mrb[69].mxu1  ;;  %v3434_v17 = vpop.f32.mrb[70].mxu0  ;;  %v4250_v1 = vpack.c.bf16 %v3432_v10, %v3432_v10 }
 0x33a   :  { %v11162_v4 = vpop.f32.mrb[70].mxu1  ;;  %v3436_v14 = vpop.f32.mrb[71].mxu0 }
 0x33b   :  { %v3662_v11 = vpop.f32.mrb[71].mxu1  ;;  %4402 = vmatmul.mubr.bf16.vlgmr.msra.gmra.mrb[128].mxu0 %v4177_v18  ;;  %v4254_v54 = vpack.c.bf16 %v3436_v14, %v3436_v14  ;;  %v4249_v14 = vpack.c.bf16 %v3430_v32, %v3430_v32 }
 0x33c   :  { %4410 = vmatpush1.bf16.xpose.msra.mxu0 %v4243_v24  ;;  %4441 = vmatprep.mubr.bf16.mxu0 %v4180_v31  ;;  %v4179_v31 = vpack.c.bf16 %v10975_v21, %v10975_v21  ;;  %v4186_v24 = vpack.c.bf16 %v10998_v46, %v10998_v46  ;;  %v4256_v21 = vpack.c.bf16 %v3662_v11, %v3662_v11 }
 0x33d   :  { %4482 = vmatmul.mubr.bf16.vlgmr.msra.gmra.mrb[128].mxu1 %v4181_v12  ;;  %4529 = vmatprep.subr.bf16.mxu0 %v4250_v1  ;;  %v4183_v12 = vpack.c.bf16 %v10984_v51, %v10984_v51  ;;  %v4252_v1 = vpack.c.bf16 %v3658_v58, %v3658_v58  ;;  %v4188_v11 = vpack.c.bf16 %v11000_v49, %v11000_v49 }
 0x33e   :  { %4490 = vmatpush1.bf16.xpose.msra.mxu1 %v4247_v45  ;;  %4521 = vmatprep.mubr.bf16.mxu1 %v4184_v37  ;;  %v4190_v45 = vpack.c.bf16 %v11006_v60, %v11006_v60 }
 0x33f   :  { %v11168_v26 = vpop.f32.mrb[72].mxu0  ;;  %4609 = vmatprep.subr.bf16.mxu1 %v4254_v54  ;;  %v4253_v54 = vpack.c.bf16 %v3434_v17, %v3434_v17  ;;  %v4185_v17 = vpack.c.bf16 %v10993_v41, %v10993_v41 }
 0x340   :  { %v11170_v44 = vpop.f32.mrb[72].mxu1  ;;  %v3442_v29 = vpop.f32.mrb[73].mxu0 }
 0x341   :  { %v11172_v33 = vpop.f32.mrb[73].mxu1  ;;  %v11174_v10 = vpop.f32.mrb[74].mxu0 }
 0x342   :  { %v11176_v18 = vpop.f32.mrb[74].mxu1  ;;  %v3446_v35 = vpop.f32.mrb[75].mxu0 }
 0x343   :  { %v11178_v50 = vpop.f32.mrb[75].mxu1 }
 0x347   :  { %v11186_v37 = vpop.f32.mrb[76].mxu0  ;;  %4442 = vmatmul.mubr.bf16.vlgmr.msra.gmra.mrb[128].mxu0 %v4179_v31  ;;  %v4251_v31 = vpack.c.bf16 %v11156_v39, %v11156_v39  ;;  %v4262_v39 = vpack.c.bf16 %v3446_v35, %v3446_v35 }
 0x348   :  { %v11190_v13 = vpop.f32.mrb[76].mxu1  ;;  %4530 = vmatpush1.bf16.xpose.msra.mxu0 %v4249_v14  ;;  %v11192_v47 = vpop.f32.mrb[77].mxu0  ;;  %4561 = vmatprep.mubr.bf16.mxu0 %v4186_v24  ;;  %v4189_v24 = vpack.c.bf16 %v11002_v57, %v11002_v57  ;;  %v4258_v14 = vpack.c.bf16 %v3442_v29, %v3442_v29 }
 0x349   :  { %v11194_v46 = vpop.f32.mrb[77].mxu1  ;;  %4569 = vmatprep.subr.bf16.mxu0 %v4252_v1  ;;  %v11196_v32 = vpop.f32.mrb[78].mxu0  ;;  %4522 = vmatmul.mubr.bf16.vlgmr.msra.gmra.mrb[128].mxu1 %v4183_v12  ;;  %v4192_v1 = vpack.c.bf16 %v11008_v62, %v11008_v62  ;;  %v4266_v22 = vpack.c.bf16 %v11192_v47, %v11192_v47 }
 0x34a   :  { %v11198_v51 = vpop.f32.mrb[78].mxu1  ;;  %4610 = vmatpush1.bf16.xpose.msra.mxu1 %v4253_v54  ;;  %v11200_v58 = vpop.f32.mrb[79].mxu0  ;;  %4641 = vmatprep.mubr.bf16.mxu1 %v4190_v45  ;;  %v4255_v45 = vpack.c.bf16 %v11162_v4, %v11162_v4 }
 0x34b   :  { %v11202_v60 = vpop.f32.mrb[79].mxu1  ;;  %4649 = vmatprep.subr.bf16.mxu1 %v4256_v21 }
 0x34f   :  { %v11212_v12 = vpop.f32.mrb[80].mxu0  ;;  %4562 = vmatmul.mubr.bf16.vlgmr.msra.gmra.mrb[132].mxu0 %v4185_v17 }
 0x350   :  { %v11218_v41 = vpop.f32.mrb[80].mxu1  ;;  %4570 = vmatpush1.bf16.xpose.msra.mxu0 %v4251_v31  ;;  %v11220_v49 = vpop.f32.mrb[81].mxu0  ;;  %4601 = vmatprep.mubr.bf16.mxu0 %v4188_v11  ;;  %v4187_v11 = vpack.c.bf16 %v10995_v43, %v10995_v43  ;;  %v4260_v43 = vpack.c.bf16 %v11172_v33, %v11172_v33 }
 0x351   :  { %v11222_v54 = vpop.f32.mrb[81].mxu1  ;;  %4689 = vmatprep.subr.bf16.mxu0 %v4258_v14  ;;  %v11224_v57 = vpop.f32.mrb[82].mxu0  ;;  %4642 = vmatmul.mubr.bf16.vlgmr.msra.gmra.mrb[132].mxu1 %v4189_v24  ;;  %v4194_v14 = vpack.c.bf16 %v11018_v42, %v11018_v42  ;;  %v4261_v42 = vpack.c.bf16 %v11174_v10, %v11174_v10 }
 0x352   :  { %v11226_v29 = vpop.f32.mrb[82].mxu1  ;;  %4650 = vmatpush1.bf16.xpose.msra.mxu1 %v4255_v45  ;;  %v11228_v62 = vpop.f32.mrb[83].mxu0  ;;  %4681 = vmatprep.mubr.bf16.mxu1 %v4192_v1  ;;  %v4257_v1 = vpack.c.bf16 %v11168_v26, %v11168_v26  ;;  %v4264_v26 = vpack.c.bf16 %v11178_v50, %v11178_v50  ;;  %v4196_v50 = vpack.c.bf16 %v11020_v9, %v11020_v9 }
 0x353   :  { %v11230_v4 = vpop.f32.mrb[83].mxu1  ;;  %4769 = vmatprep.subr.bf16.mxu1 %v4262_v39  ;;  %v4263_v9 = vpack.c.bf16 %v11176_v18, %v11176_v18 }
 0x357   :  { %v11232_v21 = vpop.f32.mrb[84].mxu0 }
 0x358   :  { %v11234_v17 = vpop.f32.mrb[84].mxu1  ;;  %v11236_v35 = vpop.f32.mrb[85].mxu0 }
 0x359   :  { %v11240_v31 = vpop.f32.mrb[85].mxu1  ;;  %v11242_v24 = vpop.f32.mrb[86].mxu0 }
 0x35a   :  { %v11248_v45 = vpop.f32.mrb[86].mxu1  ;;  %v11250_v39 = vpop.f32.mrb[87].mxu0 }
 0x35b   :  { %v11256_v5 = vpop.f32.mrb[87].mxu1  ;;  %4602 = vmatmul.mubr.bf16.vlgmr.msra.gmra.mrb[132].mxu0 %v4187_v11 }
 0x35c   :  { %4690 = vmatpush1.bf16.xpose.msra.mxu0 %v4257_v1  ;;  %4721 = vmatprep.mubr.bf16.mxu0 %v4194_v14 }
 0x35d   :  { %4729 = vmatprep.subr.bf16.mxu0 %v4260_v43  ;;  %4682 = vmatmul.mubr.bf16.vlgmr.msra.gmra.mrb[132].mxu1 %v4191_v7  ;;  %v4259_v7 = vpack.c.bf16 %v11170_v44, %v11170_v44  ;;  %v4197_v43 = vpack.c.bf16 %v11022_v16, %v11022_v16  ;;  %v4270_v44 = vpack.c.bf16 %v11200_v58, %v11200_v58 }
 0x35e   :  { %4770 = vmatpush1.bf16.xpose.msra.mxu1 %v4261_v42  ;;  %4801 = vmatprep.mubr.bf16.mxu1 %v4198_v52 }
 0x35f   :  { %4809 = vmatprep.subr.bf16.mxu1 %v4264_v26  ;;  %v11264_v23 = vpop.f32.mrb[88].mxu0  ;;  %v4200_v26 = vpack.c.bf16 %v11028_v28, %v11028_v28 }
 0x360   :  { %v11266_v33 = vpop.f32.mrb[88].mxu1  ;;  %v11268_v11 = vpop.f32.mrb[89].mxu0 }
 0x361   :  { %v11272_v10 = vpop.f32.mrb[89].mxu1  ;;  %v11274_v14 = vpop.f32.mrb[90].mxu0 }
 0x362   :  { %v11280_v52 = vpop.f32.mrb[90].mxu1  ;;  %v11282_v1 = vpop.f32.mrb[91].mxu0 }
 0x363   :  { %12282 = vst [vmem:[#allocation48_spill] sm:$0xff] %v11280_v52  ;;  %v11288_v42 = vpop.f32.mrb[91].mxu1  ;;  %4722 = vmatmul.mubr.bf16.vlgmr.msra.gmra.mrb[136].mxu0 %v4193_v27 }
 0x364   :  { %4730 = vmatpush1.bf16.xpose.msra.mxu0 %v4259_v7  ;;  %4761 = vmatprep.mubr.bf16.mxu0 %v4196_v50  ;;  %v4195_v7 = vpack.c.bf16 %v11015_v8, %v11015_v8  ;;  %v4272_v8 = vpack.c.bf16 %v11202_v60, %v11202_v60  ;;  %v4271_v60 = vpack.c.bf16 %v11198_v51, %v11198_v51 }
 0x365   :  { %4849 = vmatprep.subr.bf16.mxu0 %v4266_v22  ;;  %4802 = vmatmul.mubr.bf16.vlgmr.msra.gmra.mrb[136].mxu1 %v4197_v43  ;;  %v4202_v43 = vpack.c.bf16 %v11038_v53, %v11038_v53  ;;  %v4265_v22 = vpack.c.bf16 %v11186_v37, %v11186_v37  ;;  %v4204_v53 = vpack.c.bf16 %v11040_v56, %v11040_v56 }
 0x366   :  { %4810 = vmatpush1.bf16.xpose.msra.mxu1 %v4263_v9  ;;  %4841 = vmatprep.mubr.bf16.mxu1 %v4200_v26  ;;  %v4199_v26 = vpack.c.bf16 %v11024_v61, %v11024_v61  ;;  %v4268_v9 = vpack.c.bf16 %v11194_v46, %v11194_v46  ;;  %v4201_v61 = vpack.c.bf16 %v11033_v38, %v11033_v38 }
 0x367   :  { %4929 = vmatprep.subr.bf16.mxu1 %v4270_v44  ;;  %v11296_v16 = vpop.f32.mrb[92].mxu0  ;;  %v4206_v44 = vpack.c.bf16 %v11046_v6, %v11046_v6  ;;  %v4267_v6 = vpack.c.bf16 %v11190_v13, %v11190_v13  ;;  %v4205_v37 = vpack.c.bf16 %v11042_v63, %v11042_v63  ;;  %v4274_v46 = vpack.c.bf16 %v11220_v49, %v11220_v49 }
 0x368   :  { %v11298_v47 = vpop.f32.mrb[92].mxu1  ;;  %v11300_v27 = vpop.f32.mrb[93].mxu0  ;;  %v4278_v38 = vpack.c.bf16 %v11228_v62, %v11228_v62  ;;  %v4203_v56 = vpack.c.bf16 %v11035_v40, %v11035_v40  ;;  %v4210_v63 = vpack.c.bf16 %v11058_v25, %v11058_v25  ;;  %v4207_v13 = vpack.c.bf16 %v11044_v34, %v11044_v34  ;;  %v12284_v34 = vld [vmem:[#allocation27_spill] sm:$0xff] }
 0x369   :  { %v11302_v28 = vpop.f32.mrb[93].mxu1  ;;  %v11304_v52 = vpop.f32.mrb[94].mxu0  ;;  %v4276_v51 = vpack.c.bf16 %v11222_v54, %v11222_v54  ;;  %v4214_v49 = vpack.c.bf16 %v11066_v0, %v11066_v0  ;;  %v4277_v62 = vpack.c.bf16 %v11224_v57, %v11224_v57  ;;  %v4280_v40 = vpack.c.bf16 %v11230_v4, %v11230_v4 }
 0x36a   :  { %v11306_v18 = vpop.f32.mrb[94].mxu1  ;;  %v11308_v50 = vpop.f32.mrb[95].mxu0  ;;  %v4209_v25 = vpack.c.bf16 %v12284_v34, %v12284_v34  ;;  %v4275_v0 = vpack.c.bf16 %v11218_v41, %v11218_v41  ;;  %v4213_v57 = vpack.c.bf16 %v11062_v3, %v11062_v3  ;;  %v4282_v4 = vpack.c.bf16 %v11236_v35, %v11236_v35  ;;  %v12287_v3 = vld [vmem:[#allocation28_spill] sm:$0xff] }
 0x36b   :  { %12283 = vst [vmem:[#allocation49_spill] sm:$0xff] %v11306_v18  ;;  %v11310_v58 = vpop.f32.mrb[95].mxu1  ;;  %v4269_v18 = vpack.c.bf16 %v11196_v32, %v11196_v32  ;;  %v4208_v32 = vpack.c.bf16 %v11048_v55, %v11048_v55  ;;  %v4273_v55 = vpack.c.bf16 %v11212_v12, %v11212_v12  ;;  %v12285_v12 = vld [vmem:[#allocation29_spill] sm:$0xff]  ;;  %v4211_v41 = vpack.c.bf16 %v12287_v3, %v12287_v3  ;;  %v12297_v3 = vld [vmem:[#allocation42_spill] sm:$0xff] }
 0x36c   :  { %v4212_v54 = vpack.c.bf16 %v12285_v12, %v12285_v12  ;;  %v4218_v35 = vpack.c.bf16 %v11078_v59, %v11078_v59  ;;  %v4288_v59 = vpack.c.bf16 %v11256_v5, %v11256_v5  ;;  %v4290_v5 = vpack.c.bf16 %v11268_v11, %v11268_v11 }
 0x36f   :  { %4762 = vmatmul.mubr.bf16.vlgmr.msra.gmra.mrb[136].mxu0 %v4195_v7 }
 0x370   :  { %4850 = vmatpush1.bf16.xpose.msra.mxu0 %v4265_v22  ;;  %4881 = vmatprep.mubr.bf16.mxu0 %v4202_v43  ;;  %v4279_v43 = vpack.c.bf16 %v11226_v29, %v11226_v29  ;;  %v4286_v22 = vpack.c.bf16 %v11250_v39, %v11250_v39  ;;  %v12288_v29 = vld [vmem:[#allocation30_spill] sm:$0xff]  ;;  %v4284_v39 = vpack.c.bf16 %v11240_v31, %v11240_v31 }
 0x371   :  { %4889 = vmatprep.subr.bf16.mxu0 %v4268_v9  ;;  %4842 = vmatmul.mubr.bf16.vlgmr.msra.gmra.mrb[136].mxu1 %v4199_v26  ;;  %v4281_v26 = vpack.c.bf16 %v11232_v21, %v11232_v21  ;;  %v4215_v9 = vpack.c.bf16 %v12288_v29, %v12288_v29  ;;  %v12289_v21 = vld [vmem:[#allocation32_spill] sm:$0xff] }
 0x372   :  { %4930 = vmatpush1.bf16.xpose.msra.mxu1 %v4269_v18  ;;  %4961 = vmatprep.mubr.bf16.mxu1 %v4206_v44  ;;  %v12286_v18 = vld [vmem:[#allocation31_spill] sm:$0xff]  ;;  %v4222_v44 = vpack.c.bf16 %v11086_v48, %v11086_v48  ;;  %v4217_v31 = vpack.c.bf16 %v12289_v21, %v12289_v21  ;;  %v4283_v48 = vpack.c.bf16 %v11234_v17, %v11234_v17 }
 0x373   :  { %4969 = vmatprep.subr.bf16.mxu1 %v4272_v8  ;;  %v4216_v7 = vpack.c.bf16 %v12286_v18, %v12286_v18  ;;  %v4285_v8 = vpack.c.bf16 %v11242_v24, %v11242_v24  ;;  %v4221_v24 = vpack.c.bf16 %v11082_v15, %v11082_v15  ;;  %v4219_v15 = vpack.c.bf16 %v11075_v30, %v11075_v30 }
 0x374   :  { %v4226_v17 = vpack.c.bf16 %v11097_v36, %v11097_v36  ;;  %v4296_v30 = vpack.c.bf16 %v11288_v42, %v11288_v42  ;;  %v12291_v36 = vld [vmem:[#allocation34_spill] sm:$0xff]  ;;  %v12293_v42 = vld [vmem:[#allocation37_spill] sm:$0xff] }
 0x377   :  { %4882 = vmatmul.mubr.bf16.vlgmr.msra.gmra.mrb[140].mxu0 %v4201_v61  ;;  %v4220_v61 = vpack.c.bf16 %v11080_v2, %v11080_v2  ;;  %v4294_v2 = vpack.c.bf16 %v11282_v1, %v11282_v1  ;;  %v4292_v1 = vpack.c.bf16 %v11272_v10, %v11272_v10 }
 0x378   :  { %4890 = vmatpush1.bf16.xpose.msra.mxu0 %v4267_v6  ;;  %4921 = vmatprep.mubr.bf16.mxu0 %v4204_v53  ;;  %v4224_v53 = vpack.c.bf16 %v11088_v20, %v11088_v20  ;;  %v4287_v6 = vpack.c.bf16 %v11248_v45, %v11248_v45  ;;  %v4289_v20 = vpack.c.bf16 %v11264_v23, %v11264_v23  ;;  %v12290_v45 = vld [vmem:[#allocation33_spill] sm:$0xff] }
 0x379   :  { %5009 = vmatprep.subr.bf16.mxu0 %v4274_v46  ;;  %4962 = vmatmul.mubr.bf16.vlgmr.msra.gmra.mrb[140].mxu1 %v4205_v37  ;;  %v4223_v11 = vpack.c.bf16 %v12290_v45, %v12290_v45  ;;  %v4230_v37 = vpack.c.bf16 %v11106_v19, %v11106_v19  ;;  %v4293_v46 = vpack.c.bf16 %v11274_v14, %v11274_v14  ;;  %v12303_v45 = vld [vmem:[#allocation47_spill] sm:$0xff] }
 0x37a   :  { %4970 = vmatpush1.bf16.xpose.msra.mxu1 %v4271_v60  ;;  %5001 = vmatprep.mubr.bf16.mxu1 %v4208_v32  ;;  %v4225_v23 = vpack.c.bf16 %v12291_v36, %v12291_v36  ;;  %v12292_v32 = vld [vmem:[#allocation36_spill] sm:$0xff]  ;;  %v4291_v14 = vpack.c.bf16 %v11266_v33, %v11266_v33 }
 0x37b   :  { %5089 = vmatprep.subr.bf16.mxu1 %v4278_v38  ;;  %v4228_v19 = vpack.c.bf16 %v12292_v32, %v12292_v32 }
 0x383   :  { %4922 = vmatmul.mubr.bf16.vlgmr.msra.gmra.mrb[140].mxu0 %v4203_v56  ;;  %v4229_v56 = vpack.c.bf16 %v12293_v42, %v12293_v42 }
 0x384   :  { %5010 = vmatpush1.bf16.xpose.msra.mxu0 %v4273_v55  ;;  %5041 = vmatprep.mubr.bf16.mxu0 %v4210_v63  ;;  %v4298_v63 = vpack.c.bf16 %v11300_v27, %v11300_v27  ;;  %v4302_v27 = vpack.c.bf16 %v11308_v50, %v11308_v50 }
 0x385   :  { %5049 = vmatprep.subr.bf16.mxu0 %v4276_v51  ;;  %5002 = vmatmul.mubr.bf16.vlgmr.msra.gmra.mrb[140].mxu1 %v4207_v13  ;;  %v12294_v51 = vld [vmem:[#allocation39_spill] sm:$0xff] }
 0x386   :  { %5090 = vmatpush1.bf16.xpose.msra.mxu1 %v4277_v62  ;;  %5121 = vmatprep.mubr.bf16.mxu1 %v4214_v49  ;;  %v4232_v49 = vpack.c.bf16 %v12294_v51, %v12294_v51  ;;  %v12295_v62 = vld [vmem:[#allocation48_spill] sm:$0xff] }
 0x387   :  { %5129 = vmatprep.subr.bf16.mxu1 %v4280_v40  ;;  %v4295_v33 = vpack.c.bf16 %v12295_v62, %v12295_v62 }
 0x38b   :  { %5042 = vmatmul.mubr.bf16.vlgmr.msra.gmra.mrb[144].mxu0 %v4209_v25 }
 0x38c   :  { %5050 = vmatpush1.bf16.xpose.msra.mxu0 %v4275_v0  ;;  %5081 = vmatprep.mubr.bf16.mxu0 %v4212_v54 }
 0x38d   :  { %5169 = vmatprep.subr.bf16.mxu0 %v4282_v4  ;;  %5122 = vmatmul.mubr.bf16.vlgmr.msra.gmra.mrb[144].mxu1 %v4213_v57 }
 0x38e   :  { %5130 = vmatpush1.bf16.xpose.msra.mxu1 %v4279_v43  ;;  %5161 = vmatprep.mubr.bf16.mxu1 %v4216_v7  ;;  %v12296_v7 = vld [vmem:[#allocation35_spill] sm:$0xff] }
 0x38f   :  { %5249 = vmatprep.subr.bf16.mxu1 %v4286_v22  ;;  %v4227_v43 = vpack.c.bf16 %v12296_v7, %v12296_v7 }
 0x397   :  { %5082 = vmatmul.mubr.bf16.vlgmr.msra.gmra.mrb[144].mxu0 %v4211_v41  ;;  %v4234_v41 = vpack.c.bf16 %v12297_v3, %v12297_v3 }
 0x398   :  { %5170 = vmatpush1.bf16.xpose.msra.mxu0 %v4281_v26  ;;  %5201 = vmatprep.mubr.bf16.mxu0 %v4218_v35  ;;  %v4297_v35 = vpack.c.bf16 %v11296_v16, %v11296_v16  ;;  %v12298_v26 = vld [vmem:[#allocation38_spill] sm:$0xff] }
 0x399   :  { %5209 = vmatprep.subr.bf16.mxu0 %v4284_v39  ;;  %5162 = vmatmul.mubr.bf16.vlgmr.msra.gmra.mrb[144].mxu1 %v4215_v9  ;;  %v4231_v29 = vpack.c.bf16 %v12298_v26, %v12298_v26  ;;  %v4300_v9 = vpack.c.bf16 %v11302_v28, %v11302_v28  ;;  %v12299_v39 = vld [vmem:[#allocation46_spill] sm:$0xff] }
 0x39a   :  { %5250 = vmatpush1.bf16.xpose.msra.mxu1 %v4285_v8  ;;  %5281 = vmatprep.mubr.bf16.mxu1 %v4222_v44  ;;  %v4238_v44 = vpack.c.bf16 %v12299_v39, %v12299_v39  ;;  %v4301_v8 = vpack.c.bf16 %v11304_v52, %v11304_v52 }
 0x39b   :  { %5289 = vmatprep.subr.bf16.mxu1 %v4288_v59  ;;  %v4304_v59 = vpack.c.bf16 %v11310_v58, %v11310_v58  ;;  %v12300_v58 = vld [vmem:[#allocation40_spill] sm:$0xff] }
 0x39f   :  { %5202 = vmatmul.mubr.bf16.vlgmr.msra.gmra.mrb[148].mxu0 %v4217_v31 }
 0x3a0   :  { %5210 = vmatpush1.bf16.xpose.msra.mxu0 %v4283_v48  ;;  %5241 = vmatprep.mubr.bf16.mxu0 %v4220_v61 }
 0x3a1   :  { %5329 = vmatprep.subr.bf16.mxu0 %v4290_v5  ;;  %5282 = vmatmul.mubr.bf16.vlgmr.msra.gmra.mrb[148].mxu1 %v4221_v24  ;;  %v4233_v24 = vpack.c.bf16 %v12300_v58, %v12300_v58 }
 0x3a2   :  { %5290 = vmatpush1.bf16.xpose.msra.mxu1 %v4287_v6  ;;  %5321 = vmatprep.mubr.bf16.mxu1 %v4224_v53  ;;  %v12301_v53 = vld [vmem:[#allocation43_spill] sm:$0xff] }
 0x3a3   :  { %5409 = vmatprep.subr.bf16.mxu1 %v4294_v2  ;;  %v4236_v6 = vpack.c.bf16 %v12301_v53, %v12301_v53  ;;  %v4299_v2 = vpack.c.bf16 %v11298_v47, %v11298_v47 }
 0x3ab   :  { %5242 = vmatmul.mubr.bf16.vlgmr.msra.gmra.mrb[148].mxu0 %v4219_v15  ;;  %v12302_v15 = vld [vmem:[#allocation44_spill] sm:$0xff] }
 0x3ac   :  { %5330 = vmatpush1.bf16.xpose.msra.mxu0 %v4289_v20  ;;  %5361 = vmatprep.mubr.bf16.mxu0 %v4226_v17  ;;  %v4237_v17 = vpack.c.bf16 %v12302_v15, %v12302_v15 }
 0x3ad   :  { %5369 = vmatprep.subr.bf16.mxu0 %v4292_v1  ;;  %5322 = vmatmul.mubr.bf16.vlgmr.msra.gmra.mrb[148].mxu1 %v4223_v11  ;;  %v4240_v11 = vpack.c.bf16 %v12303_v45, %v12303_v45  ;;  %v12304_v1 = vld [vmem:[#allocation49_spill] sm:$0xff] }
 0x3ae   :  { %5410 = vmatpush1.bf16.xpose.msra.mxu1 %v4293_v46  ;;  %5441 = vmatprep.mubr.bf16.mxu1 %v4230_v37  ;;  %v4303_v37 = vpack.c.bf16 %v12304_v1, %v12304_v1 }
 0x3af   :  { %5449 = vmatprep.subr.bf16.mxu1 %v4296_v30 }
 0x3b1   :  { %v11426_v10 = vpop.f32.mrb[96].mxu0 }
 0x3b2   :  { %v11432_v60 = vpop.f32.mrb[96].mxu1  ;;  %v11434_v38 = vpop.f32.mrb[97].mxu0  ;;  %v4305_v42 = vpack.c.bf16 %v11426_v10, %v11426_v10 }
 0x3b3   :  { %v11440_v55 = vpop.f32.mrb[97].mxu1  ;;  %v11442_v13 = vpop.f32.mrb[98].mxu0  ;;  %5362 = vmatmul.mubr.bf16.vlgmr.msra.gmra.mrb[152].mxu0 %v4225_v23  ;;  %v4306_v20 = vpack.c.bf16 %v11434_v38, %v11434_v38 }
 0x3b4   :  { %v11448_v40 = vpop.f32.mrb[98].mxu1  ;;  %v11450_v34 = vpop.f32.mrb[99].mxu0  ;;  %5370 = vmatpush1.bf16.xpose.msra.mxu0 %v4291_v14  ;;  %5401 = vmatprep.mubr.bf16.mxu0 %v4228_v19  ;;  %v4308_v46 = vpack.c.bf16 %v11440_v55, %v11440_v55  ;;  %v4307_v55 = vpack.c.bf16 %v11432_v60, %v11432_v60  ;;  %v5861_v7 = vsel %vm246_vm0, %v4305_v42, 0 }
 0x3b5   :  { %v11454_v25 = vpop.f32.mrb[99].mxu1  ;;  %5489 = vmatprep.subr.bf16.mxu0 %v4298_v63  ;;  %5442 = vmatmul.mubr.bf16.vlgmr.msra.gmra.mrb[152].mxu1 %v4229_v56  ;;  %v12305_v56 = vld [vmem:[#allocation41_spill] sm:$0xff]  ;;  %v4310_v10 = vpack.c.bf16 %v11450_v34, %v11450_v34 }
 0x3b6   :  { %5450 = vmatpush1.bf16.xpose.msra.mxu1 %v4295_v33  ;;  %5481 = vmatprep.mubr.bf16.mxu1 %v4232_v49  ;;  %v4235_v63 = vpack.c.bf16 %v12305_v56, %v12305_v56  ;;  %v12306_v33 = vld [vmem:[#allocation45_spill] sm:$0xff]  ;;  %v5867_v26 = vsel %vm246_vm0, %v4307_v55, 0 }
 0x3b7   :  { %5569 = vmatprep.subr.bf16.mxu1 %v4302_v27  ;;  %v4239_v27 = vpack.c.bf16 %v12306_v33, %v12306_v33 }
 0x3b9   :  { %v11456_v12 = vpop.f32.mrb[100].mxu0 }
 0x3ba   :  { %v11458_v54 = vpop.f32.mrb[100].mxu1  ;;  %v11460_v0 = vpop.f32.mrb[101].mxu0 }
 0x3bb   :  { %v11462_v57 = vpop.f32.mrb[101].mxu1  ;;  %v11464_v4 = vpop.f32.mrb[102].mxu0 }
 0x3bc   :  { %v11466_v18 = vpop.f32.mrb[102].mxu1  ;;  %v11468_v50 = vpop.f32.mrb[103].mxu0 }
 0x3bd   :  { %v11472_v22 = vpop.f32.mrb[103].mxu1 }
 0x3bf   :  { %5402 = vmatmul.mubr.bf16.vlgmr.msra.gmra.mrb[152].mxu0 %v4227_v43 }
 0x3c0   :  { %5490 = vmatpush1.bf16.xpose.msra.mxu0 %v4297_v35  ;;  %5521 = vmatprep.mubr.bf16.mxu0 %v4234_v41  ;;  %v12307_v35 = vmov 0  }
 0x3c1   :  { %v11488_v21 = vpop.f32.mrb[104].mxu0  ;;  %5529 = vmatprep.subr.bf16.mxu0 %v4300_v9  ;;  %5482 = vmatmul.mubr.bf16.vlgmr.msra.gmra.mrb[152].mxu1 %v4231_v29  ;;  %v4312_v29 = vpack.c.bf16 %v11454_v25, %v11454_v25 }
 0x3c2   :  { %v11490_v16 = vpop.f32.mrb[104].mxu1  ;;  %v11492_v31 = vpop.f32.mrb[105].mxu0  ;;  %5570 = vmatpush1.bf16.xpose.msra.mxu1 %v4301_v8  ;;  %5601 = vmatprep.mubr.bf16.mxu1 %v4238_v44 }
 0x3c3   :  { %v11494_v28 = vpop.f32.mrb[105].mxu1  ;;  %v11496_v61 = vpop.f32.mrb[106].mxu0  ;;  %5609 = vmatprep.subr.bf16.mxu1 %v4304_v59 }
 0x3c4   :  { %v11498_v52 = vpop.f32.mrb[106].mxu1  ;;  %v11500_v48 = vpop.f32.mrb[107].mxu0 }
 0x3c5   :  { %v11504_v5 = vpop.f32.mrb[107].mxu1 }
 0x3c7   :  { %5522 = vmatmul.mubr.bf16.vlgmr.msra.gmra.mrb[156].mxu0 %v4233_v24 }
 0x3c8   :  { %5530 = vmatpush1.bf16.xpose.msra.mxu0 %v4299_v2  ;;  %5561 = vmatprep.mubr.bf16.mxu0 %v4236_v6 }
 0x3c9   :  { %v11520_v30 = vpop.f32.mrb[108].mxu0  ;;  %8882 = vmatprep.subr.msk.bf16.mxu0 %vm246_vm0, %v4306_v20  ;;  %5602 = vmatmul.mubr.bf16.vlgmr.msra.gmra.mrb[156].mxu1 %v4237_v17 }
 0x3ca   :  { %v11523_v47 = vpop.f32.mrb[108].mxu1  ;;  %v11525_v36 = vpop.f32.mrb[109].mxu0  ;;  %5610 = vmatpush1.bf16.xpose.msra.mxu1 %v4303_v37  ;;  %5641 = vmatprep.mubr.bf16.mxu1 %v4240_v11 }
 0x3cb   :  { %v11527_v23 = vpop.f32.mrb[109].mxu1  ;;  %v11529_v32 = vpop.f32.mrb[110].mxu0  ;;  %8884 = vmatprep.subr.msk.bf16.mxu1 %vm246_vm0, %v4308_v46 }
 0x3cc   :  { %v11532_v19 = vpop.f32.mrb[110].mxu1  ;;  %v11534_v14 = vpop.f32.mrb[111].mxu0 }
 0x3cd   :  { %v11536_v38 = vpop.f32.mrb[111].mxu1 }
 0x3d1   :  { %v11544_v51 = vpop.f32.mrb[112].mxu0 }
 0x3d2   :  { %v11546_v49 = vpop.f32.mrb[112].mxu1  ;;  %v11548_v62 = vpop.f32.mrb[113].mxu0 }
 0x3d3   :  { %v11555_v43 = vpop.f32.mrb[113].mxu1  ;;  %v11557_v3 = vpop.f32.mrb[114].mxu0  ;;  %5562 = vmatmul.mubr.bf16.vlgmr.msra.gmra.mrb[156].mxu0 %v4235_v63 }
 0x3d4   :  { %v11559_v60 = vpop.f32.mrb[114].mxu1  ;;  %v11561_v41 = vpop.f32.mrb[115].mxu0  ;;  %5873 = vmatpush1.bf16.msra.mxu0 %v5861_v7  ;;  %5904 = vmatprep.mubr.bf16.mxu0 %v12307_v35 }
 0x3d5   :  { %v11567_v9 = vpop.f32.mrb[115].mxu1  ;;  %8886 = vmatprep.subr.msk.bf16.mxu0 %vm246_vm0, %v4310_v10  ;;  %5642 = vmatmul.mubr.bf16.vlgmr.msra.gmra.mrb[156].mxu1 %v4239_v27 }
 0x3d6   :  { %5914 = vmatpush1.bf16.msra.mxu1 %v5867_v26  ;;  %5945 = vmatprep.mubr.bf16.mxu1 %v12307_v35 }
 0x3d7   :  { %8888 = vmatprep.subr.msk.bf16.mxu1 %vm246_vm0, %v4312_v29 }
 0x3d9   :  { %v11572_v34 = vpop.f32.mrb[116].mxu0 }
 0x3da   :  { %12308 = vst [vmem:[#allocation27_spill] sm:$0xff] %v11572_v34  ;;  %v11574_v39 = vpop.f32.mrb[116].mxu1  ;;  %v11576_v44 = vpop.f32.mrb[117].mxu0 }
 0x3db   :  { %12309 = vst [vmem:[#allocation29_spill] sm:$0xff] %v11574_v39  ;;  %v11578_v8 = vpop.f32.mrb[117].mxu1  ;;  %v11580_v59 = vpop.f32.mrb[118].mxu0 }
 0x3dc   :  { %12310 = vst [vmem:[#allocation31_spill] sm:$0xff] %v11578_v8  ;;  %12311 = vst [vmem:[#allocation28_spill] sm:$0xff] %v11580_v59  ;;  %v11582_v25 = vpop.f32.mrb[118].mxu1  ;;  %v11584_v58 = vpop.f32.mrb[119].mxu0 }
 0x3dd   :  { %12312 = vst [vmem:[#allocation30_spill] sm:$0xff] %v11582_v25  ;;  %12313 = vst [vmem:[#allocation32_spill] sm:$0xff] %v11584_v58  ;;  %v11586_v24 = vpop.f32.mrb[119].mxu1 }
 0x3de   :  { %12314 = vst [vmem:[#allocation33_spill] sm:$0xff] %v11586_v24 }
 0x3e1   :  { %v11588_v53 = vpop.f32.mrb[120].mxu0 }
 0x3e2   :  { %12315 = vst [vmem:[#allocation34_spill] sm:$0xff] %v11588_v53  ;;  %v11590_v6 = vpop.f32.mrb[120].mxu1  ;;  %v11592_v2 = vpop.f32.mrb[121].mxu0 }
 0x3e3   :  { %12316 = vst [vmem:[#allocation36_spill] sm:$0xff] %v11590_v6  ;;  %12317 = vst [vmem:[#allocation37_spill] sm:$0xff] %v11592_v2  ;;  %v11594_v15 = vpop.f32.mrb[121].mxu1  ;;  %v11596_v17 = vpop.f32.mrb[122].mxu0 }
 0x3e4   :  { %12318 = vst [vmem:[#allocation39_spill] sm:$0xff] %v11594_v15  ;;  %12319 = vst [vmem:[#allocation48_spill] sm:$0xff] %v11596_v17  ;;  %v11598_v20 = vpop.f32.mrb[122].mxu1  ;;  %v11600_v45 = vpop.f32.mrb[123].mxu0 }
 0x3e5   :  { %12320 = vst [vmem:[#allocation35_spill] sm:$0xff] %v11598_v20  ;;  %12321 = vst [vmem:[#allocation42_spill] sm:$0xff] %v11600_v45  ;;  %v11602_v11 = vpop.f32.mrb[123].mxu1 }
 0x3e6   :  { %12322 = vst [vmem:[#allocation38_spill] sm:$0xff] %v11602_v11 }
 0x3e9   :  { %v11604_v1 = vpop.f32.mrb[124].mxu0 }
 0x3ea   :  { %12323 = vst [vmem:[#allocation46_spill] sm:$0xff] %v11604_v1  ;;  %v11606_v37 = vpop.f32.mrb[124].mxu1  ;;  %v11608_v46 = vpop.f32.mrb[125].mxu0 }
 0x3eb   :  { %12324 = vst [vmem:[#allocation40_spill] sm:$0xff] %v11606_v37  ;;  %12325 = vst [vmem:[#allocation43_spill] sm:$0xff] %v11608_v46  ;;  %v11610_v42 = vpop.f32.mrb[125].mxu1  ;;  %v11612_v56 = vpop.f32.mrb[126].mxu0 }
 0x3ec   :  { %12326 = vst [vmem:[#allocation44_spill] sm:$0xff] %v11610_v42  ;;  %12327 = vst [vmem:[#allocation47_spill] sm:$0xff] %v11612_v56  ;;  %v11614_v63 = vpop.f32.mrb[126].mxu1  ;;  %v11616_v55 = vpop.f32.mrb[127].mxu0 }
 0x3ed   :  { %12328 = vst [vmem:[#allocation49_spill] sm:$0xff] %v11614_v63  ;;  %12329 = vst [vmem:[#allocation41_spill] sm:$0xff] %v11616_v55  ;;  %v11618_v33 = vpop.f32.mrb[127].mxu1 }
 0x3ee   :  { %12330 = vst [vmem:[#allocation45_spill] sm:$0xff] %v11618_v33 }
 0x41a   :  { %v4443_v27 = vpop.f32.mrb[128].mxu0 }
 0x41b   :  { %v11620_v7 = vmul.f32 0.044194173, %v4443_v27  ;;  %v4445_v10 = vpop.f32.mrb[129].mxu0 }
 0x41c   :  { %v4446_v26 = vpop.f32.mrb[130].mxu0  ;;  %v4523_v29 = vpop.f32.mrb[128].mxu1 }
 0x41d   :  { %v11622_v1 = vmul.f32 0.044194173, %v4523_v29  ;;  %v4447_v37 = vpop.f32.mrb[131].mxu0  ;;  %v4525_v46 = vpop.f32.mrb[129].mxu1  ;;  %v5665_v42 = vsel %vm221_vm1, %v11620_v7, -inf }
 0x41e   :  { %v4526_v56 = vpop.f32.mrb[130].mxu1  ;;  %5666 = vmax.xlane.f32.xlu0 %v5665_v42 }
 0x41f   :  { %v4527_v63 = vpop.f32.mrb[131].mxu1  ;;  %v5668_v55 = vsel %vm221_vm1, %v11622_v1, -inf }
 0x422   :  { %5669 = vmax.xlane.f32.xlu0 %v5668_v55 }
 0x42e   :  { %v4603_v33 = vpop.f32.mrb[132].mxu0 }
 0x42f   :  { %v11628_v27 = vmul.f32 0.044194173, %v4603_v33  ;;  %v4605_v10 = vpop.f32.mrb[133].mxu0 }
 0x430   :  { %v4606_v26 = vpop.f32.mrb[134].mxu0  ;;  %v4683_v20 = vpop.f32.mrb[132].mxu1 }
 0x431   :  { %v11630_v29 = vmul.f32 0.044194173, %v4683_v20  ;;  %v4607_v37 = vpop.f32.mrb[135].mxu0  ;;  %v4685_v46 = vpop.f32.mrb[133].mxu1  ;;  %v5671_v17 = vsel %vm221_vm1, %v11628_v27, -inf }
 0x432   :  { %v4686_v56 = vpop.f32.mrb[134].mxu1  ;;  %5672 = vmax.xlane.f32.xlu1 %v5671_v17 }
 0x433   :  { %v4687_v42 = vpop.f32.mrb[135].mxu1  ;;  %v5674_v63 = vsel %vm221_vm1, %v11630_v29, -inf }
 0x436   :  { %5675 = vmax.xlane.f32.xlu1 %v5674_v63 }
 0x442   :  { %v4763_v55 = vpop.f32.mrb[136].mxu0 }
 0x443   :  { %v11636_v33 = vmul.f32 0.044194173, %v4763_v55  ;;  %v4765_v10 = vpop.f32.mrb[137].mxu0 }
 0x444   :  { %v4766_v26 = vpop.f32.mrb[138].mxu0  ;;  %v4843_v11 = vpop.f32.mrb[136].mxu1 }
 0x445   :  { %v11638_v20 = vmul.f32 0.044194173, %v4843_v11  ;;  %v4767_v37 = vpop.f32.mrb[139].mxu0  ;;  %v4845_v46 = vpop.f32.mrb[137].mxu1  ;;  %v5677_v45 = vsel %vm221_vm1, %v11636_v33, -inf }
 0x446   :  { %v4846_v56 = vpop.f32.mrb[138].mxu1  ;;  %5678 = vmax.xlane.f32.xlu0 %v5677_v45 }
 0x447   :  { %v4847_v17 = vpop.f32.mrb[139].mxu1  ;;  %v5680_v42 = vsel %vm221_vm1, %v11638_v20, -inf }
 0x448   :  { %5681 = vmax.xlane.f32.xlu1 %v5680_v42 }
 0x456   :  { %v4923_v63 = vpop.f32.mrb[140].mxu0 }
 0x457   :  { %v11644_v55 = vmul.f32 0.044194173, %v4923_v63  ;;  %v4925_v10 = vpop.f32.mrb[141].mxu0 }
 0x458   :  { %v4926_v26 = vpop.f32.mrb[142].mxu0  ;;  %v5003_v6 = vpop.f32.mrb[140].mxu1 }
 0x459   :  { %v11646_v11 = vmul.f32 0.044194173, %v5003_v6  ;;  %v4927_v37 = vpop.f32.mrb[143].mxu0  ;;  %v5005_v46 = vpop.f32.mrb[141].mxu1  ;;  %v5683_v53 = vsel %vm221_vm1, %v11644_v55, -inf }
 0x45a   :  { %v5006_v56 = vpop.f32.mrb[142].mxu1  ;;  %5684 = vmax.xlane.f32.xlu0 %v5683_v53 }
 0x45b   :  { %v5007_v45 = vpop.f32.mrb[143].mxu1  ;;  %v5686_v17 = vsel %vm221_vm1, %v11646_v11, -inf }
 0x45c   :  { %5687 = vmax.xlane.f32.xlu1 %v5686_v17 }
 0x46a   :  { %v5083_v42 = vpop.f32.mrb[144].mxu0 }
 0x46b   :  { %v11652_v63 = vmul.f32 0.044194173, %v5083_v42  ;;  %v5085_v10 = vpop.f32.mrb[145].mxu0 }
 0x46c   :  { %v5086_v26 = vpop.f32.mrb[146].mxu0  ;;  %v5163_v15 = vpop.f32.mrb[144].mxu1 }
 0x46d   :  { %v11654_v6 = vmul.f32 0.044194173, %v5163_v15  ;;  %v5087_v37 = vpop.f32.mrb[147].mxu0  ;;  %v5165_v46 = vpop.f32.mrb[145].mxu1  ;;  %v5689_v2 = vsel %vm221_vm1, %v11652_v63, -inf }
 0x46e   :  { %v5166_v56 = vpop.f32.mrb[146].mxu1  ;;  %5690 = vmax.xlane.f32.xlu0 %v5689_v2 }
 0x46f   :  { %v5167_v53 = vpop.f32.mrb[147].mxu1  ;;  %v5692_v45 = vsel %vm221_vm1, %v11654_v6, -inf }
 0x470   :  { %5693 = vmax.xlane.f32.xlu1 %v5692_v45 }
 0x47e   :  { %v5243_v17 = vpop.f32.mrb[148].mxu0 }
 0x47f   :  { %v11660_v42 = vmul.f32 0.044194173, %v5243_v17  ;;  %v5245_v10 = vpop.f32.mrb[149].mxu0 }
 0x480   :  { %v5246_v26 = vpop.f32.mrb[150].mxu0  ;;  %v5323_v25 = vpop.f32.mrb[148].mxu1 }
 0x481   :  { %v11662_v15 = vmul.f32 0.044194173, %v5323_v25  ;;  %v5247_v37 = vpop.f32.mrb[151].mxu0  ;;  %v5325_v46 = vpop.f32.mrb[149].mxu1  ;;  %v5695_v59 = vsel %vm221_vm1, %v11660_v42, -inf }
 0x482   :  { %v5326_v56 = vpop.f32.mrb[150].mxu1  ;;  %5696 = vmax.xlane.f32.xlu0 %v5695_v59 }
 0x483   :  { %v5327_v2 = vpop.f32.mrb[151].mxu1  ;;  %v5698_v53 = vsel %vm221_vm1, %v11662_v15, -inf }
 0x484   :  { %5699 = vmax.xlane.f32.xlu1 %v5698_v53 }
 0x492   :  { %v5403_v45 = vpop.f32.mrb[152].mxu0 }
 0x493   :  { %v11668_v17 = vmul.f32 0.044194173, %v5403_v45  ;;  %v5405_v10 = vpop.f32.mrb[153].mxu0 }
 0x494   :  { %v5406_v26 = vpop.f32.mrb[154].mxu0  ;;  %v5483_v24 = vpop.f32.mrb[152].mxu1 }
 0x495   :  { %v11670_v25 = vmul.f32 0.044194173, %v5483_v24  ;;  %v5407_v37 = vpop.f32.mrb[155].mxu0  ;;  %v5485_v46 = vpop.f32.mrb[153].mxu1  ;;  %v5701_v58 = vsel %vm221_vm1, %v11668_v17, -inf }
 0x496   :  { %v5486_v56 = vpop.f32.mrb[154].mxu1  ;;  %5702 = vmax.xlane.f32.xlu1 %v5701_v58 }
 0x497   :  { %v5487_v59 = vpop.f32.mrb[155].mxu1  ;;  %v5704_v2 = vsel %vm221_vm1, %v11670_v25, -inf }
 0x49a   :  { %5705 = vmax.xlane.f32.xlu1 %v5704_v2 }
 0x4a6   :  { %v5563_v53 = vpop.f32.mrb[156].mxu0 }
 0x4a7   :  { %v11676_v45 = vmul.f32 0.044194173, %v5563_v53  ;;  %v5565_v10 = vpop.f32.mrb[157].mxu0 }
 0x4a8   :  { %v5566_v26 = vpop.f32.mrb[158].mxu0  ;;  %v5643_v39 = vpop.f32.mrb[156].mxu1 }
 0x4a9   :  { %v11678_v24 = vmul.f32 0.044194173, %v5643_v39  ;;  %v5567_v37 = vpop.f32.mrb[159].mxu0  ;;  %v5645_v46 = vpop.f32.mrb[157].mxu1  ;;  %v5707_v34 = vsel %vm221_vm1, %v11676_v45, -inf }
 0x4aa   :  { %v5646_v56 = vpop.f32.mrb[158].mxu1  ;;  %5708 = vmax.xlane.f32.xlu1 %v5707_v34 }
 0x4ab   :  { %v5647_v58 = vpop.f32.mrb[159].mxu1  ;;  %v5667_v59 = vpop.xlane.xlu0 %5666  ;;  %v5710_v2 = vsel %vm221_vm1, %v11678_v24, -inf }
 0x4ac   :  { %v5713_v8 = vsub.f32 %v11620_v7, %v5667_v59 }
 0x4ae   :  { %v5729_v53 = vmul.f32 1.442695, %v5713_v8  ;;  %5711 = vmax.xlane.f32.xlu1 %v5710_v2 }
 0x4af   :  { %v5670_v10 = vpop.xlane.xlu0 %5669 }
 0x4b0   :  { %10075 = vpow2.f32 %v5729_v53  ;;  %v5714_v39 = vsub.f32 %v11622_v1, %v5670_v10 }
 0x4b2   :  { %v5731_v26 = vmul.f32 1.442695, %v5714_v39 }
 0x4b4   :  { %10077 = vpow2.f32 %v5731_v26 }
 0x4ba   :  { %v11686_v37 = vpop.eup %10075 }
 0x4bb   :  { %v5761_v34 = vsel %vm221_vm1, %v11686_v37, 0.0 }
 0x4bc   :  { %5762 = vadd.xlane.f32.xlu0 %v5761_v34 }
 0x4be   :  { %v11690_v46 = vpop.eup %10077 }
 0x4bf   :  { %v5673_v7 = vpop.xlane.xlu1 %5672  ;;  %v5764_v56 = vsel %vm221_vm1, %v11690_v46, 0.0 }
 0x4c0   :  { %v5715_v8 = vsub.f32 %v11628_v27, %v5673_v7  ;;  %5765 = vadd.xlane.f32.xlu0 %v5764_v56 }
 0x4c2   :  { %v5733_v58 = vmul.f32 1.442695, %v5715_v8 }
 0x4c3   :  { %v5676_v59 = vpop.xlane.xlu1 %5675 }
 0x4c4   :  { %10079 = vpow2.f32 %v5733_v58  ;;  %v5716_v1 = vsub.f32 %v11630_v29, %v5676_v59 }
 0x4c6   :  { %v5735_v2 = vmul.f32 1.442695, %v5716_v1 }
 0x4c8   :  { %10081 = vpow2.f32 %v5735_v2 }
 0x4ce   :  { %v11696_v53 = vpop.eup %10079 }
 0x4cf   :  { %v5767_v10 = vsel %vm221_vm1, %v11696_v53, 0.0 }
 0x4d0   :  { %5768 = vadd.xlane.f32.xlu0 %v5767_v10 }
 0x4d2   :  { %v11700_v39 = vpop.eup %10081 }
 0x4d3   :  { %v5679_v26 = vpop.xlane.xlu0 %5678  ;;  %v5770_v27 = vsel %vm221_vm1, %v11700_v39, 0.0 }
 0x4d4   :  { %v5717_v34 = vsub.f32 %v11636_v33, %v5679_v26  ;;  %5771 = vadd.xlane.f32.xlu0 %v5770_v27 }
 0x4d5   :  { %v5682_v7 = vpop.xlane.xlu1 %5681 }
 0x4d6   :  { %v5737_v56 = vmul.f32 1.442695, %v5717_v34  ;;  %v5718_v29 = vsub.f32 %v11638_v20, %v5682_v7 }
 0x4d8   :  { %10083 = vpow2.f32 %v5737_v56  ;;  %v5739_v8 = vmul.f32 1.442695, %v5718_v29 }
 0x4da   :  { %10085 = vpow2.f32 %v5739_v8 }
 0x4e2   :  { %v11706_v58 = vpop.eup %10083 }
 0x4e3   :  { %v5773_v59 = vsel %vm221_vm1, %v11706_v58, 0.0 }
 0x4e4   :  { %v11710_v1 = vpop.eup %10085  ;;  %5774 = vadd.xlane.f32.xlu0 %v5773_v59 }
 0x4e5   :  { %v5776_v2 = vsel %vm221_vm1, %v11710_v1, 0.0 }
 0x4e6   :  { %5777 = vadd.xlane.f32.xlu1 %v5776_v2 }
 0x4e7   :  { %v5685_v33 = vpop.xlane.xlu0 %5684 }
 0x4e8   :  { %v5719_v10 = vsub.f32 %v11644_v55, %v5685_v33 }
 0x4e9   :  { %v5688_v26 = vpop.xlane.xlu1 %5687 }
 0x4ea   :  { %v5741_v20 = vmul.f32 1.442695, %v5719_v10  ;;  %v5720_v27 = vsub.f32 %v11646_v11, %v5688_v26 }
 0x4ec   :  { %10087 = vpow2.f32 %v5741_v20  ;;  %v5743_v34 = vmul.f32 1.442695, %v5720_v27 }
 0x4ee   :  { %10089 = vpow2.f32 %v5743_v34 }
 0x4f6   :  { %v11716_v7 = vpop.eup %10087 }
 0x4f7   :  { %v5779_v56 = vsel %vm221_vm1, %v11716_v7, 0.0 }
 0x4f8   :  { %v11720_v29 = vpop.eup %10089  ;;  %5780 = vadd.xlane.f32.xlu0 %v5779_v56 }
 0x4f9   :  { %v5782_v8 = vsel %vm221_vm1, %v11720_v29, 0.0 }
 0x4fa   :  { %5783 = vadd.xlane.f32.xlu1 %v5782_v8 }
 0x4fb   :  { %v5691_v55 = vpop.xlane.xlu0 %5690 }
 0x4fc   :  { %v5721_v59 = vsub.f32 %v11652_v63, %v5691_v55 }
 0x4fd   :  { %v5694_v2 = vpop.xlane.xlu1 %5693 }
 0x4fe   :  { %v5745_v11 = vmul.f32 1.442695, %v5721_v59  ;;  %v5722_v33 = vsub.f32 %v11654_v6, %v5694_v2 }
 0x500   :  { %10091 = vpow2.f32 %v5745_v11  ;;  %v5747_v10 = vmul.f32 1.442695, %v5722_v33 }
 0x502   :  { %10093 = vpow2.f32 %v5747_v10 }
 0x50a   :  { %v11726_v26 = vpop.eup %10091 }
 0x50b   :  { %v5785_v20 = vsel %vm221_vm1, %v11726_v26, 0.0 }
 0x50c   :  { %v11730_v27 = vpop.eup %10093  ;;  %5786 = vadd.xlane.f32.xlu0 %v5785_v20 }
 0x50d   :  { %v5788_v34 = vsel %vm221_vm1, %v11730_v27, 0.0 }
 0x50e   :  { %5789 = vadd.xlane.f32.xlu1 %v5788_v34 }
 0x50f   :  { %v5697_v63 = vpop.xlane.xlu0 %5696 }
 0x510   :  { %v5723_v56 = vsub.f32 %v11660_v42, %v5697_v63 }
 0x511   :  { %v5700_v8 = vpop.xlane.xlu1 %5699 }
 0x512   :  { %v5749_v6 = vmul.f32 1.442695, %v5723_v56  ;;  %v5724_v55 = vsub.f32 %v11662_v15, %v5700_v8 }
 0x514   :  { %10095 = vpow2.f32 %v5749_v6  ;;  %v5751_v59 = vmul.f32 1.442695, %v5724_v55 }
 0x516   :  { %10097 = vpow2.f32 %v5751_v59 }
 0x51e   :  { %v11736_v2 = vpop.eup %10095 }
 0x51f   :  { %v5791_v11 = vsel %vm221_vm1, %v11736_v2, 0.0 }
 0x520   :  { %v11740_v33 = vpop.eup %10097  ;;  %5792 = vadd.xlane.f32.xlu0 %v5791_v11 }
 0x521   :  { %v5794_v10 = vsel %vm221_vm1, %v11740_v33, 0.0 }
 0x522   :  { %5795 = vadd.xlane.f32.xlu1 %v5794_v10 }
 0x523   :  { %v5703_v42 = vpop.xlane.xlu1 %5702 }
 0x524   :  { %v5725_v20 = vsub.f32 %v11668_v17, %v5703_v42 }
 0x526   :  { %v5753_v34 = vmul.f32 1.442695, %v5725_v20 }
 0x527   :  { %v5706_v15 = vpop.xlane.xlu1 %5705 }
 0x528   :  { %10099 = vpow2.f32 %v5753_v34  ;;  %v5726_v63 = vsub.f32 %v11670_v25, %v5706_v15 }
 0x52a   :  { %v5755_v56 = vmul.f32 1.442695, %v5726_v63 }
 0x52c   :  { %10101 = vpow2.f32 %v5755_v56 }
 0x532   :  { %v11746_v8 = vpop.eup %10099 }
 0x533   :  { %v5797_v6 = vsel %vm221_vm1, %v11746_v8, 0.0 }
 0x534   :  { %5798 = vadd.xlane.f32.xlu0 %v5797_v6 }
 0x536   :  { %v11750_v55 = vpop.eup %10101 }
 0x537   :  { %v5709_v59 = vpop.xlane.xlu1 %5708  ;;  %v5800_v11 = vsel %vm221_vm1, %v11750_v55, 0.0 }
 0x538   :  { %v5727_v17 = vsub.f32 %v11676_v45, %v5709_v59  ;;  %5801 = vadd.xlane.f32.xlu1 %v5800_v11  ;;  %v4311_v11 = vpack.c.bf16 %v11448_v40, %v11448_v40  ;;  %v4313_v40 = vpack.c.bf16 %v11456_v12, %v11456_v12 }
 0x53a   :  { %v5757_v10 = vmul.f32 1.442695, %v5727_v17 }
 0x53b   :  { %v5712_v42 = vpop.xlane.xlu1 %5711 }
 0x53c   :  { %10103 = vpow2.f32 %v5757_v10  ;;  %v5728_v25 = vsub.f32 %v11678_v24, %v5712_v42  ;;  %v4309_v24 = vpack.c.bf16 %v11442_v13, %v11442_v13 }
 0x53e   :  { %v5759_v20 = vmul.f32 1.442695, %v5728_v25  ;;  %v5958_v25 = vsel %vm246_vm0, %v4309_v24, 0 }
 0x540   :  { %10105 = vpow2.f32 %v5759_v20  ;;  %v5964_v20 = vsel %vm246_vm0, %v4311_v11, 0 }
 0x546   :  { %v11756_v34 = vpop.eup %10103 }
 0x547   :  { %v5803_v15 = vsel %vm221_vm1, %v11756_v34, 0.0 }
 0x548   :  { %5804 = vadd.xlane.f32.xlu0 %v5803_v15  ;;  %v4314_v15 = vpack.c.bf16 %v11460_v0, %v11460_v0  ;;  %v4315_v0 = vpack.c.bf16 %v11458_v54, %v11458_v54 }
 0x549   :  { %v5763_v63 = vpop.xlane.xlu0 %5762 }
 0x54a   :  { %v11760_v56 = vpop.eup %10105  ;;  %10107 = vrcp.f32 %v5763_v63  ;;  %v4316_v63 = vpack.c.bf16 %v11462_v57, %v11462_v57 }
 0x54b   :  { %v5806_v45 = vsel %vm221_vm1, %v11760_v56, 0.0 }
 0x54c   :  { %5807 = vadd.xlane.f32.xlu1 %v5806_v45  ;;  %v6055_v45 = vsel %vm246_vm0, %v4313_v40, 0  ;;  %v4328_v40 = vpack.c.bf16 %v11504_v5, %v11504_v5 }
 0x54d   :  { %v5766_v6 = vpop.xlane.xlu0 %5765 }
 0x54e   :  { %10109 = vrcp.f32 %v5766_v6  ;;  %v4318_v6 = vpack.c.bf16 %v11468_v50, %v11468_v50  ;;  %v4317_v50 = vpack.c.bf16 %v11464_v4, %v11464_v4 }
 0x554   :  { %v10108_v59 = vpop.eup %10107 }
 0x555   :  { %v5825_v17 = vmul.f32 %v10108_v59, %v11686_v37  ;;  %v4320_v59 = vpack.c.bf16 %v11472_v22, %v11472_v22  ;;  %v4319_v22 = vpack.c.bf16 %v11466_v18, %v11466_v18  ;;  %v4321_v18 = vpack.c.bf16 %v11488_v21, %v11488_v21 }
 0x557   :  { %v5841_v10 = vpack.c.bf16 %v5825_v17, %v5825_v17 }
 0x558   :  { %v10110_v42 = vpop.eup %10109 }
 0x559   :  { %8883 = vmatmul.mubr.msk.bf16.vlgmr.msra.gmra.mrb[160].mxu0 %vm221_vm1, %v5841_v10  ;;  %8885 = vmatmul.mubr.msk.bf16.vlgmr.msra.gmra.mrb[160].mxu1 %vm221_vm1, %v5841_v10  ;;  %v5826_v13 = vmul.f32 %v10110_v42, %v11690_v46  ;;  %v6061_v46 = vsel %vm246_vm0, %v4315_v0, 0  ;;  %v6152_v10 = vsel %vm246_vm0, %v4317_v50, 0  ;;  %v6158_v42 = vsel %vm246_vm0, %v4319_v22, 0 }
 0x55a   :  { %5970 = vmatpush1.bf16.msra.mxu0 %v5958_v25  ;;  %6011 = vmatpush1.bf16.msra.mxu1 %v5964_v20  ;;  %v4322_v25 = vpack.c.bf16 %v11492_v31, %v11492_v31  ;;  %v4324_v20 = vpack.c.bf16 %v11494_v28, %v11494_v28  ;;  %v4323_v31 = vpack.c.bf16 %v11490_v16, %v11490_v16 }
 0x55b   :  { %8890 = vmatprep.subr.msk.bf16.mxu0 %vm246_vm0, %v4314_v15  ;;  %8892 = vmatprep.subr.msk.bf16.mxu1 %vm246_vm0, %v4316_v63  ;;  %v5842_v37 = vpack.c.bf16 %v5826_v13, %v5826_v13  ;;  %v4326_v13 = vpack.c.bf16 %v11500_v48, %v11500_v48  ;;  %v4325_v16 = vpack.c.bf16 %v11496_v61, %v11496_v61 }
 0x55c   :  { %6001 = vmatprep.mubr.bf16.mxu0 %v12307_v35  ;;  %6042 = vmatprep.mubr.bf16.mxu1 %v12307_v35  ;;  %v6255_v63 = vsel %vm246_vm0, %v4323_v31, 0  ;;  %v4327_v48 = vpack.c.bf16 %v11498_v52, %v11498_v52  ;;  %v4329_v52 = vpack.c.bf16 %v11520_v30, %v11520_v30  ;;  %v4336_v50 = vpack.c.bf16 %v11536_v38, %v11536_v38 }
 0x55d   :  { %v5769_v57 = vpop.xlane.xlu0 %5768 }
 0x55e   :  { %10111 = vrcp.f32 %v5769_v57 }
 0x561   :  { %8887 = vmatmul.mubr.msk.bf16.vlgmr.msra.gmra.mrb[164].mxu0 %vm221_vm1, %v5842_v37  ;;  %8889 = vmatmul.mubr.msk.bf16.vlgmr.msra.gmra.mrb[164].mxu1 %vm221_vm1, %v5842_v37  ;;  %v5772_v12 = vpop.xlane.xlu0 %5771  ;;  %v6346_v37 = vsel %vm246_vm0, %v4325_v16, 0 }
 0x562   :  { %6067 = vmatpush1.bf16.msra.mxu0 %v6055_v45  ;;  %6108 = vmatpush1.bf16.msra.mxu1 %v6061_v46  ;;  %10113 = vrcp.f32 %v5772_v12  ;;  %v6352_v45 = vsel %vm246_vm0, %v4327_v48, 0  ;;  %v4330_v46 = vpack.c.bf16 %v11525_v36, %v11525_v36  ;;  %v4331_v36 = vpack.c.bf16 %v11523_v47, %v11523_v47 }
 0x563   :  { %8894 = vmatprep.subr.msk.bf16.mxu0 %vm246_vm0, %v4318_v6  ;;  %8896 = vmatprep.subr.msk.bf16.mxu1 %vm246_vm0, %v4320_v59  ;;  %v4332_v6 = vpack.c.bf16 %v11527_v23, %v11527_v23  ;;  %v4333_v47 = vpack.c.bf16 %v11529_v32, %v11529_v32 }
 0x564   :  { %6098 = vmatprep.mubr.bf16.mxu0 %v12307_v35  ;;  %6139 = vmatprep.mubr.bf16.mxu1 %v12307_v35  ;;  %v6449_v12 = vsel %vm246_vm0, %v4331_v36, 0 }
 0x568   :  { %v10112_v54 = vpop.eup %10111 }
 0x569   :  { %v5827_v24 = vmul.f32 %v10112_v54, %v11696_v53  ;;  %v4334_v54 = vpack.c.bf16 %v11534_v14, %v11534_v14  ;;  %v4335_v14 = vpack.c.bf16 %v11532_v19, %v11532_v19  ;;  %v4337_v19 = vpack.c.bf16 %v11544_v51, %v11544_v51 }
 0x56b   :  { %v5843_v11 = vpack.c.bf16 %v5827_v24, %v5827_v24 }
 0x56c   :  { %v10114_v17 = vpop.eup %10113 }
 0x56d   :  { %8891 = vmatmul.mubr.msk.bf16.vlgmr.msra.gmra.mrb[168].mxu0 %vm221_vm1, %v5843_v11  ;;  %8893 = vmatmul.mubr.msk.bf16.vlgmr.msra.gmra.mrb[168].mxu1 %vm221_vm1, %v5843_v11  ;;  %v5828_v4 = vmul.f32 %v10114_v17, %v11700_v39  ;;  %v6249_v39 = vsel %vm246_vm0, %v4321_v18, 0  ;;  %v6540_v11 = vsel %vm246_vm0, %v4333_v47, 0  ;;  %v6546_v17 = vsel %vm246_vm0, %v4335_v14, 0  ;;  %v12340_v14 = vld [vmem:[#allocation34_spill] sm:$0xff] }
 0x56e   :  { %6164 = vmatpush1.bf16.msra.mxu0 %v6152_v10  ;;  %6205 = vmatpush1.bf16.msra.mxu1 %v6158_v42  ;;  %v4338_v10 = vpack.c.bf16 %v11548_v62, %v11548_v62  ;;  %v4340_v42 = vpack.c.bf16 %v11555_v43, %v11555_v43  ;;  %v4339_v62 = vpack.c.bf16 %v11546_v49, %v11546_v49 }
 0x56f   :  { %8898 = vmatprep.subr.msk.bf16.mxu0 %vm246_vm0, %v4322_v25  ;;  %8900 = vmatprep.subr.msk.bf16.mxu1 %vm246_vm0, %v4324_v20  ;;  %v5844_v15 = vpack.c.bf16 %v5828_v4, %v5828_v4  ;;  %v4342_v4 = vpack.c.bf16 %v11561_v41, %v11561_v41  ;;  %v4344_v18 = vpack.c.bf16 %v11567_v9, %v11567_v9 }
 0x570   :  { %6195 = vmatprep.mubr.bf16.mxu0 %v12307_v35  ;;  %6236 = vmatprep.mubr.bf16.mxu1 %v12307_v35  ;;  %v6643_v20 = vsel %vm246_vm0, %v4339_v62, 0  ;;  %v4341_v49 = vpack.c.bf16 %v11557_v3, %v11557_v3  ;;  %v4343_v41 = vpack.c.bf16 %v11559_v60, %v11559_v60  ;;  %v12332_v60 = vld [vmem:[#allocation27_spill] sm:$0xff] }
 0x571   :  { %v5775_v28 = vpop.xlane.xlu0 %5774 }
 0x572   :  { %10115 = vrcp.f32 %v5775_v28 }
 0x573   :  { %v5778_v53 = vpop.xlane.xlu1 %5777 }
 0x574   :  { %10117 = vrcp.f32 %v5778_v53  ;;  %v6734_v53 = vsel %vm246_vm0, %v4341_v49, 0 }
 0x575   :  { %8895 = vmatmul.mubr.msk.bf16.vlgmr.msra.gmra.mrb[172].mxu0 %vm221_vm1, %v5844_v15  ;;  %8897 = vmatmul.mubr.msk.bf16.vlgmr.msra.gmra.mrb[172].mxu1 %vm221_vm1, %v5844_v15  ;;  %v6740_v15 = vsel %vm246_vm0, %v4343_v41, 0 }
 0x576   :  { %6261 = vmatpush1.bf16.msra.mxu0 %v6249_v39  ;;  %6302 = vmatpush1.bf16.msra.mxu1 %v6255_v63  ;;  %v4346_v39 = vpack.c.bf16 %v11576_v44, %v11576_v44  ;;  %v12331_v63 = vld [vmem:[#allocation31_spill] sm:$0xff]  ;;  %v4345_v44 = vpack.c.bf16 %v12332_v60, %v12332_v60 }
 0x577   :  { %8902 = vmatprep.subr.msk.bf16.mxu0 %vm246_vm0, %v4326_v13  ;;  %8904 = vmatprep.subr.msk.bf16.mxu1 %vm246_vm0, %v4328_v40  ;;  %v4348_v13 = vpack.c.bf16 %v12331_v63, %v12331_v63 }
 0x578   :  { %6292 = vmatprep.mubr.bf16.mxu0 %v12307_v35  ;;  %6333 = vmatprep.mubr.bf16.mxu1 %v12307_v35 }
 0x57c   :  { %v10116_v21 = vpop.eup %10115 }
 0x57d   :  { %v5829_v5 = vmul.f32 %v10116_v21, %v11706_v58 }
 0x57e   :  { %v10118_v57 = vpop.eup %10117 }
 0x57f   :  { %v5845_v0 = vpack.c.bf16 %v5829_v5, %v5829_v5  ;;  %v5830_v61 = vmul.f32 %v10118_v57, %v11710_v1  ;;  %v6443_v1 = vsel %vm246_vm0, %v4329_v52, 0  ;;  %v12337_v52 = vld [vmem:[#allocation30_spill] sm:$0xff] }
 0x580   :  { %v4351_v36 = vpack.c.bf16 %v12337_v52, %v12337_v52  ;;  %v10041_v52 = vld [vmem:[%s12250_s4 + $0x40] sm:$0xff]  }
 0x581   :  { %8899 = vmatmul.mubr.msk.bf16.vlgmr.msra.gmra.mrb[176].mxu0 %vm221_vm1, %v5845_v0  ;;  %8901 = vmatmul.mubr.msk.bf16.vlgmr.msra.gmra.mrb[176].mxu1 %vm221_vm1, %v5845_v0  ;;  %v5846_v59 = vpack.c.bf16 %v5830_v61, %v5830_v61  ;;  %v12334_v0 = vld [vmem:[#allocation32_spill] sm:$0xff] }
 0x582   :  { %6358 = vmatpush1.bf16.msra.mxu0 %v6346_v37  ;;  %6399 = vmatpush1.bf16.msra.mxu1 %v6352_v45  ;;  %v4350_v57 = vpack.c.bf16 %v12334_v0, %v12334_v0  ;;  %v12335_v37 = vld [vmem:[#allocation33_spill] sm:$0xff]  ;;  %v12352_v0 = vld [vmem:[#allocation47_spill] sm:$0xff] }
 0x583   :  { %8906 = vmatprep.subr.msk.bf16.mxu0 %vm246_vm0, %v4330_v46  ;;  %8908 = vmatprep.subr.msk.bf16.mxu1 %vm246_vm0, %v4332_v6  ;;  %v4352_v45 = vpack.c.bf16 %v12335_v37, %v12335_v37  ;;  %v12336_v6 = vld [vmem:[#allocation28_spill] sm:$0xff]  ;;  %v12353_v37 = vld [vmem:[#allocation49_spill] sm:$0xff] }
 0x584   :  { %6389 = vmatprep.mubr.bf16.mxu0 %v12307_v35  ;;  %6430 = vmatprep.mubr.bf16.mxu1 %v12307_v35  ;;  %v4349_v61 = vpack.c.bf16 %v12336_v6, %v12336_v6 }
 0x585   :  { %v5781_v23 = vpop.xlane.xlu0 %5780 }
 0x586   :  { %10119 = vrcp.f32 %v5781_v23 }
 0x587   :  { %v5784_v58 = vpop.xlane.xlu1 %5783 }
 0x588   :  { %10121 = vrcp.f32 %v5784_v58 }
 0x589   :  { %8903 = vmatmul.mubr.msk.bf16.vlgmr.msra.gmra.mrb[180].mxu0 %vm221_vm1, %v5846_v59  ;;  %8905 = vmatmul.mubr.msk.bf16.vlgmr.msra.gmra.mrb[180].mxu1 %vm221_vm1, %v5846_v59 }
 0x58a   :  { %6455 = vmatpush1.bf16.msra.mxu0 %v6443_v1  ;;  %6496 = vmatpush1.bf16.msra.mxu1 %v6449_v12  ;;  %v6928_v1 = vsel %vm246_vm0, %v4349_v61, 0  ;;  %v6934_v12 = vsel %vm246_vm0, %v4351_v36, 0  ;;  %v10042_v36 = vld [vmem:[%s12250_s4 + $0xc0] sm:$0xff]  }
 0x58b   :  { %8910 = vmatprep.subr.msk.bf16.mxu0 %vm246_vm0, %v4334_v54  ;;  %8912 = vmatprep.subr.msk.bf16.mxu1 %vm246_vm0, %v4336_v50  ;;  %v12338_v54 = vld [vmem:[#allocation37_spill] sm:$0xff] }
 0x58c   :  { %6486 = vmatprep.mubr.bf16.mxu0 %v12307_v35  ;;  %6527 = vmatprep.mubr.bf16.mxu1 %v12307_v35  ;;  %v4354_v50 = vpack.c.bf16 %v12338_v54, %v12338_v54  ;;  %v10045_v54 = vld [vmem:[%s12250_s4 + $0x48] sm:$0xff]  }
 0x590   :  { %v10120_v30 = vpop.eup %10119 }
 0x591   :  { %v5831_v38 = vmul.f32 %v10120_v30, %v11716_v7  ;;  %v12339_v30 = vld [vmem:[#allocation39_spill] sm:$0xff] }
 0x592   :  { %v10122_v24 = vpop.eup %10121  ;;  %v4356_v47 = vpack.c.bf16 %v12339_v30, %v12339_v30  ;;  %v10049_v30 = vld [vmem:[%s12250_s4 + $0x50] sm:$0xff]  }
 0x593   :  { %v5847_v22 = vpack.c.bf16 %v5831_v38, %v5831_v38  ;;  %v5832_v32 = vmul.f32 %v10122_v24, %v11720_v29  ;;  %v6637_v29 = vsel %vm246_vm0, %v4337_v19, 0  ;;  %v4353_v38 = vpack.c.bf16 %v12340_v14, %v12340_v14  ;;  %v12343_v19 = vld [vmem:[#allocation38_spill] sm:$0xff]  ;;  %v10052_v14 = vld [vmem:[%s12250_s4 + $0x90] sm:$0xff]  }
 0x594   :  { %v4360_v62 = vpack.c.bf16 %v12343_v19, %v12343_v19  ;;  %v10062_v19 = vld [vmem:[%s12250_s4 + $0xe8] sm:$0xff]  }
 0x595   :  { %8907 = vmatmul.mubr.msk.bf16.vlgmr.msra.gmra.mrb[184].mxu0 %vm221_vm1, %v5847_v22  ;;  %8909 = vmatmul.mubr.msk.bf16.vlgmr.msra.gmra.mrb[184].mxu1 %vm221_vm1, %v5847_v22  ;;  %v5848_v25 = vpack.c.bf16 %v5832_v32, %v5832_v32  ;;  %v12341_v22 = vld [vmem:[#allocation36_spill] sm:$0xff] }
 0x596   :  { %6552 = vmatpush1.bf16.msra.mxu0 %v6540_v11  ;;  %6593 = vmatpush1.bf16.msra.mxu1 %v6546_v17  ;;  %v4355_v24 = vpack.c.bf16 %v12341_v22, %v12341_v22  ;;  %v10054_v22 = vld [vmem:[%s12250_s4 + $0xd8] sm:$0xff]  }
 0x597   :  { %8914 = vmatprep.subr.msk.bf16.mxu0 %vm246_vm0, %v4338_v10  ;;  %8916 = vmatprep.subr.msk.bf16.mxu1 %vm246_vm0, %v4340_v42  ;;  %v7025_v10 = vsel %vm246_vm0, %v4353_v38, 0  ;;  %v12342_v42 = vld [vmem:[#allocation42_spill] sm:$0xff] }
 0x598   :  { %6583 = vmatprep.mubr.bf16.mxu0 %v12307_v35  ;;  %6624 = vmatprep.mubr.bf16.mxu1 %v12307_v35  ;;  %v4358_v32 = vpack.c.bf16 %v12342_v42, %v12342_v42  ;;  %v10053_v38 = vld [vmem:[%s12250_s4 + $0x58] sm:$0xff]   ;;  %v10060_v42 = vld [vmem:[%s12250_s4 + $0xa0] sm:$0xff]  }
 0x599   :  { %v5787_v43 = vpop.xlane.xlu0 %5786 }
 0x59a   :  { %10123 = vrcp.f32 %v5787_v43 }
 0x59b   :  { %v5790_v7 = vpop.xlane.xlu1 %5789 }
 0x59c   :  { %10125 = vrcp.f32 %v5790_v7 }
 0x59d   :  { %8911 = vmatmul.mubr.msk.bf16.vlgmr.msra.gmra.mrb[188].mxu0 %vm221_vm1, %v5848_v25  ;;  %8913 = vmatmul.mubr.msk.bf16.vlgmr.msra.gmra.mrb[188].mxu1 %vm221_vm1, %v5848_v25  ;;  %v12344_v25 = vld [vmem:[#allocation48_spill] sm:$0xff] }
 0x59e   :  { %6649 = vmatpush1.bf16.msra.mxu0 %v6637_v29  ;;  %6690 = vmatpush1.bf16.msra.mxu1 %v6643_v20  ;;  %v4357_v29 = vpack.c.bf16 %v12344_v25, %v12344_v25  ;;  %v12345_v20 = vld [vmem:[#allocation35_spill] sm:$0xff]  ;;  %v10066_v25 = vld [vmem:[%s12250_s4 + $0xf0] sm:$0xff]  }
 0x59f   :  { %8918 = vmatprep.subr.msk.bf16.mxu0 %vm246_vm0, %v4342_v4  ;;  %8920 = vmatprep.subr.msk.bf16.mxu1 %vm246_vm0, %v4344_v18  ;;  %v4359_v4 = vpack.c.bf16 %v12345_v20, %v12345_v20  ;;  %v10068_v20 = vld [vmem:[%s12250_s4 + $0xb0] sm:$0xff]  }
 0x5a0   :  { %6680 = vmatprep.mubr.bf16.mxu0 %v12307_v35  ;;  %6721 = vmatprep.mubr.bf16.mxu1 %v12307_v35  ;;  %v7122_v41 = vsel %vm246_vm0, %v4357_v29, 0  ;;  %v10067_v29 = vld [vmem:[%s12250_s4 + $0x30] sm:$0xff]  }
 0x5a4   :  { %v10124_v51 = vpop.eup %10123 }
 0x5a5   :  { %v5833_v9 = vmul.f32 %v10124_v51, %v11726_v26  ;;  %v12333_v26 = vld [vmem:[#allocation29_spill] sm:$0xff] }
 0x5a6   :  { %v10126_v28 = vpop.eup %10125  ;;  %v4347_v40 = vpack.c.bf16 %v12333_v26, %v12333_v26 }
 0x5a7   :  { %v5849_v31 = vpack.c.bf16 %v5833_v9, %v5833_v9  ;;  %v5834_v3 = vmul.f32 %v10126_v28, %v11730_v27  ;;  %v6831_v27 = vsel %vm246_vm0, %v4345_v44, 0  ;;  %v7128_v9 = vsel %vm246_vm0, %v4359_v4, 0  ;;  %v10069_v4 = vld [vmem:[%s12250_s4 + $0x78] sm:$0xff]  }
 0x5a8   :  { %v6837_v5 = vsel %vm246_vm0, %v4347_v40, 0  ;;  %v12350_v40 = vld [vmem:[#allocation41_spill] sm:$0xff] }
 0x5a9   :  { %8915 = vmatmul.mubr.msk.bf16.vlgmr.msra.gmra.mrb[192].mxu0 %vm221_vm1, %v5849_v31  ;;  %8917 = vmatmul.mubr.msk.bf16.vlgmr.msra.gmra.mrb[192].mxu1 %vm221_vm1, %v5849_v31  ;;  %v5850_v48 = vpack.c.bf16 %v5834_v3, %v5834_v3  ;;  %v12346_v31 = vld [vmem:[#allocation43_spill] sm:$0xff] }
 0x5aa   :  { %6746 = vmatpush1.bf16.msra.mxu0 %v6734_v53  ;;  %6787 = vmatpush1.bf16.msra.mxu1 %v6740_v15  ;;  %v4362_v28 = vpack.c.bf16 %v12346_v31, %v12346_v31  ;;  %v12347_v53 = vld [vmem:[#allocation44_spill] sm:$0xff] }
 0x5ab   :  { %8922 = vmatprep.subr.msk.bf16.mxu0 %vm246_vm0, %v4346_v39  ;;  %8924 = vmatprep.subr.msk.bf16.mxu1 %vm246_vm0, %v4348_v13  ;;  %v4364_v15 = vpack.c.bf16 %v12347_v53, %v12347_v53  ;;  %v12348_v39 = vld [vmem:[#allocation46_spill] sm:$0xff]  ;;  %v12349_v13 = vld [vmem:[#allocation40_spill] sm:$0xff] }
 0x5ac   :  { %6777 = vmatprep.mubr.bf16.mxu0 %v12307_v35  ;;  %6818 = vmatprep.mubr.bf16.mxu1 %v12307_v35  ;;  %v4361_v63 = vpack.c.bf16 %v12348_v39, %v12348_v39  ;;  %v4363_v3 = vpack.c.bf16 %v12349_v13, %v12349_v13 }
 0x5ad   :  { %v5793_v21 = vpop.xlane.xlu0 %5792 }
 0x5ae   :  { %10127 = vrcp.f32 %v5793_v21  ;;  %v7219_v26 = vsel %vm246_vm0, %v4361_v63, 0  ;;  %v4366_v21 = vpack.c.bf16 %v12350_v40, %v12350_v40 }
 0x5af   :  { %v5796_v16 = vpop.xlane.xlu1 %5795 }
 0x5b0   :  { %10129 = vrcp.f32 %v5796_v16  ;;  %v12351_v16 = vld [vmem:[#allocation45_spill] sm:$0xff] }
 0x5b1   :  { %8919 = vmatmul.mubr.msk.bf16.vlgmr.msra.gmra.mrb[196].mxu0 %vm221_vm1, %v5850_v48  ;;  %8921 = vmatmul.mubr.msk.bf16.vlgmr.msra.gmra.mrb[196].mxu1 %vm221_vm1, %v5850_v48  ;;  %v4368_v48 = vpack.c.bf16 %v12351_v16, %v12351_v16 }
 0x5b2   :  { %6843 = vmatpush1.bf16.msra.mxu0 %v6831_v27  ;;  %6884 = vmatpush1.bf16.msra.mxu1 %v6837_v5 }
 0x5b3   :  { %8926 = vmatprep.subr.msk.bf16.mxu0 %vm246_vm0, %v4350_v57  ;;  %8928 = vmatprep.subr.msk.bf16.mxu1 %vm246_vm0, %v4352_v45  ;;  %v4365_v57 = vpack.c.bf16 %v12352_v0, %v12352_v0  ;;  %v4367_v45 = vpack.c.bf16 %v12353_v37, %v12353_v37 }
 0x5b4   :  { %6874 = vmatprep.mubr.bf16.mxu0 %v12307_v35  ;;  %6915 = vmatprep.mubr.bf16.mxu1 %v12307_v35 }
 0x5b8   :  { %v10128_v46 = vpop.eup %10127 }
 0x5b9   :  { %v5835_v23 = vmul.f32 %v10128_v46, %v11736_v2 }
 0x5ba   :  { %v10130_v59 = vpop.eup %10129 }
 0x5bb   :  { %v5851_v58 = vpack.c.bf16 %v5835_v23, %v5835_v23  ;;  %v5836_v2 = vmul.f32 %v10130_v59, %v11740_v33  ;;  %v7031_v33 = vsel %vm246_vm0, %v4355_v24, 0  ;;  %v7316_v23 = vsel %vm246_vm0, %v4365_v57, 0  ;;  %v10043_v59 = vld [vmem:[%s12250_s4] sm:$0xff]   ;;  %v10055_v24 = vld [vmem:[%s12250_s4 + $0x18] sm:$0xff]  }
 0x5bd   :  { %8923 = vmatmul.mubr.msk.bf16.vlgmr.msra.gmra.mrb[200].mxu0 %vm221_vm1, %v5851_v58  ;;  %8925 = vmatmul.mubr.msk.bf16.vlgmr.msra.gmra.mrb[200].mxu1 %vm221_vm1, %v5851_v58  ;;  %v5852_v17 = vpack.c.bf16 %v5836_v2, %v5836_v2  ;;  %v7322_v58 = vsel %vm246_vm0, %v4367_v45, 0  ;;  %v10051_v2 = vld [vmem:[%s12250_s4 + $0x10] sm:$0xff]  }
 0x5be   :  { %6940 = vmatpush1.bf16.msra.mxu0 %v6928_v1  ;;  %6981 = vmatpush1.bf16.msra.mxu1 %v6934_v12  ;;  %v10044_v1 = vld [vmem:[%s12250_s4 + $0x80] sm:$0xff]  }
 0x5bf   :  { %8930 = vmatprep.subr.msk.bf16.mxu0 %vm246_vm0, %v4354_v50  ;;  %8932 = vmatprep.subr.msk.bf16.mxu1 %vm246_vm0, %v4356_v47  ;;  %v10048_v50 = vld [vmem:[%s12250_s4 + $0x88] sm:$0xff]   ;;  %v10050_v47 = vld [vmem:[%s12250_s4 + $0xd0] sm:$0xff]  }
 0x5c0   :  { %6971 = vmatprep.mubr.bf16.mxu0 %v12307_v35  ;;  %7012 = vmatprep.mubr.bf16.mxu1 %v12307_v35 }
 0x5c1   :  { %v5799_v11 = vpop.xlane.xlu0 %5798 }
 0x5c2   :  { %10131 = vrcp.f32 %v5799_v11  ;;  %v10056_v11 = vld [vmem:[%s12250_s4 + $0x98] sm:$0xff]  }
 0x5c5   :  { %8927 = vmatmul.mubr.msk.bf16.vlgmr.msra.gmra.mrb[204].mxu0 %vm221_vm1, %v5852_v17  ;;  %8929 = vmatmul.mubr.msk.bf16.vlgmr.msra.gmra.mrb[204].mxu1 %vm221_vm1, %v5852_v17  ;;  %v5802_v43 = vpop.xlane.xlu1 %5801  ;;  %v10057_v17 = vld [vmem:[%s12250_s4 + $0x60] sm:$0xff]  }
 0x5c6   :  { %7037 = vmatpush1.bf16.msra.mxu0 %v7025_v10  ;;  %7078 = vmatpush1.bf16.msra.mxu1 %v7031_v33  ;;  %10133 = vrcp.f32 %v5802_v43  ;;  %v10058_v10 = vld [vmem:[%s12250_s4 + $0xe0] sm:$0xff]   ;;  %v10064_v43 = vld [vmem:[%s12250_s4 + $0xa8] sm:$0xff]  }
 0x5c7   :  { %8934 = vmatprep.subr.msk.bf16.mxu0 %vm246_vm0, %v4358_v32  ;;  %8936 = vmatprep.subr.msk.bf16.mxu1 %vm246_vm0, %v4360_v62  ;;  %v10059_v33 = vld [vmem:[%s12250_s4 + $0x20] sm:$0xff]   ;;  %v10061_v32 = vld [vmem:[%s12250_s4 + $0x68] sm:$0xff]  }
 0x5c8   :  { %7068 = vmatprep.mubr.bf16.mxu0 %v12307_v35  ;;  %7109 = vmatprep.mubr.bf16.mxu1 %v12307_v35  ;;  %v10063_v62 = vld [vmem:[%s12250_s4 + $0x28] sm:$0xff]  }
 0x5cc   :  { %v10132_v7 = vpop.eup %10131 }
 0x5cd   :  { %v5837_v18 = vmul.f32 %v10132_v7, %v11746_v8  ;;  %v10065_v7 = vld [vmem:[%s12250_s4 + $0x70] sm:$0xff]  }
 0x5cf   :  { %v5853_v51 = vpack.c.bf16 %v5837_v18, %v5837_v18  ;;  %v10070_v18 = vld [vmem:[%s12250_s4 + $0xf8] sm:$0xff]  }
 0x5d0   :  { %v10134_v49 = vpop.eup %10133 }
 0x5d1   :  { %8931 = vmatmul.mubr.msk.bf16.vlgmr.msra.gmra.mrb[208].mxu0 %vm221_vm1, %v5853_v51  ;;  %8933 = vmatmul.mubr.msk.bf16.vlgmr.msra.gmra.mrb[208].mxu1 %vm221_vm1, %v5853_v51  ;;  %v5838_v8 = vmul.f32 %v10134_v49, %v11750_v55  ;;  %v7225_v55 = vsel %vm246_vm0, %v4363_v3, 0  ;;  %v10071_v51 = vld [vmem:[%s12250_s4 + $0x38] sm:$0xff]  }
 0x5d2   :  { %7134 = vmatpush1.bf16.msra.mxu0 %v7122_v41  ;;  %7175 = vmatpush1.bf16.msra.mxu1 %v7128_v9  ;;  %v10072_v49 = vld [vmem:[%s12250_s4 + $0xb8] sm:$0xff]  }
 0x5d3   :  { %8938 = vmatprep.subr.msk.bf16.mxu0 %vm246_vm0, %v4362_v28  ;;  %8940 = vmatprep.subr.msk.bf16.mxu1 %vm246_vm0, %v4364_v15  ;;  %v5854_v44 = vpack.c.bf16 %v5838_v8, %v5838_v8 }
 0x5d4   :  { %7165 = vmatprep.mubr.bf16.mxu0 %v12307_v35  ;;  %7206 = vmatprep.mubr.bf16.mxu1 %v12307_v35 }
 0x5d5   :  { %v5805_v60 = vpop.xlane.xlu0 %5804 }
 0x5d6   :  { %10135 = vrcp.f32 %v5805_v60 }
 0x5d9   :  { %8935 = vmatmul.mubr.msk.bf16.vlgmr.msra.gmra.mrb[212].mxu0 %vm221_vm1, %v5854_v44  ;;  %8937 = vmatmul.mubr.msk.bf16.vlgmr.msra.gmra.mrb[212].mxu1 %vm221_vm1, %v5854_v44  ;;  %v5808_v27 = vpop.xlane.xlu1 %5807 }
 0x5da   :  { %7231 = vmatpush1.bf16.msra.mxu0 %v7219_v26  ;;  %7272 = vmatpush1.bf16.msra.mxu1 %v7225_v55  ;;  %10137 = vrcp.f32 %v5808_v27 }
 0x5db   :  { %8942 = vmatprep.subr.msk.bf16.mxu0 %vm246_vm0, %v4366_v21  ;;  %8944 = vmatprep.subr.msk.bf16.mxu1 %vm246_vm0, %v4368_v48 }
 0x5dc   :  { %7262 = vmatprep.mubr.bf16.mxu0 %v12307_v35  ;;  %7303 = vmatprep.mubr.bf16.mxu1 %v12307_v35 }
 0x5e0   :  { %v10136_v5 = vpop.eup %10135 }
 0x5e1   :  { %v5839_v46 = vmul.f32 %v10136_v5, %v11756_v34 }
 0x5e3   :  { %v5855_v6 = vpack.c.bf16 %v5839_v46, %v5839_v46 }
 0x5e4   :  { %v10138_v61 = vpop.eup %10137 }
 0x5e5   :  { %8939 = vmatmul.mubr.msk.bf16.vlgmr.msra.gmra.mrb[216].mxu0 %vm221_vm1, %v5855_v6  ;;  %8941 = vmatmul.mubr.msk.bf16.vlgmr.msra.gmra.mrb[216].mxu1 %vm221_vm1, %v5855_v6  ;;  %v5840_v34 = vmul.f32 %v10138_v61, %v11760_v56  ;;  %v10046_v56 = vld [vmem:[%s12250_s4 + $0xc8] sm:$0xff]  }
 0x5e6   :  { %7328 = vmatpush1.bf16.msra.mxu0 %v7316_v23  ;;  %7369 = vmatpush1.bf16.msra.mxu1 %v7322_v58 }
 0x5e7   :  { %7359 = vmatprep.mubr.bf16.mxu0 %v12307_v35  ;;  %7400 = vmatprep.mubr.bf16.mxu1 %v12307_v35  ;;  %v5856_v12 = vpack.c.bf16 %v5840_v34, %v5840_v34  ;;  %v10047_v35 = vld [vmem:[%s12250_s4 + $0x8] sm:$0xff]   ;;  %s10410_s4 = smov [#allocation19]  }
 0x5e8   :  { %9001 = vmatprep.subr.bf16.mxu0 %v10041_v52  ;;  %9065 = vmatprep.subr.bf16.mxu1 %v10042_v36  ;;  %s8459_s13 = sshll.u32 %s10410_s4, 4  ;;  %s8460_s13 = int_to_ptr.vmem [resolvable:$true] %s8459_s13 }
 0x5e9   :  { %s10359_s2 = scalar_lea.vmem %s8460_s13, 256  ;;  %p10364_p11 = scmp.lt.s32.totalorder %s8460_s13, %s8460_s13 }
 0x5ea   :  { %p10360_p10 = scmp.ne.s32.totalorder %s8460_s13, %s10359_s2  ;;  %p10365_p12 = scmp.lt.s32.totalorder %s10359_s2, %s10359_s2 }
 0x5ec   :  { %p10366_p13 = por %p10365_p12, %p10364_p11 }
 0x5ed   :  { %8943 = vmatmul.mubr.msk.bf16.vlgmr.msra.gmra.mrb[220].mxu0 %vm221_vm1, %v5856_v12  ;;  %8945 = vmatmul.mubr.msk.bf16.vlgmr.msra.gmra.mrb[220].mxu1 %vm221_vm1, %v5856_v12 }
 0x5ee   :  { %9002 = vmatpush3.bf16.msra.mxu0 %v10043_v59  ;;  %9066 = vmatpush3.bf16.msra.mxu1 %v10044_v1  ;;  %p10367_p0 = pnand %p10366_p13, %p10360_p10 }
 0x5ef   :  { %9003 = vmatprep.subr.bf16.mxu0 %v10045_v54  ;;  %9067 = vmatprep.subr.bf16.mxu1 %v10046_v56 }
 0x5f2   :  { %9004 = vmatpush3.bf16.msra.mxu0 %v10047_v35  ;;  %9068 = vmatpush3.bf16.msra.mxu1 %v10048_v50 }
 0x5f3   :  { %9005 = vmatprep.subr.bf16.mxu0 %v10049_v30  ;;  %9069 = vmatprep.subr.bf16.mxu1 %v10050_v47 }
 0x5f6   :  { %9006 = vmatpush3.bf16.msra.mxu0 %v10051_v2  ;;  %9070 = vmatpush3.bf16.msra.mxu1 %v10052_v14 }
 0x5f7   :  { %9007 = vmatprep.subr.bf16.mxu0 %v10053_v38  ;;  %9071 = vmatprep.subr.bf16.mxu1 %v10054_v22 }
 0x5fa   :  { %9008 = vmatpush3.bf16.msra.mxu0 %v10055_v24  ;;  %9072 = vmatpush3.bf16.msra.mxu1 %v10056_v11 }
 0x5fb   :  { %9009 = vmatprep.subr.bf16.mxu0 %v10057_v17  ;;  %9073 = vmatprep.subr.bf16.mxu1 %v10058_v10 }
 0x5fe   :  { %9010 = vmatpush3.bf16.msra.mxu0 %v10059_v33  ;;  %9074 = vmatpush3.bf16.msra.mxu1 %v10060_v42 }
 0x5ff   :  { %9011 = vmatprep.subr.bf16.mxu0 %v10061_v32  ;;  %9075 = vmatprep.subr.bf16.mxu1 %v10062_v19 }
 0x602   :  { %9012 = vmatpush3.bf16.msra.mxu0 %v10063_v62  ;;  %9076 = vmatpush3.bf16.msra.mxu1 %v10064_v43 }
 0x603   :  { %9013 = vmatprep.subr.bf16.mxu0 %v10065_v7  ;;  %9077 = vmatprep.subr.bf16.mxu1 %v10066_v25 }
 0x606   :  { %9014 = vmatpush3.bf16.msra.mxu0 %v10067_v29  ;;  %9078 = vmatpush3.bf16.msra.mxu1 %v10068_v20 }
 0x607   :  { %9015 = vmatprep.subr.bf16.mxu0 %v10069_v4  ;;  %9079 = vmatprep.subr.bf16.mxu1 %v10070_v18 }
 0x60a   :  { %9016 = vmatpush3.bf16.msra.mxu0 %v10071_v51  ;;  %9080 = vmatpush3.bf16.msra.mxu1 %v10072_v49 }
 0x62c   :  { %v5906_v41 = vpop.f32.mrb[160].mxu0  ;;  %v5947_v9 = vpop.f32.mrb[160].mxu1 }
 0x62d   :  { %v5908_v31 = vpop.f32.mrb[161].mxu0  ;;  %v5949_v28 = vpop.f32.mrb[161].mxu1 }
 0x62e   :  { %v5910_v53 = vpop.f32.mrb[162].mxu0  ;;  %v5951_v15 = vpop.f32.mrb[162].mxu1 }
 0x62f   :  { %v5911_v8 = vpop.f32.mrb[163].mxu0  ;;  %v5952_v39 = vpop.f32.mrb[163].mxu1 }
 0x634   :  { %v6003_v63 = vpop.f32.mrb[164].mxu0  ;;  %v6044_v13 = vpop.f32.mrb[164].mxu1 }
 0x635   :  { %v7409_v3 = vpack.c.bf16 %v6003_v63, %v5906_v41  ;;  %v7411_v60 = vpack.c.bf16 %v6044_v13, %v5947_v9  ;;  %v6005_v44 = vpop.f32.mrb[165].mxu0  ;;  %v6046_v26 = vpop.f32.mrb[165].mxu1 }
 0x636   :  { %v7410_v55 = vpack.c.bf16 %v6005_v44, %v5908_v31  ;;  %v7412_v40 = vpack.c.bf16 %v6046_v26, %v5949_v28  ;;  %v6007_v21 = vpop.f32.mrb[166].mxu0  ;;  %v6048_v16 = vpop.f32.mrb[166].mxu1 }
 0x637   :  { %v6008_v48 = vpop.f32.mrb[167].mxu0  ;;  %v6049_v27 = vpop.f32.mrb[167].mxu1 }
 0x638   :  { %7736 = vmatprep.mubr.bf16.mxu0 %v7410_v55  ;;  %7833 = vmatprep.mubr.bf16.mxu1 %v7412_v40 }
 0x639   :  { %7737 = vmatmul.mubr.bf16.vlgmr.msra.gmra.mrb[224].mxu0 %v7409_v3  ;;  %7834 = vmatmul.mubr.bf16.vlgmr.msra.gmra.mrb[224].mxu1 %v7411_v60 }
 0x640   :  { %v6100_v5 = vpop.f32.mrb[168].mxu0  ;;  %v6141_v0 = vpop.f32.mrb[168].mxu1 }
 0x641   :  { %v6102_v57 = vpop.f32.mrb[169].mxu0  ;;  %v6143_v37 = vpop.f32.mrb[169].mxu1 }
 0x642   :  { %v6104_v45 = vpop.f32.mrb[170].mxu0  ;;  %v6145_v46 = vpop.f32.mrb[170].mxu1 }
 0x643   :  { %v6105_v6 = vpop.f32.mrb[171].mxu0  ;;  %v6146_v61 = vpop.f32.mrb[171].mxu1 }
 0x648   :  { %v6197_v52 = vpop.f32.mrb[172].mxu0  ;;  %v6238_v36 = vpop.f32.mrb[172].mxu1 }
 0x649   :  { %v7413_v23 = vpack.c.bf16 %v6197_v52, %v6100_v5  ;;  %v7415_v58 = vpack.c.bf16 %v6238_v36, %v6141_v0  ;;  %v6199_v34 = vpop.f32.mrb[173].mxu0  ;;  %v6240_v59 = vpop.f32.mrb[173].mxu1 }
 0x64a   :  { %v7414_v1 = vpack.c.bf16 %v6199_v34, %v6102_v57  ;;  %v7416_v12 = vpack.c.bf16 %v6240_v59, %v6143_v37  ;;  %v6201_v54 = vpop.f32.mrb[174].mxu0  ;;  %v6242_v56 = vpop.f32.mrb[174].mxu1 }
 0x64b   :  { %v6202_v35 = vpop.f32.mrb[175].mxu0  ;;  %v6243_v50 = vpop.f32.mrb[175].mxu1 }
 0x64c   :  { %7744 = vmatprep.mubr.bf16.mxu0 %v7414_v1  ;;  %7841 = vmatprep.mubr.bf16.mxu1 %v7416_v12 }
 0x64d   :  { %7745 = vmatmul.mubr.bf16.gmra.mrb[228].mxu0 %v7413_v23  ;;  %7842 = vmatmul.mubr.bf16.gmra.mrb[228].mxu1 %v7415_v58 }
 0x654   :  { %v6294_v30 = vpop.f32.mrb[176].mxu0  ;;  %v6335_v47 = vpop.f32.mrb[176].mxu1 }
 0x655   :  { %v6296_v2 = vpop.f32.mrb[177].mxu0  ;;  %v6337_v14 = vpop.f32.mrb[177].mxu1 }
 0x656   :  { %v6298_v38 = vpop.f32.mrb[178].mxu0  ;;  %v6339_v22 = vpop.f32.mrb[178].mxu1 }
 0x657   :  { %v6299_v24 = vpop.f32.mrb[179].mxu0  ;;  %v6340_v11 = vpop.f32.mrb[179].mxu1 }
 0x65c   :  { %v6391_v17 = vpop.f32.mrb[180].mxu0  ;;  %v6432_v10 = vpop.f32.mrb[180].mxu1 }
 0x65d   :  { %v7417_v33 = vpack.c.bf16 %v6391_v17, %v6294_v30  ;;  %v7419_v42 = vpack.c.bf16 %v6432_v10, %v6335_v47  ;;  %v6393_v32 = vpop.f32.mrb[181].mxu0  ;;  %v6434_v19 = vpop.f32.mrb[181].mxu1 }
 0x65e   :  { %v7418_v62 = vpack.c.bf16 %v6393_v32, %v6296_v2  ;;  %v7420_v43 = vpack.c.bf16 %v6434_v19, %v6337_v14  ;;  %v6395_v7 = vpop.f32.mrb[182].mxu0  ;;  %v6436_v25 = vpop.f32.mrb[182].mxu1 }
 0x65f   :  { %v6396_v29 = vpop.f32.mrb[183].mxu0  ;;  %v6437_v20 = vpop.f32.mrb[183].mxu1 }
 0x660   :  { %7752 = vmatprep.mubr.bf16.mxu0 %v7418_v62  ;;  %7849 = vmatprep.mubr.bf16.mxu1 %v7420_v43 }
 0x661   :  { %7753 = vmatmul.mubr.bf16.gmra.mrb[232].mxu0 %v7417_v33  ;;  %7850 = vmatmul.mubr.bf16.gmra.mrb[232].mxu1 %v7419_v42 }
 0x668   :  { %v6488_v4 = vpop.f32.mrb[184].mxu0  ;;  %v6529_v18 = vpop.f32.mrb[184].mxu1 }
 0x669   :  { %v6490_v51 = vpop.f32.mrb[185].mxu0  ;;  %v6531_v49 = vpop.f32.mrb[185].mxu1 }
 0x66a   :  { %v6492_v41 = vpop.f32.mrb[186].mxu0  ;;  %v6533_v9 = vpop.f32.mrb[186].mxu1 }
 0x66b   :  { %v6493_v31 = vpop.f32.mrb[187].mxu0  ;;  %v6534_v28 = vpop.f32.mrb[187].mxu1 }
 0x66c   :  { %v7914_v31 = vld [vmem:[#allocation10] sm:$0xf] }
 0x66d   :  { %9442 = vmatprep.subr.msk.bf16.mxu0 %vm246_vm0, %v7914_v31 }
 0x670   :  { %v6585_v53 = vpop.f32.mrb[188].mxu0  ;;  %v6626_v15 = vpop.f32.mrb[188].mxu1 }
 0x671   :  { %v7421_v8 = vpack.c.bf16 %v6585_v53, %v6488_v4  ;;  %v7423_v39 = vpack.c.bf16 %v6626_v15, %v6529_v18  ;;  %v6587_v63 = vpop.f32.mrb[189].mxu0  ;;  %v6628_v13 = vpop.f32.mrb[189].mxu1 }
 0x672   :  { %v7422_v3 = vpack.c.bf16 %v6587_v63, %v6490_v51  ;;  %v7424_v60 = vpack.c.bf16 %v6628_v13, %v6531_v49  ;;  %v6589_v44 = vpop.f32.mrb[190].mxu0  ;;  %v6630_v26 = vpop.f32.mrb[190].mxu1 }
 0x673   :  { %v6590_v55 = vpop.f32.mrb[191].mxu0  ;;  %v6631_v40 = vpop.f32.mrb[191].mxu1 }
 0x674   :  { %7760 = vmatprep.mubr.bf16.mxu0 %v7422_v3  ;;  %7857 = vmatprep.mubr.bf16.mxu1 %v7424_v60 }
 0x675   :  { %7761 = vmatmul.mubr.bf16.gmra.mrb[236].mxu0 %v7421_v8  ;;  %7858 = vmatmul.mubr.bf16.gmra.mrb[236].mxu1 %v7423_v39  ;;  %v7950_v39 = vsel %vm246_vm0, %v7914_v31, 0 }
 0x676   :  { %9149 = vmatpush3.bf16.msra.mxu0 %v7950_v39 }
 0x67c   :  { %v6682_v21 = vpop.f32.mrb[192].mxu0  ;;  %v6723_v16 = vpop.f32.mrb[192].mxu1 }
 0x67d   :  { %v6684_v48 = vpop.f32.mrb[193].mxu0  ;;  %v6725_v27 = vpop.f32.mrb[193].mxu1 }
 0x67e   :  { %v6686_v5 = vpop.f32.mrb[194].mxu0  ;;  %v6727_v0 = vpop.f32.mrb[194].mxu1 }
 0x67f   :  { %v6687_v57 = vpop.f32.mrb[195].mxu0  ;;  %v6728_v37 = vpop.f32.mrb[195].mxu1 }
 0x684   :  { %v6779_v45 = vpop.f32.mrb[196].mxu0  ;;  %v6820_v46 = vpop.f32.mrb[196].mxu1 }
 0x685   :  { %v7425_v6 = vpack.c.bf16 %v6779_v45, %v6682_v21  ;;  %v7427_v61 = vpack.c.bf16 %v6820_v46, %v6723_v16  ;;  %v6781_v52 = vpop.f32.mrb[197].mxu0  ;;  %v6822_v36 = vpop.f32.mrb[197].mxu1 }
 0x686   :  { %v7426_v23 = vpack.c.bf16 %v6781_v52, %v6684_v48  ;;  %v7428_v58 = vpack.c.bf16 %v6822_v36, %v6725_v27  ;;  %v6783_v34 = vpop.f32.mrb[198].mxu0  ;;  %v6824_v59 = vpop.f32.mrb[198].mxu1 }
 0x687   :  { %v6784_v1 = vpop.f32.mrb[199].mxu0  ;;  %v6825_v12 = vpop.f32.mrb[199].mxu1 }
 0x688   :  { %7768 = vmatprep.mubr.bf16.mxu0 %v7426_v23  ;;  %7865 = vmatprep.mubr.bf16.mxu1 %v7428_v58 }
 0x689   :  { %7769 = vmatmul.mubr.bf16.gmra.mrb[240].mxu0 %v7425_v6  ;;  %7866 = vmatmul.mubr.bf16.gmra.mrb[240].mxu1 %v7427_v61 }
 0x690   :  { %v6876_v54 = vpop.f32.mrb[200].mxu0  ;;  %v6917_v56 = vpop.f32.mrb[200].mxu1 }
 0x691   :  { %v6878_v35 = vpop.f32.mrb[201].mxu0  ;;  %v6919_v50 = vpop.f32.mrb[201].mxu1 }
 0x692   :  { %v6880_v30 = vpop.f32.mrb[202].mxu0  ;;  %v6921_v47 = vpop.f32.mrb[202].mxu1 }
 0x693   :  { %v6881_v2 = vpop.f32.mrb[203].mxu0  ;;  %v6922_v14 = vpop.f32.mrb[203].mxu1 }
 0x698   :  { %v6973_v38 = vpop.f32.mrb[204].mxu0  ;;  %v7014_v22 = vpop.f32.mrb[204].mxu1 }
 0x699   :  { %v7429_v24 = vpack.c.bf16 %v6973_v38, %v6876_v54  ;;  %v7431_v11 = vpack.c.bf16 %v7014_v22, %v6917_v56  ;;  %v6975_v17 = vpop.f32.mrb[205].mxu0  ;;  %v7016_v10 = vpop.f32.mrb[205].mxu1  ;;  %v12114_v54 = vld [vmem:[#allocation8] ss:$0 sm:$0xff] }
 0x69a   :  { %v7430_v33 = vpack.c.bf16 %v6975_v17, %v6878_v35  ;;  %v7432_v42 = vpack.c.bf16 %v7016_v10, %v6919_v50  ;;  %v6977_v32 = vpop.f32.mrb[206].mxu0  ;;  %v7018_v19 = vpop.f32.mrb[206].mxu1 }
 0x69b   :  { %v6978_v62 = vpop.f32.mrb[207].mxu0  ;;  %v7019_v43 = vpop.f32.mrb[207].mxu1 }
 0x69c   :  { %7776 = vmatprep.mubr.bf16.mxu0 %v7430_v33  ;;  %7873 = vmatprep.mubr.bf16.mxu1 %v7432_v42 }
 0x69d   :  { %7777 = vmatmul.mubr.bf16.gmra.mrb[244].mxu0 %v7429_v24  ;;  %7874 = vmatmul.mubr.bf16.gmra.mrb[244].mxu1 %v7431_v11 }
 0x6a4   :  { %v7070_v7 = vpop.f32.mrb[208].mxu0  ;;  %v7111_v25 = vpop.f32.mrb[208].mxu1 }
 0x6a5   :  { %v7072_v29 = vpop.f32.mrb[209].mxu0  ;;  %v7113_v20 = vpop.f32.mrb[209].mxu1 }
 0x6a6   :  { %v7074_v4 = vpop.f32.mrb[210].mxu0  ;;  %v7115_v18 = vpop.f32.mrb[210].mxu1 }
 0x6a7   :  { %v7075_v51 = vpop.f32.mrb[211].mxu0  ;;  %v7116_v49 = vpop.f32.mrb[211].mxu1 }
 0x6ac   :  { %v7167_v41 = vpop.f32.mrb[212].mxu0  ;;  %v7208_v9 = vpop.f32.mrb[212].mxu1 }
 0x6ad   :  { %v7433_v28 = vpack.c.bf16 %v7167_v41, %v7070_v7  ;;  %v7435_v53 = vpack.c.bf16 %v7208_v9, %v7111_v25  ;;  %v7169_v15 = vpop.f32.mrb[213].mxu0  ;;  %v7210_v8 = vpop.f32.mrb[213].mxu1 }
 0x6ae   :  { %v7434_v63 = vpack.c.bf16 %v7169_v15, %v7072_v29  ;;  %v7436_v13 = vpack.c.bf16 %v7210_v8, %v7113_v20  ;;  %v7171_v3 = vpop.f32.mrb[214].mxu0  ;;  %v7212_v60 = vpop.f32.mrb[214].mxu1 }
 0x6af   :  { %v7172_v44 = vpop.f32.mrb[215].mxu0  ;;  %v7213_v26 = vpop.f32.mrb[215].mxu1 }
 0x6b0   :  { %7784 = vmatprep.mubr.bf16.mxu0 %v7434_v63  ;;  %7881 = vmatprep.mubr.bf16.mxu1 %v7436_v13 }
 0x6b1   :  { %7785 = vmatmul.mubr.bf16.gmra.mrb[248].mxu0 %v7433_v28  ;;  %7882 = vmatmul.mubr.bf16.gmra.mrb[248].mxu1 %v7435_v53 }
 0x6b8   :  { %v7264_v55 = vpop.f32.mrb[216].mxu0  ;;  %v7305_v40 = vpop.f32.mrb[216].mxu1 }
 0x6b9   :  { %v7266_v21 = vpop.f32.mrb[217].mxu0  ;;  %v7307_v16 = vpop.f32.mrb[217].mxu1 }
 0x6ba   :  { %v7268_v48 = vpop.f32.mrb[218].mxu0  ;;  %v7309_v27 = vpop.f32.mrb[218].mxu1 }
 0x6bb   :  { %v7269_v5 = vpop.f32.mrb[219].mxu0  ;;  %v7310_v0 = vpop.f32.mrb[219].mxu1 }
 0x6c0   :  { %v7361_v57 = vpop.f32.mrb[220].mxu0  ;;  %v7402_v37 = vpop.f32.mrb[220].mxu1 }
 0x6c1   :  { %v7437_v45 = vpack.c.bf16 %v7361_v57, %v7264_v55  ;;  %v7439_v46 = vpack.c.bf16 %v7402_v37, %v7305_v40  ;;  %v7363_v6 = vpop.f32.mrb[221].mxu0  ;;  %v7404_v61 = vpop.f32.mrb[221].mxu1 }
 0x6c2   :  { %v7438_v52 = vpack.c.bf16 %v7363_v6, %v7266_v21  ;;  %v7440_v36 = vpack.c.bf16 %v7404_v61, %v7307_v16  ;;  %v7365_v23 = vpop.f32.mrb[222].mxu0  ;;  %v7406_v58 = vpop.f32.mrb[222].mxu1 }
 0x6c3   :  { %v7366_v34 = vpop.f32.mrb[223].mxu0  ;;  %v7407_v59 = vpop.f32.mrb[223].mxu1 }
 0x6c4   :  { %7792 = vmatprep.mubr.bf16.mxu0 %v7438_v52  ;;  %7889 = vmatprep.mubr.bf16.mxu1 %v7440_v36 }
 0x6c5   :  { %7793 = vmatmul.mubr.bf16.gmra.mrb[252].mxu0 %v7437_v45  ;;  %7890 = vmatmul.mubr.bf16.gmra.mrb[252].mxu1 %v7439_v46 }
 0x70c   :  { %v9017_v1 = vpop.f32.mrb[224].mxu0  ;;  %v9081_v12 = vpop.f32.mrb[224].mxu1 }
 0x70d   :  { %v9018_v56 = vpop.f32.mrb[225].mxu0  ;;  %v9082_v35 = vpop.f32.mrb[225].mxu1 }
 0x70e   :  { %v9019_v50 = vadd.f32 %v9018_v56, %v9017_v1  ;;  %v9083_v30 = vadd.f32 %v9082_v35, %v9081_v12  ;;  %v9020_v47 = vpop.f32.mrb[226].mxu0  ;;  %v9084_v2 = vpop.f32.mrb[226].mxu1 }
 0x70f   :  { %v9021_v14 = vpop.f32.mrb[227].mxu0  ;;  %v9085_v38 = vpop.f32.mrb[227].mxu1 }
 0x710   :  { %v7739_v22 = vadd.f32 %v9019_v50, %v12114_v54  ;;  %v9022_v24 = vadd.f32 %v9021_v14, %v9020_v47  ;;  %v9086_v11 = vadd.f32 %v9085_v38, %v9084_v2 }
 0x712   :  { %v7836_v17 = vadd.f32 %v9083_v30, %v7739_v22  ;;  %v7742_v10 = vadd.f32 %v9022_v24, %v12114_v54 }
 0x714   :  { %v7839_v33 = vadd.f32 %v9086_v11, %v7742_v10  ;;  %v7898_v42 = vmax.f32 %v7836_v17, 0.0 }
 0x716   :  { %v7899_v32 = vmax.f32 %v7839_v33, 0.0 }
 0x718   :  { %v7917_v19 = vpack.c.bf16 %v7899_v32, %v7898_v42 }
 0x71a   :  { %9150 = vmatprep.mubr.msk.bf16.mxu0 %vm221_vm1, %v7917_v19 }
 0x720   :  { %v9023_v62 = vpop.f32.mrb[228].mxu0  ;;  %v9087_v43 = vpop.f32.mrb[228].mxu1 }
 0x721   :  { %v9024_v7 = vpop.f32.mrb[229].mxu0  ;;  %v9088_v25 = vpop.f32.mrb[229].mxu1 }
 0x722   :  { %v9025_v29 = vadd.f32 %v9024_v7, %v9023_v62  ;;  %v9089_v20 = vadd.f32 %v9088_v25, %v9087_v43  ;;  %v9026_v4 = vpop.f32.mrb[230].mxu0  ;;  %v9090_v18 = vpop.f32.mrb[230].mxu1 }
 0x723   :  { %v9027_v51 = vpop.f32.mrb[231].mxu0  ;;  %v9091_v49 = vpop.f32.mrb[231].mxu1 }
 0x724   :  { %v7747_v41 = vadd.f32 %v9025_v29, %v12114_v54  ;;  %v9028_v9 = vadd.f32 %v9027_v51, %v9026_v4  ;;  %v9092_v31 = vadd.f32 %v9091_v49, %v9090_v18 }
 0x726   :  { %v7844_v28 = vadd.f32 %v9089_v20, %v7747_v41  ;;  %v7750_v53 = vadd.f32 %v9028_v9, %v12114_v54 }
 0x728   :  { %v7847_v15 = vadd.f32 %v9092_v31, %v7750_v53  ;;  %v7900_v8 = vmax.f32 %v7844_v28, 0.0 }
 0x72a   :  { %v7901_v39 = vmax.f32 %v7847_v15, 0.0 }
 0x72c   :  { %v7918_v63 = vpack.c.bf16 %v7901_v39, %v7900_v8 }
 0x72e   :  { %9151 = vmatmul.mubr.msk.bf16.vlgmr.msra.gmra.mrb[0].mxu0 %vm221_vm1, %v7918_v63 }
 0x734   :  { %v9029_v13 = vpop.f32.mrb[232].mxu0  ;;  %v9093_v3 = vpop.f32.mrb[232].mxu1 }
 0x735   :  { %v9030_v60 = vpop.f32.mrb[233].mxu0  ;;  %v9094_v44 = vpop.f32.mrb[233].mxu1 }
 0x736   :  { %v9031_v26 = vadd.f32 %v9030_v60, %v9029_v13  ;;  %v9095_v55 = vadd.f32 %v9094_v44, %v9093_v3  ;;  %v9032_v40 = vpop.f32.mrb[234].mxu0  ;;  %v9096_v21 = vpop.f32.mrb[234].mxu1 }
 0x737   :  { %v9033_v16 = vpop.f32.mrb[235].mxu0  ;;  %v9097_v48 = vpop.f32.mrb[235].mxu1 }
 0x738   :  { %v7755_v27 = vadd.f32 %v9031_v26, %v12114_v54  ;;  %v9034_v5 = vadd.f32 %v9033_v16, %v9032_v40  ;;  %v9098_v0 = vadd.f32 %v9097_v48, %v9096_v21 }
 0x73a   :  { %v7852_v57 = vadd.f32 %v9095_v55, %v7755_v27  ;;  %v7758_v37 = vadd.f32 %v9034_v5, %v12114_v54 }
 0x73c   :  { %v7855_v45 = vadd.f32 %v9098_v0, %v7758_v37  ;;  %v7902_v46 = vmax.f32 %v7852_v57, 0.0 }
 0x73e   :  { %v7903_v6 = vmax.f32 %v7855_v45, 0.0 }
 0x740   :  { %v7919_v61 = vpack.c.bf16 %v7903_v6, %v7902_v46 }
 0x742   :  { %9154 = vmatprep.mubr.msk.bf16.mxu0 %vm221_vm1, %v7919_v61 }
 0x748   :  { %v9035_v52 = vpop.f32.mrb[236].mxu0  ;;  %v9099_v36 = vpop.f32.mrb[236].mxu1 }
 0x749   :  { %v9036_v23 = vpop.f32.mrb[237].mxu0  ;;  %v9100_v58 = vpop.f32.mrb[237].mxu1 }
 0x74a   :  { %v9037_v34 = vadd.f32 %v9036_v23, %v9035_v52  ;;  %v9101_v59 = vadd.f32 %v9100_v58, %v9099_v36  ;;  %v9038_v1 = vpop.f32.mrb[238].mxu0  ;;  %v9102_v12 = vpop.f32.mrb[238].mxu1 }
 0x74b   :  { %v9039_v56 = vpop.f32.mrb[239].mxu0  ;;  %v9103_v35 = vpop.f32.mrb[239].mxu1 }
 0x74c   :  { %v7763_v50 = vadd.f32 %v9037_v34, %v12114_v54  ;;  %v9040_v30 = vadd.f32 %v9039_v56, %v9038_v1  ;;  %v9104_v47 = vadd.f32 %v9103_v35, %v9102_v12  ;;  %v10073_v34 = vld [vmem:[#allocation14] sm:$0xff]  }
 0x74d   :  { %9166 = vmatprep.subr.bf16.mxu1 %v10073_v34 }
 0x74e   :  { %v7860_v2 = vadd.f32 %v9101_v59, %v7763_v50  ;;  %v7766_v14 = vadd.f32 %v9040_v30, %v12114_v54  ;;  %9167 = vmatpush3.bf16.msra.mxu1 %v10073_v34  ;;  %v10074_v50 = vld [vmem:[#allocation14 + $0x8] sm:$0xff]  }
 0x74f   :  { %9168 = vmatprep.subr.bf16.mxu1 %v10074_v50 }
 0x750   :  { %v7863_v38 = vadd.f32 %v9104_v47, %v7766_v14  ;;  %v7904_v22 = vmax.f32 %v7860_v2, 0.0 }
 0x752   :  { %v7905_v24 = vmax.f32 %v7863_v38, 0.0  ;;  %9169 = vmatpush3.bf16.msra.mxu1 %v10074_v50 }
 0x754   :  { %v7920_v11 = vpack.c.bf16 %v7905_v24, %v7904_v22 }
 0x756   :  { %9155 = vmatmul.mubr.msk.bf16.gmra.mrb[4].mxu0 %vm221_vm1, %v7920_v11 }
 0x75c   :  { %v9041_v17 = vpop.f32.mrb[240].mxu0  ;;  %v9105_v10 = vpop.f32.mrb[240].mxu1 }
 0x75d   :  { %v9042_v33 = vpop.f32.mrb[241].mxu0  ;;  %v9106_v42 = vpop.f32.mrb[241].mxu1 }
 0x75e   :  { %v9043_v32 = vadd.f32 %v9042_v33, %v9041_v17  ;;  %v9107_v19 = vadd.f32 %v9106_v42, %v9105_v10  ;;  %v9044_v62 = vpop.f32.mrb[242].mxu0  ;;  %v9108_v43 = vpop.f32.mrb[242].mxu1 }
 0x75f   :  { %v9045_v7 = vpop.f32.mrb[243].mxu0  ;;  %v9109_v25 = vpop.f32.mrb[243].mxu1 }
 0x760   :  { %v7771_v29 = vadd.f32 %v9043_v32, %v12114_v54  ;;  %v9046_v20 = vadd.f32 %v9045_v7, %v9044_v62  ;;  %v9110_v4 = vadd.f32 %v9109_v25, %v9108_v43 }
 0x762   :  { %v7868_v18 = vadd.f32 %v9107_v19, %v7771_v29  ;;  %v7774_v51 = vadd.f32 %v9046_v20, %v12114_v54 }
 0x764   :  { %v7871_v49 = vadd.f32 %v9110_v4, %v7774_v51  ;;  %v7906_v41 = vmax.f32 %v7868_v18, 0.0 }
 0x766   :  { %v7907_v9 = vmax.f32 %v7871_v49, 0.0  ;;  %v12140_v49 = vld [vmem:[#allocation11] ss:$0 sm:$0xff] }
 0x768   :  { %v7921_v31 = vpack.c.bf16 %v7907_v9, %v7906_v41  ;;  %v12142_v41 = vld [vmem:[#allocation13] ss:$0 sm:$0xff] }
 0x76a   :  { %9158 = vmatprep.mubr.msk.bf16.mxu0 %vm221_vm1, %v7921_v31 }
 0x770   :  { %v9047_v28 = vpop.f32.mrb[244].mxu0  ;;  %v9111_v53 = vpop.f32.mrb[244].mxu1 }
 0x771   :  { %v9048_v15 = vpop.f32.mrb[245].mxu0  ;;  %v9112_v8 = vpop.f32.mrb[245].mxu1 }
 0x772   :  { %v9049_v39 = vadd.f32 %v9048_v15, %v9047_v28  ;;  %v9113_v63 = vadd.f32 %v9112_v8, %v9111_v53  ;;  %v9050_v13 = vpop.f32.mrb[246].mxu0  ;;  %v9114_v3 = vpop.f32.mrb[246].mxu1 }
 0x773   :  { %v9051_v60 = vpop.f32.mrb[247].mxu0  ;;  %v9115_v44 = vpop.f32.mrb[247].mxu1 }
 0x774   :  { %v7779_v26 = vadd.f32 %v9049_v39, %v12114_v54  ;;  %v9052_v55 = vadd.f32 %v9051_v60, %v9050_v13  ;;  %v9116_v40 = vadd.f32 %v9115_v44, %v9114_v3 }
 0x776   :  { %v7876_v21 = vadd.f32 %v9113_v63, %v7779_v26  ;;  %v7782_v16 = vadd.f32 %v9052_v55, %v12114_v54 }
 0x778   :  { %v7879_v48 = vadd.f32 %v9116_v40, %v7782_v16  ;;  %v7908_v27 = vmax.f32 %v7876_v21, 0.0 }
 0x77a   :  { %v7909_v5 = vmax.f32 %v7879_v48, 0.0 }
 0x77c   :  { %v7922_v0 = vpack.c.bf16 %v7909_v5, %v7908_v27 }
 0x77e   :  { %9159 = vmatmul.mubr.msk.bf16.gmra.mrb[8].mxu0 %vm221_vm1, %v7922_v0 }
 0x784   :  { %v9053_v57 = vpop.f32.mrb[248].mxu0  ;;  %v9117_v37 = vpop.f32.mrb[248].mxu1 }
 0x785   :  { %v9054_v45 = vpop.f32.mrb[249].mxu0  ;;  %v9118_v46 = vpop.f32.mrb[249].mxu1 }
 0x786   :  { %v9055_v6 = vadd.f32 %v9054_v45, %v9053_v57  ;;  %v9119_v61 = vadd.f32 %v9118_v46, %v9117_v37  ;;  %v9056_v52 = vpop.f32.mrb[250].mxu0  ;;  %v9120_v36 = vpop.f32.mrb[250].mxu1 }
 0x787   :  { %v9057_v23 = vpop.f32.mrb[251].mxu0  ;;  %v9121_v58 = vpop.f32.mrb[251].mxu1 }
 0x788   :  { %v7787_v59 = vadd.f32 %v9055_v6, %v12114_v54  ;;  %v9058_v1 = vadd.f32 %v9057_v23, %v9056_v52  ;;  %v9122_v12 = vadd.f32 %v9121_v58, %v9120_v36 }
 0x78a   :  { %v7884_v56 = vadd.f32 %v9119_v61, %v7787_v59  ;;  %v7790_v35 = vadd.f32 %v9058_v1, %v12114_v54 }
 0x78c   :  { %v7887_v30 = vadd.f32 %v9122_v12, %v7790_v35  ;;  %v7910_v47 = vmax.f32 %v7884_v56, 0.0 }
 0x78e   :  { %v7911_v2 = vmax.f32 %v7887_v30, 0.0 }
 0x790   :  { %v7923_v14 = vpack.c.bf16 %v7911_v2, %v7910_v47 }
 0x792   :  { %9162 = vmatprep.mubr.msk.bf16.mxu0 %vm221_vm1, %v7923_v14 }
 0x798   :  { %v9059_v38 = vpop.f32.mrb[252].mxu0  ;;  %v9123_v22 = vpop.f32.mrb[252].mxu1 }
 0x799   :  { %v9060_v24 = vpop.f32.mrb[253].mxu0  ;;  %v9124_v11 = vpop.f32.mrb[253].mxu1 }
 0x79a   :  { %v9061_v17 = vadd.f32 %v9060_v24, %v9059_v38  ;;  %v9125_v10 = vadd.f32 %v9124_v11, %v9123_v22  ;;  %v9062_v33 = vpop.f32.mrb[254].mxu0  ;;  %v9126_v42 = vpop.f32.mrb[254].mxu1 }
 0x79b   :  { %v9063_v32 = vpop.f32.mrb[255].mxu0  ;;  %v9127_v19 = vpop.f32.mrb[255].mxu1 }
 0x79c   :  { %v7795_v62 = vadd.f32 %v9061_v17, %v12114_v54  ;;  %v9064_v43 = vadd.f32 %v9063_v32, %v9062_v33  ;;  %v9128_v7 = vadd.f32 %v9127_v19, %v9126_v42 }
 0x79e   :  { %v7892_v25 = vadd.f32 %v9125_v10, %v7795_v62  ;;  %v7798_v29 = vadd.f32 %v9064_v43, %v12114_v54 }
 0x7a0   :  { %v7895_v20 = vadd.f32 %v9128_v7, %v7798_v29  ;;  %v7912_v4 = vmax.f32 %v7892_v25, 0.0 }
 0x7a2   :  { %v7913_v18 = vmax.f32 %v7895_v20, 0.0 }
 0x7a4   :  { %v7924_v51 = vpack.c.bf16 %v7913_v18, %v7912_v4 }
 0x7a6   :  { %9163 = vmatmul.mubr.msk.bf16.gmra.mrb[12].mxu0 %vm221_vm1, %v7924_v51 }
 0x801   :  { %v9152_v9 = vpop.f32.mrb[0].mxu0 }
 0x802   :  { %v8057_v31 = vmul.f32 %v9152_v9, %v12140_v49  ;;  %v7986_v28 = vpop.f32.mrb[1].mxu0 }
 0x803   :  { %v8055_v53 = vmul.f32 %v12140_v49, %v7986_v28  ;;  %v9153_v15 = vpop.f32.mrb[2].mxu0 }
 0x804   :  { %v8079_v8 = vadd.f32 %v12142_v41, %v8057_v31  ;;  %v8058_v54 = vmul.f32 %v9153_v15, %v12140_v49  ;;  %v7989_v39 = vpop.f32.mrb[3].mxu0 }
 0x805   :  { %v8077_v63 = vadd.f32 %v12142_v41, %v8055_v53  ;;  %v8056_v13 = vmul.f32 %v12140_v49, %v7989_v39 }
 0x806   :  { %v8080_v3 = vadd.f32 %v12142_v41, %v8058_v54  ;;  %v8095_v44 = vmax.f32 %v8079_v8, 0.0 }
 0x807   :  { %v8078_v60 = vadd.f32 %v12142_v41, %v8056_v13  ;;  %v8093_v55 = vmax.f32 %v8077_v63, 0.0 }
 0x808   :  { %v8096_v26 = vmax.f32 %v8080_v3, 0.0  ;;  %v12184_v3 = vld [vmem:[#allocation16] ss:$0 sm:$0xff] }
 0x809   :  { %v8094_v40 = vmax.f32 %v8078_v60, 0.0  ;;  %v12186_v60 = vld [vmem:[#allocation17] ss:$0 sm:$0xff] }
 0x80a   :  { %v8116_v21 = vpack.c.bf16 %v8096_v26, %v8095_v44 }
 0x80b   :  { %v8115_v16 = vpack.c.bf16 %v8094_v40, %v8093_v55 }
 0x80d   :  { %9170 = vmatprep.mubr.msk.bf16.mxu1 %vm8135_vm2, %v8115_v16 }
 0x80e   :  { %9171 = vmatmul.mubr.msk.bf16.vlgmr.msra.gmra.mrb[0].mxu1 %vm8135_vm2, %v8116_v21 }
 0x829   :  { %v9156_v48 = vpop.f32.mrb[4].mxu0 }
 0x82a   :  { %v8061_v27 = vmul.f32 %v9156_v48, %v12140_v49  ;;  %v8002_v5 = vpop.f32.mrb[5].mxu0 }
 0x82b   :  { %v8059_v0 = vmul.f32 %v12140_v49, %v8002_v5  ;;  %v9157_v57 = vpop.f32.mrb[6].mxu0 }
 0x82c   :  { %v8083_v37 = vadd.f32 %v12142_v41, %v8061_v27  ;;  %v8062_v45 = vmul.f32 %v9157_v57, %v12140_v49  ;;  %v8005_v46 = vpop.f32.mrb[7].mxu0 }
 0x82d   :  { %v8081_v6 = vadd.f32 %v12142_v41, %v8059_v0  ;;  %v8060_v61 = vmul.f32 %v12140_v49, %v8005_v46 }
 0x82e   :  { %v8084_v52 = vadd.f32 %v12142_v41, %v8062_v45  ;;  %v8099_v23 = vmax.f32 %v8083_v37, 0.0 }
 0x82f   :  { %v8082_v36 = vadd.f32 %v12142_v41, %v8060_v61  ;;  %v8097_v34 = vmax.f32 %v8081_v6, 0.0 }
 0x830   :  { %v8100_v58 = vmax.f32 %v8084_v52, 0.0 }
 0x831   :  { %v8098_v59 = vmax.f32 %v8082_v36, 0.0 }
 0x832   :  { %v8118_v1 = vpack.c.bf16 %v8100_v58, %v8099_v23 }
 0x833   :  { %v8117_v12 = vpack.c.bf16 %v8098_v59, %v8097_v34 }
 0x835   :  { %9174 = vmatprep.mubr.msk.bf16.mxu1 %vm8135_vm2, %v8117_v12 }
 0x836   :  { %9175 = vmatmul.mubr.msk.bf16.gmra.mrb[4].mxu1 %vm8135_vm2, %v8118_v1 }
 0x851   :  { %v9160_v56 = vpop.f32.mrb[8].mxu0 }
 0x852   :  { %v8065_v35 = vmul.f32 %v9160_v56, %v12140_v49  ;;  %v8018_v50 = vpop.f32.mrb[9].mxu0 }
 0x853   :  { %v8063_v30 = vmul.f32 %v12140_v49, %v8018_v50  ;;  %v9161_v47 = vpop.f32.mrb[10].mxu0 }
 0x854   :  { %v8087_v2 = vadd.f32 %v12142_v41, %v8065_v35  ;;  %v8066_v14 = vmul.f32 %v9161_v47, %v12140_v49  ;;  %v8021_v38 = vpop.f32.mrb[11].mxu0 }
 0x855   :  { %v8085_v22 = vadd.f32 %v12142_v41, %v8063_v30  ;;  %v8064_v24 = vmul.f32 %v12140_v49, %v8021_v38 }
 0x856   :  { %v8088_v11 = vadd.f32 %v12142_v41, %v8066_v14  ;;  %v8103_v10 = vmax.f32 %v8087_v2, 0.0 }
 0x857   :  { %v8086_v17 = vadd.f32 %v12142_v41, %v8064_v24  ;;  %v8101_v42 = vmax.f32 %v8085_v22, 0.0 }
 0x858   :  { %v8104_v33 = vmax.f32 %v8088_v11, 0.0 }
 0x859   :  { %v8102_v32 = vmax.f32 %v8086_v17, 0.0 }
 0x85a   :  { %v8120_v19 = vpack.c.bf16 %v8104_v33, %v8103_v10 }
 0x85b   :  { %v8119_v62 = vpack.c.bf16 %v8102_v32, %v8101_v42 }
 0x85d   :  { %9178 = vmatprep.mubr.msk.bf16.mxu1 %vm8135_vm2, %v8119_v62 }
 0x85e   :  { %9179 = vmatmul.mubr.msk.bf16.gmra.mrb[8].mxu1 %vm8135_vm2, %v8120_v19 }
 0x879   :  { %v9164_v43 = vpop.f32.mrb[12].mxu0 }
 0x87a   :  { %v8069_v7 = vmul.f32 %v9164_v43, %v12140_v49  ;;  %v8034_v25 = vpop.f32.mrb[13].mxu0 }
 0x87b   :  { %v8067_v29 = vmul.f32 %v12140_v49, %v8034_v25  ;;  %v9165_v20 = vpop.f32.mrb[14].mxu0 }
 0x87c   :  { %v8091_v4 = vadd.f32 %v12142_v41, %v8069_v7  ;;  %v8070_v18 = vmul.f32 %v9165_v20, %v12140_v49  ;;  %v8037_v51 = vpop.f32.mrb[15].mxu0 }
 0x87d   :  { %v8089_v9 = vadd.f32 %v12142_v41, %v8067_v29  ;;  %v8068_v31 = vmul.f32 %v12140_v49, %v8037_v51 }
 0x87e   :  { %v8092_v28 = vadd.f32 %v12142_v41, %v8070_v18  ;;  %v8107_v15 = vmax.f32 %v8091_v4, 0.0 }
 0x87f   :  { %v8090_v53 = vadd.f32 %v12142_v41, %v8068_v31  ;;  %v8105_v54 = vmax.f32 %v8089_v9, 0.0 }
 0x880   :  { %v8108_v8 = vmax.f32 %v8092_v28, 0.0 }
 0x881   :  { %v8106_v39 = vmax.f32 %v8090_v53, 0.0 }
 0x882   :  { %v8122_v63 = vpack.c.bf16 %v8108_v8, %v8107_v15 }
 0x883   :  { %v8121_v13 = vpack.c.bf16 %v8106_v39, %v8105_v54 }
 0x885   :  { %9182 = vmatprep.mubr.msk.bf16.mxu1 %vm8135_vm2, %v8121_v13 }
 0x886   :  { %9183 = vmatmul.mubr.msk.bf16.gmra.mrb[12].mxu1 %vm8135_vm2, %v8122_v63 }
 0x8e1   :  { %v9172_v44 = vpop.f32.mrb[0].mxu1 }
 0x8e2   :  { %v8265_v49 = vmul.f32 %v9172_v44, %v12184_v3  ;;  %v8194_v26 = vpop.f32.mrb[1].mxu1 }
 0x8e3   :  { %v8263_v41 = vmul.f32 %v12184_v3, %v8194_v26  ;;  %v9173_v55 = vpop.f32.mrb[2].mxu1 }
 0x8e4   :  { %v8287_v40 = vadd.f32 %v12186_v60, %v8265_v49  ;;  %v8266_v21 = vmul.f32 %v9173_v55, %v12184_v3  ;;  %v8197_v16 = vpop.f32.mrb[3].mxu1 }
 0x8e5   :  { %v8285_v48 = vadd.f32 %v12186_v60, %v8263_v41  ;;  %v8264_v27 = vmul.f32 %v12184_v3, %v8197_v16 }
 0x8e6   :  { %v8303_v5 = vmax.f32 %v8287_v40, 0.0  ;;  %v8288_v0 = vadd.f32 %v12186_v60, %v8266_v21 }
 0x8e7   :  { %v8301_v57 = vmax.f32 %v8285_v48, 0.0  ;;  %v8286_v37 = vadd.f32 %v12186_v60, %v8264_v27 }
 0x8e8   :  { %v8329_v45 = vrot.slane %v8303_v5, 4  ;;  %v8304_v46 = vmax.f32 %v8288_v0, 0.0 }
 0x8e9   :  { %v8317_v6 = vrot.slane %v8301_v57, 4  ;;  %v8302_v61 = vmax.f32 %v8286_v37, 0.0 }
 0x8ea   :  { %v8330_v52 = vmax.f32 %v8303_v5, %v8329_v45  ;;  %v8335_v36 = vrot.slane %v8304_v46, 4 }
 0x8eb   :  { %v8318_v23 = vmax.f32 %v8301_v57, %v8317_v6  ;;  %v8323_v58 = vrot.slane %v8302_v61, 4 }
 0x8ec   :  { %v8331_v34 = vrot.slane %v8330_v52, 2  ;;  %v8336_v59 = vmax.f32 %v8304_v46, %v8335_v36 }
 0x8ed   :  { %v8319_v1 = vrot.slane %v8318_v23, 2  ;;  %v8324_v12 = vmax.f32 %v8302_v61, %v8323_v58 }
 0x8ee   :  { %v8332_v56 = vmax.f32 %v8330_v52, %v8331_v34  ;;  %v8337_v35 = vrot.slane %v8336_v59, 2 }
 0x8ef   :  { %v8320_v50 = vmax.f32 %v8318_v23, %v8319_v1  ;;  %v8325_v30 = vrot.slane %v8324_v12, 2 }
 0x8f0   :  { %v8338_v47 = vmax.f32 %v8336_v59, %v8337_v35  ;;  %v8333_v38 = vrot.slane %v8332_v56, 1 }
 0x8f1   :  { %v8321_v2 = vrot.slane %v8320_v50, 1  ;;  %v8326_v14 = vmax.f32 %v8324_v12, %v8325_v30 }
 0x8f2   :  { %v8339_v22 = vrot.slane %v8338_v47, 1  ;;  %v8334_v10 = vmax.f32 %v8332_v56, %v8333_v38 }
 0x8f3   :  { %v8327_v24 = vrot.slane %v8326_v14, 1  ;;  %v8322_v11 = vmax.f32 %v8320_v50, %v8321_v2 }
 0x8f4   :  { %v8340_v33 = vmax.f32 %v8338_v47, %v8339_v22 }
 0x8f5   :  { %v8328_v17 = vmax.f32 %v8326_v14, %v8327_v24 }
 0x8f7   :  { %v8430_v42 = vsel %vm8429_vm3, %v8328_v17, %v8322_v11 }
 0x8f8   :  { %v8432_v32 = vsel %vm8431_vm4, %v8334_v10, %v8430_v42 }
 0x8f9   :  { %v8434_v19 = vsel %vm8433_vm5, %v8340_v33, %v8432_v32 }
 0x909   :  { %v9176_v62 = vpop.f32.mrb[4].mxu1 }
 0x90a   :  { %v8269_v43 = vmul.f32 %v9176_v62, %v12184_v3  ;;  %v8210_v7 = vpop.f32.mrb[5].mxu1 }
 0x90b   :  { %v8267_v25 = vmul.f32 %v12184_v3, %v8210_v7  ;;  %v9177_v29 = vpop.f32.mrb[6].mxu1 }
 0x90c   :  { %v8291_v20 = vadd.f32 %v12186_v60, %v8269_v43  ;;  %v8270_v4 = vmul.f32 %v9177_v29, %v12184_v3  ;;  %v8213_v18 = vpop.f32.mrb[7].mxu1 }
 0x90d   :  { %v8289_v51 = vadd.f32 %v12186_v60, %v8267_v25  ;;  %v8268_v9 = vmul.f32 %v12184_v3, %v8213_v18 }
 0x90e   :  { %v8307_v31 = vmax.f32 %v8291_v20, 0.0  ;;  %v8292_v28 = vadd.f32 %v12186_v60, %v8270_v4 }
 0x90f   :  { %v8305_v53 = vmax.f32 %v8289_v51, 0.0  ;;  %v8290_v15 = vadd.f32 %v12186_v60, %v8268_v9 }
 0x910   :  { %v8353_v8 = vrot.slane %v8307_v31, 4  ;;  %v8308_v54 = vmax.f32 %v8292_v28, 0.0 }
 0x911   :  { %v8341_v39 = vrot.slane %v8305_v53, 4  ;;  %v8306_v63 = vmax.f32 %v8290_v15, 0.0 }
 0x912   :  { %v8354_v13 = vmax.f32 %v8307_v31, %v8353_v8  ;;  %v8359_v44 = vrot.slane %v8308_v54, 4 }
 0x913   :  { %v8342_v49 = vmax.f32 %v8305_v53, %v8341_v39  ;;  %v8347_v26 = vrot.slane %v8306_v63, 4 }
 0x914   :  { %v8355_v41 = vrot.slane %v8354_v13, 2  ;;  %v8360_v55 = vmax.f32 %v8308_v54, %v8359_v44 }
 0x915   :  { %v8343_v40 = vrot.slane %v8342_v49, 2  ;;  %v8348_v21 = vmax.f32 %v8306_v63, %v8347_v26 }
 0x916   :  { %v8356_v16 = vmax.f32 %v8354_v13, %v8355_v41  ;;  %v8361_v48 = vrot.slane %v8360_v55, 2 }
 0x917   :  { %v8344_v27 = vmax.f32 %v8342_v49, %v8343_v40  ;;  %v8349_v5 = vrot.slane %v8348_v21, 2 }
 0x918   :  { %v8362_v0 = vmax.f32 %v8360_v55, %v8361_v48  ;;  %v8357_v45 = vrot.slane %v8356_v16, 1 }
 0x919   :  { %v8345_v57 = vrot.slane %v8344_v27, 1  ;;  %v8350_v37 = vmax.f32 %v8348_v21, %v8349_v5 }
 0x91a   :  { %v8363_v6 = vrot.slane %v8362_v0, 1  ;;  %v8358_v23 = vmax.f32 %v8356_v16, %v8357_v45 }
 0x91b   :  { %v8346_v46 = vmax.f32 %v8344_v27, %v8345_v57  ;;  %v8351_v61 = vrot.slane %v8350_v37, 1 }
 0x91c   :  { %v8364_v58 = vmax.f32 %v8362_v0, %v8363_v6 }
 0x91d   :  { %v8436_v52 = vsel %vm8435_vm6, %v8346_v46, %v8434_v19  ;;  %v8352_v36 = vmax.f32 %v8350_v37, %v8351_v61 }
 0x91f   :  { %v8438_v34 = vsel %vm8437_vm7, %v8352_v36, %v8436_v52 }
 0x920   :  { %v8440_v59 = vsel %vm8439_vm8, %v8358_v23, %v8438_v34 }
 0x921   :  { %v8442_v1 = vsel %vm8441_vm9, %v8364_v58, %v8440_v59 }
 0x922   :  { %8452 = vst [vmem:[#allocation19] sm:$0xff] %v8442_v1 }
 0x931   :  { %v9180_v12 = vpop.f32.mrb[8].mxu1 }
 0x932   :  { %v8273_v56 = vmul.f32 %v9180_v12, %v12184_v3  ;;  %v8226_v35 = vpop.f32.mrb[9].mxu1 }
 0x933   :  { %v8271_v50 = vmul.f32 %v12184_v3, %v8226_v35  ;;  %v9181_v30 = vpop.f32.mrb[10].mxu1 }
 0x934   :  { %v8295_v47 = vadd.f32 %v12186_v60, %v8273_v56  ;;  %v8274_v2 = vmul.f32 %v9181_v30, %v12184_v3  ;;  %v8229_v14 = vpop.f32.mrb[11].mxu1 }
 0x935   :  { %v8293_v38 = vadd.f32 %v12186_v60, %v8271_v50  ;;  %v8272_v22 = vmul.f32 %v12184_v3, %v8229_v14 }
 0x936   :  { %v8311_v24 = vmax.f32 %v8295_v47, 0.0  ;;  %v8296_v11 = vadd.f32 %v12186_v60, %v8274_v2 }
 0x937   :  { %v8309_v17 = vmax.f32 %v8293_v38, 0.0  ;;  %v8294_v10 = vadd.f32 %v12186_v60, %v8272_v22 }
 0x938   :  { %v8377_v33 = vrot.slane %v8311_v24, 4  ;;  %v8312_v42 = vmax.f32 %v8296_v11, 0.0 }
 0x939   :  { %v8365_v32 = vrot.slane %v8309_v17, 4  ;;  %v8310_v19 = vmax.f32 %v8294_v10, 0.0 }
 0x93a   :  { %v8378_v62 = vmax.f32 %v8311_v24, %v8377_v33  ;;  %v8383_v43 = vrot.slane %v8312_v42, 4 }
 0x93b   :  { %v8366_v7 = vmax.f32 %v8309_v17, %v8365_v32  ;;  %v8371_v25 = vrot.slane %v8310_v19, 4 }
 0x93c   :  { %v8379_v29 = vrot.slane %v8378_v62, 2  ;;  %v8384_v20 = vmax.f32 %v8312_v42, %v8383_v43 }
 0x93d   :  { %v8367_v4 = vrot.slane %v8366_v7, 2  ;;  %v8372_v18 = vmax.f32 %v8310_v19, %v8371_v25 }
 0x93e   :  { %v8380_v51 = vmax.f32 %v8378_v62, %v8379_v29  ;;  %v8385_v9 = vrot.slane %v8384_v20, 2 }
 0x93f   :  { %v8368_v31 = vmax.f32 %v8366_v7, %v8367_v4  ;;  %v8373_v28 = vrot.slane %v8372_v18, 2 }
 0x940   :  { %v8386_v53 = vmax.f32 %v8384_v20, %v8385_v9  ;;  %v8381_v54 = vrot.slane %v8380_v51, 1 }
 0x941   :  { %v8369_v15 = vrot.slane %v8368_v31, 1  ;;  %v8374_v8 = vmax.f32 %v8372_v18, %v8373_v28 }
 0x942   :  { %v8387_v39 = vrot.slane %v8386_v53, 1  ;;  %v8382_v49 = vmax.f32 %v8380_v51, %v8381_v54 }
 0x943   :  { %v8375_v63 = vrot.slane %v8374_v8, 1  ;;  %v8370_v13 = vmax.f32 %v8368_v31, %v8369_v15 }
 0x944   :  { %v8388_v26 = vmax.f32 %v8386_v53, %v8387_v39 }
 0x945   :  { %v8376_v44 = vmax.f32 %v8374_v8, %v8375_v63 }
 0x947   :  { %v8443_v41 = vsel %vm8429_vm3, %v8376_v44, %v8370_v13 }
 0x948   :  { %v8444_v55 = vsel %vm8431_vm4, %v8382_v49, %v8443_v41 }
 0x949   :  { %v8445_v40 = vsel %vm8433_vm5, %v8388_v26, %v8444_v55 }
 0x959   :  { %v9184_v21 = vpop.f32.mrb[12].mxu1 }
 0x95a   :  { %v8277_v16 = vmul.f32 %v9184_v21, %v12184_v3  ;;  %v8242_v48 = vpop.f32.mrb[13].mxu1 }
 0x95b   :  { %v8275_v27 = vmul.f32 %v12184_v3, %v8242_v48  ;;  %v9185_v5 = vpop.f32.mrb[14].mxu1 }
 0x95c   :  { %v8299_v0 = vadd.f32 %v12186_v60, %v8277_v16  ;;  %v8278_v57 = vmul.f32 %v9185_v5, %v12184_v3  ;;  %v8245_v37 = vpop.f32.mrb[15].mxu1 }
 0x95d   :  { %v8297_v45 = vadd.f32 %v12186_v60, %v8275_v27  ;;  %v8276_v46 = vmul.f32 %v12184_v3, %v8245_v37 }
 0x95e   :  { %v8315_v6 = vmax.f32 %v8299_v0, 0.0  ;;  %v8300_v61 = vadd.f32 %v12186_v60, %v8278_v57 }
 0x95f   :  { %v8313_v52 = vmax.f32 %v8297_v45, 0.0  ;;  %v8298_v36 = vadd.f32 %v12186_v60, %v8276_v46 }
 0x960   :  { %v8401_v23 = vrot.slane %v8315_v6, 4  ;;  %v8316_v58 = vmax.f32 %v8300_v61, 0.0 }
 0x961   :  { %v8389_v34 = vrot.slane %v8313_v52, 4  ;;  %v8314_v59 = vmax.f32 %v8298_v36, 0.0 }
 0x962   :  { %v8402_v1 = vmax.f32 %v8315_v6, %v8401_v23  ;;  %v8407_v12 = vrot.slane %v8316_v58, 4 }
 0x963   :  { %v8390_v56 = vmax.f32 %v8313_v52, %v8389_v34  ;;  %v8395_v35 = vrot.slane %v8314_v59, 4 }
 0x964   :  { %v8403_v50 = vrot.slane %v8402_v1, 2  ;;  %v8408_v30 = vmax.f32 %v8316_v58, %v8407_v12 }
 0x965   :  { %v8391_v47 = vrot.slane %v8390_v56, 2  ;;  %v8396_v2 = vmax.f32 %v8314_v59, %v8395_v35 }
 0x966   :  { %v8404_v14 = vmax.f32 %v8402_v1, %v8403_v50  ;;  %v8409_v3 = vrot.slane %v8408_v30, 2 }
 0x967   :  { %v8392_v38 = vmax.f32 %v8390_v56, %v8391_v47  ;;  %v8397_v22 = vrot.slane %v8396_v2, 2 }
 0x968   :  { %v8410_v24 = vmax.f32 %v8408_v30, %v8409_v3  ;;  %v8405_v60 = vrot.slane %v8404_v14, 1 }
 0x969   :  { %v8393_v11 = vrot.slane %v8392_v38, 1  ;;  %v8398_v17 = vmax.f32 %v8396_v2, %v8397_v22 }
 0x96a   :  { %v8411_v33 = vrot.slane %v8410_v24, 1  ;;  %v8406_v62 = vmax.f32 %v8404_v14, %v8405_v60 }
 0x96b   :  { %v8394_v10 = vmax.f32 %v8392_v38, %v8393_v11  ;;  %v8399_v42 = vrot.slane %v8398_v17, 1 }
 0x96c   :  { %v8412_v43 = vmax.f32 %v8410_v24, %v8411_v33 }
 0x96d   :  { %v8446_v32 = vsel %vm8435_vm6, %v8394_v10, %v8445_v40  ;;  %v8400_v19 = vmax.f32 %v8398_v17, %v8399_v42 }
 0x96f   :  { %v8447_v7 = vsel %vm8437_vm7, %v8400_v19, %v8446_v32 }
 0x970   :  { %v8448_v25 = vsel %vm8439_vm8, %v8406_v62, %v8447_v7 }
 0x971   :  { %v8449_v29 = vsel %vm8441_vm9, %v8412_v43, %v8448_v25 }
 0x972   :  { %8453 = vst [vmem:[#allocation19 + $0x8] sm:$0xff] %v8449_v29 }
 0x973   :  { %10370 = shalt.err (!%p10367_p0)
}
 0x974   :  { %s10371_s8 = scalar_lea.hbm %s12258_s12, 256 }
 0x975   :  { %p10372_p1 = scmp.ne.s32.totalorder %s12258_s12, %s10371_s8  ;;  %p10375_p2 = scmp.lt.u32.totalorder %s10371_s8, %s12258_s12 }
 0x977   :  { %p10377_p3 = pnand %p10375_p2, %p10372_p1 }
 0x979   :  { %10380 = shalt.err (!%p10377_p3)
}
 0x97a   :  { %s10411_s14 = smov 128   ;;  %s10412_s7 = smov 8  }
 0x97b   :  { %8465 = dma.vmem_to_hbm [thread:$0]  %s8460_s13, 256, %s12258_s12, [#allocation4], %s10411_s14, %s10411_s14, %s10412_s7  }
 0x97c   :  { %10393 = dma.done.wait [#allocation4], 256  }
 0x97d   :  { %10394 = vsyncadd [#allocation4], 4294967040 }
 0x97e   :  { %8469 = vsyncpa [#allocation3], 1 }
 0x97f   :  { %8470 = vsyncpa [#allocation6], 1 }
 0x980   :  { %8471 = vsyncpa [#allocation9], 1 }
 0x981   :  { %8472 = vsyncpa [#allocation12], 1 }
 0x982   :  { %8473 = vsyncpa [#allocation15], 1 }
 0x983   :  { %8474 = vsyncpa [#allocation18], 1 }
 0x984   :  { %8475 = vsyncpa [#allocation4], 1 }

</bundles_post_ra>
